<compile_context>
chip_gen: v7x
topology: tpu7x:2x2x1
jax: 0.10.0
libtpu: 0.0.40
codegen_flags: <defaults>
</compile_context>

<pallas_src>
import functools

import jax
import jax.numpy as jnp
from jax.experimental import pallas as pl
from jax.experimental.pallas import tpu as pltpu


# ----------------------------- fused Pallas kernel ---------------------------

def _basic_block2_kernel(xc_ref, mask_ref, wf_ref, wc_ref, o_ref, *, Wp, p2):
    # xc_ref:   (1, Cin, Ll)       flattened zero-padded canvas (zero ring/tail)
    # mask_ref: (1, Ll)            1.0 on canvas interior, 0.0 on ring + tail
    # wf_ref:   (2, 2*p2, 9*Cin+1) fused branch GEMM weights, bias = last column
    # wc_ref:   (4, p2, 9*p2+1)    chain GEMM weights, bias = last column
    # o_ref:    (1, 2*p2, Ll)      output canvas (interior = block output)
    Ll = xc_ref.shape[-1]
    mask = mask_ref[...]                                       # (1, Ll)

    # Conv output at canvas lane q needs input lane q + s, s = (dy-1)*Wp+(dx-1).
    # roll(x, -s)[q] == x[q + s] for every interior q (never wraps); ring/tail
    # outputs are garbage but are masked (intermediate) or cropped (final).
    shifts = [((1 - dy) * Wp + (1 - dx)) % Ll
              for dy in range(3) for dx in range(3)]

    def build_patch(parts):
        # im2col patch: tap-major, then channels of `parts` in order.
        # The appended mask row folds the bias into the GEMM.
        rows = []
        for sh in shifts:
            for a in parts:
                rows.append(a if sh == 0 else pltpu.roll(a, shift=sh, axis=1))
        rows.append(mask)
        return jnp.concatenate(rows, axis=0)                   # (9*C + 1, Ll)

    def conv(w, parts, masked=True):
        out = jnp.dot(w, build_patch(parts),
                      preferred_element_type=jnp.float32)      # one MXU GEMM
        out = jnp.maximum(out, 0.0)                            # folded BN+ReLU
        return out * mask if masked else out                   # re-zero ring

    x = xc_ref[0]                                              # (Cin, Ll)

    # Fused GEMM 1: rows [:p2] = conv1_1[0]+BN+ReLU, rows [p2:] = conv1_2+bn2+ReLU
    y1 = conv(wf_ref[0], [x])                                  # (2*p2, Ll)
    h = conv(wc_ref[0], [y1[:p2, :]])                          # conv1_1[3]+BN+ReLU
    out1_1 = conv(wc_ref[1], [h])                              # conv1_1[6]+bn1+ReLU
    out1_2 = y1[p2:, :]

    # Fused GEMM 2 on x2 = cat(out1_1, out1_2) -- x2 is never materialized,
    # its halves feed the patch directly in the module's channel order.
    y2 = conv(wf_ref[1], [out1_1, out1_2], masked=False)       # (2*p2, Ll)
    h = conv(wc_ref[2], [y2[:p2, :] * mask])                   # conv2_1[3]+BN+ReLU
    out2_1 = conv(wc_ref[3], [h], masked=False)                # conv2_1[6]+bn3+ReLU

    # Final channel concat == two sublane-range stores (no concat copy).
    o_ref[0, 0:p2, :] = out2_1
    o_ref[0, p2:2 * p2, :] = y2[p2:, :]                        # conv2_2+bn4+ReLU


# ----------------------- parameters (deterministic) ---------------------------

def _make_conv(key, cin, cout):
    kw, kb = jax.random.split(key)
    w = 0.1 * jax.random.normal(kw, (3, 3, cin, cout), jnp.float32)   # HWIO
    b = 0.1 * jax.random.normal(kb, (cout,), jnp.float32)
    return w, b


def _make_bn(key, c):
    k1, k2, k3, k4 = jax.random.split(key, 4)
    gamma = 1.0 + 0.1 * jax.random.normal(k1, (c,), jnp.float32)
    beta = 0.1 * jax.random.normal(k2, (c,), jnp.float32)
    mean = 0.1 * jax.random.normal(k3, (c,), jnp.float32)
    var = jax.random.uniform(k4, (c,), jnp.float32, minval=0.5, maxval=1.5)
    return gamma, beta, mean, var


def init_params(key, inplanes, planes):
    # conv2_1 / conv2_2 are built with `inplanes` input channels but applied to
    # the `planes`-channel concat in forward(); the module is only consistent
    # when inplanes == planes (and planes even).
    assert inplanes == planes and planes % 2 == 0
    p2 = planes // 2
    ks = jax.random.split(key, 16)
    p = {}
    p["c11a"] = _make_conv(ks[0], inplanes, p2)
    p["bn11a"] = _make_bn(ks[1], p2)
    p["c11b"] = _make_conv(ks[2], p2, p2)
    p["bn11b"] = _make_bn(ks[3], p2)
    p["c11c"] = _make_conv(ks[4], p2, p2)
    p["bn1"] = _make_bn(ks[5], p2)
    p["c12"] = _make_conv(ks[6], inplanes, p2)
    p["bn2"] = _make_bn(ks[7], p2)
    p["c21a"] = _make_conv(ks[8], inplanes, p2)
    p["bn21a"] = _make_bn(ks[9], p2)
    p["c21b"] = _make_conv(ks[10], p2, p2)
    p["bn21b"] = _make_bn(ks[11], p2)
    p["c21c"] = _make_conv(ks[12], p2, p2)
    p["bn3"] = _make_bn(ks[13], p2)
    p["c22"] = _make_conv(ks[14], inplanes, p2)
    p["bn4"] = _make_bn(ks[15], p2)
    return p


def _prep_conv_bn(conv, bn, eps=1e-5):
    """Fold BN (inference semantics) into the conv.

    Returns a GEMM weight of shape (Cout, 9*Cin + 1): columns are tap-major
    then input-channel (matching the kernel's patch rows), last column is the
    folded bias (multiplied by the mask row appended to the patch).
    """
    w, b = conv                                  # w: (3, 3, Cin, Cout) HWIO
    gamma, beta, mean, var = bn
    s = gamma / jnp.sqrt(var + eps)              # (Cout,)
    bias = (b - mean) * s + beta                 # (Cout,)
    cout, cin = w.shape[3], w.shape[2]
    wg = jnp.transpose(w * s, (3, 0, 1, 2)).reshape(cout, 9 * cin)
    return jnp.concatenate([wg, bias[:, None]], axis=1)


def _pack_weights(p):
    prep = _prep_conv_bn
    wf = jnp.stack([
        jnp.concatenate([prep(p["c11a"], p["bn11a"]),
                         prep(p["c12"], p["bn2"])], axis=0),
        jnp.concatenate([prep(p["c21a"], p["bn21a"]),
                         prep(p["c22"], p["bn4"])], axis=0),
    ], axis=0)                                   # (2, planes, 9*Cin + 1)
    wc = jnp.stack([
        prep(p["c11b"], p["bn11b"]),
        prep(p["c11c"], p["bn1"]),
        prep(p["c21b"], p["bn21b"]),
        prep(p["c21c"], p["bn3"]),
    ], axis=0)                                   # (4, p2, 9*p2 + 1)
    return wf, wc


# ------------------------------- forward --------------------------------------

def _multi_tensorcore():
    """True on chips with >= 2 TensorCores per Pallas device (v4/v5p, v7x)."""
    try:
        kind = jax.devices()[0].device_kind.lower()
    except Exception:
        return False
    return any(tag in kind for tag in ("v7", "v4", "v5p"))


def basic_block2_forward(x_nchw, params):
    N, Cin, H, W = x_nchw.shape
    planes = Cin                                 # inplanes == planes required
    p2 = planes // 2
    Hp, Wp = H + 2, W + 2
    L = Hp * Wp
    Lp = ((L + 127) // 128) * 128                # lane-dense canvas length

    # Pad ONCE for the whole block; flatten; pad lane axis to multiple of 128.
    xc = jnp.pad(x_nchw, ((0, 0), (0, 0), (1, 1), (1, 1))).reshape(N, Cin, L)
    xc = jnp.pad(xc, ((0, 0), (0, 0), (0, Lp - L)))             # (N, Cin, Lp)
    mask = jnp.zeros((Hp, Wp), jnp.float32).at[1:H + 1, 1:W + 1].set(1.0)
    mask = jnp.pad(mask.reshape(1, L), ((0, 0), (0, Lp - L)))   # (1, Lp)

    wf, wc = _pack_weights(params)

    # v5e/v6e (1 TC): fold the batch into the lane axis, single grid step.
    # v7x / megacore (2 TCs): one sample per grid step, "parallel" semantics.
    fold_batch = (N == 1) or not _multi_tensorcore()
    if fold_batch:
        xin = jnp.transpose(xc, (1, 0, 2)).reshape(1, Cin, N * Lp)
        mask_in = jnp.tile(mask, (1, N))
        n_blocks, Ll = 1, N * Lp
    else:
        xin, mask_in, n_blocks, Ll = xc, mask, N, Lp

    kernel = functools.partial(_basic_block2_kernel, Wp=Wp, p2=p2)
    out_canvas = pl.pallas_call(
        kernel,
        out_shape=jax.ShapeDtypeStruct((n_blocks, planes, Ll), jnp.float32),
        grid=(n_blocks,),
        in_specs=[
            pl.BlockSpec((1, Cin, Ll), lambda n: (n, 0, 0)),
            pl.BlockSpec((1, Ll), lambda n: (0, 0)),
            pl.BlockSpec(wf.shape, lambda n: (0, 0, 0)),
            pl.BlockSpec(wc.shape, lambda n: (0, 0, 0)),
        ],
        out_specs=pl.BlockSpec((1, planes, Ll), lambda n: (n, 0, 0)),
        compiler_params=pltpu.CompilerParams(
            dimension_semantics=("parallel",)),
    )(xin, mask_in, wf, wc)

    if fold_batch:
        out_canvas = out_canvas[0].reshape(planes, N, Lp).transpose(1, 0, 2)
    # Crop the canvas interior back to NCHW.
    out = out_canvas[:, :, :L].reshape(N, planes, Hp, Wp)[:, :, 1:H + 1, 1:W + 1]
    return out


# ---------------------------- pure-JAX reference ------------------------------

def basic_block2_reference(x_nchw, p, eps=1e-5):
    x = jnp.transpose(x_nchw, (0, 2, 3, 1))      # NHWC

    def cba(x, conv, bn):
        w, b = conv
        gamma, beta, mean, var = bn
        s = gamma / jnp.sqrt(var + eps)
        bb = (b - mean) * s + beta
        y = jax.lax.conv_general_dilated(
            x, w, window_strides=(1, 1), padding=((1, 1), (1, 1)),
            dimension_numbers=("NHWC", "HWIO", "NHWC"))
        return jnp.maximum(y * s + bb, 0.0)

    h = cba(x, p["c11a"], p["bn11a"])
    h = cba(h, p["c11b"], p["bn11b"])
    out1_1 = cba(h, p["c11c"], p["bn1"])
    out1_2 = cba(x, p["c12"], p["bn2"])
    x2 = jnp.concatenate([out1_1, out1_2], axis=-1)
    h = cba(x2, p["c21a"], p["bn21a"])
    h = cba(h, p["c21b"], p["bn21b"])
    out2_1 = cba(h, p["c21c"], p["bn3"])
    out2_2 = cba(x2, p["c22"], p["bn4"])
    out = jnp.concatenate([out2_1, out2_2], axis=-1)
    return jnp.transpose(out, (0, 3, 1, 2))      # back to NCHW


# --------------------------------- main ----------------------------------------

if __name__ == "__main__":
    key = jax.random.PRNGKey(0)
    kx, kp = jax.random.split(key)

    N, C, H, W = 2, 8, 16, 16        # inplanes == planes == 8 (module requires it)
    x_nchw = jax.random.normal(kx, (N, C, H, W), jnp.float32)   # PyTorch NCHW input
    params = init_params(kp, inplanes=C, planes=C)

    out = jax.jit(basic_block2_forward)(x_nchw, params)
    jax.block_until_ready(out)

    ref = basic_block2_reference(x_nchw, params)
    assert out.shape == (N, C, H, W)
    assert jnp.allclose(out, ref, rtol=1e-4, atol=1e-4), "mismatch vs reference"

    print("KERNEL_OK")
</pallas_src>

<mosaic_0001>
module attributes {stable_mosaic.version = 11 : i64} {
  func.func @_basic_block2_kernel(%arg0: i32, %arg1: memref<1x8x768xf32, #tpu.memory_space<vmem>>, %arg2: memref<1x768xf32, #tpu.memory_space<vmem>>, %arg3: memref<2x8x73xf32, #tpu.memory_space<vmem>>, %arg4: memref<4x4x37xf32, #tpu.memory_space<vmem>>, %arg5: memref<1x8x768xf32, #tpu.memory_space<vmem>>) attributes {dimension_semantics = [#tpu.dimension_semantics<parallel>], iteration_bounds = array<i64: 1>, scalar_prefetch = 0 : i64, scratch_operands = 0 : i64, tpu.core_type = #tpu.core_type<tc>, window_params = [{transform_indices = @transform_0, window_bounds = array<i64: 1, 8, 768>}, {pipeline_mode = #tpu.pipeline_mode<synchronous>, transform_indices = @transform_1, window_bounds = array<i64: 1, 768>}, {pipeline_mode = #tpu.pipeline_mode<synchronous>, transform_indices = @transform_2, window_bounds = array<i64: 2, 8, 73>}, {pipeline_mode = #tpu.pipeline_mode<synchronous>, transform_indices = @transform_3, window_bounds = array<i64: 4, 4, 37>}, {transform_indices = @transform_4, window_bounds = array<i64: 1, 8, 768>}]} {
    %c0 = arith.constant 0 : index
    %c0_0 = arith.constant 0 : index
    %0 = vector.load %arg2[%c0, %c0_0] : memref<1x768xf32, #tpu.memory_space<vmem>>, vector<1x768xf32>
    %c0_1 = arith.constant 0 : index
    %c0_2 = arith.constant 0 : index
    %c0_3 = arith.constant 0 : index
    %1 = vector.load %arg1[%c0_1, %c0_2, %c0_3] : memref<1x8x768xf32, #tpu.memory_space<vmem>>, vector<1x8x768xf32>
    %2 = vector.shape_cast %1 : vector<1x8x768xf32> to vector<8x768xf32>
    %c0_4 = arith.constant 0 : index
    %c0_5 = arith.constant 0 : index
    %c0_6 = arith.constant 0 : index
    %3 = vector.load %arg3[%c0_4, %c0_5, %c0_6] : memref<2x8x73xf32, #tpu.memory_space<vmem>>, vector<1x8x73xf32>
    %4 = vector.shape_cast %3 : vector<1x8x73xf32> to vector<8x73xf32>
    %c19_i32 = arith.constant 19 : i32
    %5 = tpu.dynamic_rotate %2 by %c19_i32 dim 1 : vector<8x768xf32>, i32 -> vector<8x768xf32>
    %c18_i32 = arith.constant 18 : i32
    %6 = tpu.dynamic_rotate %2 by %c18_i32 dim 1 : vector<8x768xf32>, i32 -> vector<8x768xf32>
    %c17_i32 = arith.constant 17 : i32
    %7 = tpu.dynamic_rotate %2 by %c17_i32 dim 1 : vector<8x768xf32>, i32 -> vector<8x768xf32>
    %c1_i32 = arith.constant 1 : i32
    %8 = tpu.dynamic_rotate %2 by %c1_i32 dim 1 : vector<8x768xf32>, i32 -> vector<8x768xf32>
    %c767_i32 = arith.constant 767 : i32
    %9 = tpu.dynamic_rotate %2 by %c767_i32 dim 1 : vector<8x768xf32>, i32 -> vector<8x768xf32>
    %c751_i32 = arith.constant 751 : i32
    %10 = tpu.dynamic_rotate %2 by %c751_i32 dim 1 : vector<8x768xf32>, i32 -> vector<8x768xf32>
    %c750_i32 = arith.constant 750 : i32
    %11 = tpu.dynamic_rotate %2 by %c750_i32 dim 1 : vector<8x768xf32>, i32 -> vector<8x768xf32>
    %c749_i32 = arith.constant 749 : i32
    %12 = tpu.dynamic_rotate %2 by %c749_i32 dim 1 : vector<8x768xf32>, i32 -> vector<8x768xf32>
    %13 = tpu.concatenate %5, %6, %7, %8, %2, %9, %10, %11, %12, %0 in 0 : vector<8x768xf32>, vector<8x768xf32>, vector<8x768xf32>, vector<8x768xf32>, vector<8x768xf32>, vector<8x768xf32>, vector<8x768xf32>, vector<8x768xf32>, vector<8x768xf32>, vector<1x768xf32> -> vector<73x768xf32>
    %cst = arith.constant dense<0.000000e+00> : vector<8x768xf32>
    %14 = tpu.matmul %4, %13, %cst {dimension_numbers = #tpu.dot_dimension_numbers<[1], [0], [0], [1], [0, 0, 1, 1], [], []>} : vector<8x73xf32>, vector<73x768xf32>, vector<8x768xf32> -> vector<8x768xf32>
    %cst_7 = arith.constant 0.000000e+00 : f32
    %15 = vector.broadcast %cst_7 : f32 to vector<8x768xf32>
    %16 = arith.maximumf %14, %15 : vector<8x768xf32>
    %17 = vector.broadcast %0 : vector<1x768xf32> to vector<8x768xf32>
    %18 = arith.mulf %16, %17 : vector<8x768xf32>
    %c0_8 = arith.constant 0 : index
    %c0_9 = arith.constant 0 : index
    %c0_10 = arith.constant 0 : index
    %19 = vector.load %arg4[%c0_8, %c0_9, %c0_10] : memref<4x4x37xf32, #tpu.memory_space<vmem>>, vector<1x4x37xf32>
    %20 = vector.shape_cast %19 : vector<1x4x37xf32> to vector<4x37xf32>
    %21 = vector.extract_strided_slice %18 {offsets = [0, 0], sizes = [4, 768], strides = [1, 1]} : vector<8x768xf32> to vector<4x768xf32>
    %c19_i32_11 = arith.constant 19 : i32
    %22 = tpu.dynamic_rotate %21 by %c19_i32_11 dim 1 : vector<4x768xf32>, i32 -> vector<4x768xf32>
    %c18_i32_12 = arith.constant 18 : i32
    %23 = tpu.dynamic_rotate %21 by %c18_i32_12 dim 1 : vector<4x768xf32>, i32 -> vector<4x768xf32>
    %c17_i32_13 = arith.constant 17 : i32
    %24 = tpu.dynamic_rotate %21 by %c17_i32_13 dim 1 : vector<4x768xf32>, i32 -> vector<4x768xf32>
    %c1_i32_14 = arith.constant 1 : i32
    %25 = tpu.dynamic_rotate %21 by %c1_i32_14 dim 1 : vector<4x768xf32>, i32 -> vector<4x768xf32>
    %c767_i32_15 = arith.constant 767 : i32
    %26 = tpu.dynamic_rotate %21 by %c767_i32_15 dim 1 : vector<4x768xf32>, i32 -> vector<4x768xf32>
    %c751_i32_16 = arith.constant 751 : i32
    %27 = tpu.dynamic_rotate %21 by %c751_i32_16 dim 1 : vector<4x768xf32>, i32 -> vector<4x768xf32>
    %c750_i32_17 = arith.constant 750 : i32
    %28 = tpu.dynamic_rotate %21 by %c750_i32_17 dim 1 : vector<4x768xf32>, i32 -> vector<4x768xf32>
    %c749_i32_18 = arith.constant 749 : i32
    %29 = tpu.dynamic_rotate %21 by %c749_i32_18 dim 1 : vector<4x768xf32>, i32 -> vector<4x768xf32>
    %30 = tpu.concatenate %22, %23, %24, %25, %21, %26, %27, %28, %29, %0 in 0 : vector<4x768xf32>, vector<4x768xf32>, vector<4x768xf32>, vector<4x768xf32>, vector<4x768xf32>, vector<4x768xf32>, vector<4x768xf32>, vector<4x768xf32>, vector<4x768xf32>, vector<1x768xf32> -> vector<37x768xf32>
    %cst_19 = arith.constant dense<0.000000e+00> : vector<4x768xf32>
    %31 = tpu.matmul %20, %30, %cst_19 {dimension_numbers = #tpu.dot_dimension_numbers<[1], [0], [0], [1], [0, 0, 1, 1], [], []>} : vector<4x37xf32>, vector<37x768xf32>, vector<4x768xf32> -> vector<4x768xf32>
    %cst_20 = arith.constant 0.000000e+00 : f32
    %32 = vector.broadcast %cst_20 : f32 to vector<4x768xf32>
    %33 = arith.maximumf %31, %32 : vector<4x768xf32>
    %34 = vector.broadcast %0 : vector<1x768xf32> to vector<4x768xf32>
    %35 = arith.mulf %33, %34 : vector<4x768xf32>
    %c1 = arith.constant 1 : index
    %c0_21 = arith.constant 0 : index
    %c0_22 = arith.constant 0 : index
    %36 = vector.load %arg4[%c1, %c0_21, %c0_22] : memref<4x4x37xf32, #tpu.memory_space<vmem>>, vector<1x4x37xf32>
    %37 = vector.shape_cast %36 : vector<1x4x37xf32> to vector<4x37xf32>
    %c19_i32_23 = arith.constant 19 : i32
    %38 = tpu.dynamic_rotate %35 by %c19_i32_23 dim 1 : vector<4x768xf32>, i32 -> vector<4x768xf32>
    %c18_i32_24 = arith.constant 18 : i32
    %39 = tpu.dynamic_rotate %35 by %c18_i32_24 dim 1 : vector<4x768xf32>, i32 -> vector<4x768xf32>
    %c17_i32_25 = arith.constant 17 : i32
    %40 = tpu.dynamic_rotate %35 by %c17_i32_25 dim 1 : vector<4x768xf32>, i32 -> vector<4x768xf32>
    %c1_i32_26 = arith.constant 1 : i32
    %41 = tpu.dynamic_rotate %35 by %c1_i32_26 dim 1 : vector<4x768xf32>, i32 -> vector<4x768xf32>
    %c767_i32_27 = arith.constant 767 : i32
    %42 = tpu.dynamic_rotate %35 by %c767_i32_27 dim 1 : vector<4x768xf32>, i32 -> vector<4x768xf32>
    %c751_i32_28 = arith.constant 751 : i32
    %43 = tpu.dynamic_rotate %35 by %c751_i32_28 dim 1 : vector<4x768xf32>, i32 -> vector<4x768xf32>
    %c750_i32_29 = arith.constant 750 : i32
    %44 = tpu.dynamic_rotate %35 by %c750_i32_29 dim 1 : vector<4x768xf32>, i32 -> vector<4x768xf32>
    %c749_i32_30 = arith.constant 749 : i32
    %45 = tpu.dynamic_rotate %35 by %c749_i32_30 dim 1 : vector<4x768xf32>, i32 -> vector<4x768xf32>
    %46 = tpu.concatenate %38, %39, %40, %41, %35, %42, %43, %44, %45, %0 in 0 : vector<4x768xf32>, vector<4x768xf32>, vector<4x768xf32>, vector<4x768xf32>, vector<4x768xf32>, vector<4x768xf32>, vector<4x768xf32>, vector<4x768xf32>, vector<4x768xf32>, vector<1x768xf32> -> vector<37x768xf32>
    %cst_31 = arith.constant dense<0.000000e+00> : vector<4x768xf32>
    %47 = tpu.matmul %37, %46, %cst_31 {dimension_numbers = #tpu.dot_dimension_numbers<[1], [0], [0], [1], [0, 0, 1, 1], [], []>} : vector<4x37xf32>, vector<37x768xf32>, vector<4x768xf32> -> vector<4x768xf32>
    %cst_32 = arith.constant 0.000000e+00 : f32
    %48 = vector.broadcast %cst_32 : f32 to vector<4x768xf32>
    %49 = arith.maximumf %47, %48 : vector<4x768xf32>
    %50 = vector.broadcast %0 : vector<1x768xf32> to vector<4x768xf32>
    %51 = arith.mulf %49, %50 : vector<4x768xf32>
    %52 = vector.extract_strided_slice %18 {offsets = [4, 0], sizes = [4, 768], strides = [1, 1]} : vector<8x768xf32> to vector<4x768xf32>
    %c1_33 = arith.constant 1 : index
    %c0_34 = arith.constant 0 : index
    %c0_35 = arith.constant 0 : index
    %53 = vector.load %arg3[%c1_33, %c0_34, %c0_35] : memref<2x8x73xf32, #tpu.memory_space<vmem>>, vector<1x8x73xf32>
    %54 = vector.shape_cast %53 : vector<1x8x73xf32> to vector<8x73xf32>
    %c19_i32_36 = arith.constant 19 : i32
    %55 = tpu.dynamic_rotate %51 by %c19_i32_36 dim 1 : vector<4x768xf32>, i32 -> vector<4x768xf32>
    %c19_i32_37 = arith.constant 19 : i32
    %56 = tpu.dynamic_rotate %52 by %c19_i32_37 dim 1 : vector<4x768xf32>, i32 -> vector<4x768xf32>
    %c18_i32_38 = arith.constant 18 : i32
    %57 = tpu.dynamic_rotate %51 by %c18_i32_38 dim 1 : vector<4x768xf32>, i32 -> vector<4x768xf32>
    %c18_i32_39 = arith.constant 18 : i32
    %58 = tpu.dynamic_rotate %52 by %c18_i32_39 dim 1 : vector<4x768xf32>, i32 -> vector<4x768xf32>
    %c17_i32_40 = arith.constant 17 : i32
    %59 = tpu.dynamic_rotate %51 by %c17_i32_40 dim 1 : vector<4x768xf32>, i32 -> vector<4x768xf32>
    %c17_i32_41 = arith.constant 17 : i32
    %60 = tpu.dynamic_rotate %52 by %c17_i32_41 dim 1 : vector<4x768xf32>, i32 -> vector<4x768xf32>
    %c1_i32_42 = arith.constant 1 : i32
    %61 = tpu.dynamic_rotate %51 by %c1_i32_42 dim 1 : vector<4x768xf32>, i32 -> vector<4x768xf32>
    %c1_i32_43 = arith.constant 1 : i32
    %62 = tpu.dynamic_rotate %52 by %c1_i32_43 dim 1 : vector<4x768xf32>, i32 -> vector<4x768xf32>
    %c767_i32_44 = arith.constant 767 : i32
    %63 = tpu.dynamic_rotate %51 by %c767_i32_44 dim 1 : vector<4x768xf32>, i32 -> vector<4x768xf32>
    %c767_i32_45 = arith.constant 767 : i32
    %64 = tpu.dynamic_rotate %52 by %c767_i32_45 dim 1 : vector<4x768xf32>, i32 -> vector<4x768xf32>
    %c751_i32_46 = arith.constant 751 : i32
    %65 = tpu.dynamic_rotate %51 by %c751_i32_46 dim 1 : vector<4x768xf32>, i32 -> vector<4x768xf32>
    %c751_i32_47 = arith.constant 751 : i32
    %66 = tpu.dynamic_rotate %52 by %c751_i32_47 dim 1 : vector<4x768xf32>, i32 -> vector<4x768xf32>
    %c750_i32_48 = arith.constant 750 : i32
    %67 = tpu.dynamic_rotate %51 by %c750_i32_48 dim 1 : vector<4x768xf32>, i32 -> vector<4x768xf32>
    %c750_i32_49 = arith.constant 750 : i32
    %68 = tpu.dynamic_rotate %52 by %c750_i32_49 dim 1 : vector<4x768xf32>, i32 -> vector<4x768xf32>
    %c749_i32_50 = arith.constant 749 : i32
    %69 = tpu.dynamic_rotate %51 by %c749_i32_50 dim 1 : vector<4x768xf32>, i32 -> vector<4x768xf32>
    %c749_i32_51 = arith.constant 749 : i32
    %70 = tpu.dynamic_rotate %52 by %c749_i32_51 dim 1 : vector<4x768xf32>, i32 -> vector<4x768xf32>
    %71 = tpu.concatenate %55, %56, %57, %58, %59, %60, %61, %62, %51, %52, %63, %64, %65, %66, %67, %68 in 0 : vector<4x768xf32>, vector<4x768xf32>, vector<4x768xf32>, vector<4x768xf32>, vector<4x768xf32>, vector<4x768xf32>, vector<4x768xf32>, vector<4x768xf32>, vector<4x768xf32>, vector<4x768xf32>, vector<4x768xf32>, vector<4x768xf32>, vector<4x768xf32>, vector<4x768xf32>, vector<4x768xf32>, vector<4x768xf32> -> vector<64x768xf32>
    %72 = tpu.concatenate %69, %70, %0 in 0 : vector<4x768xf32>, vector<4x768xf32>, vector<1x768xf32> -> vector<9x768xf32>
    %73 = tpu.concatenate %71, %72 in 0 : vector<64x768xf32>, vector<9x768xf32> -> vector<73x768xf32>
    %cst_52 = arith.constant dense<0.000000e+00> : vector<8x768xf32>
    %74 = tpu.matmul %54, %73, %cst_52 {dimension_numbers = #tpu.dot_dimension_numbers<[1], [0], [0], [1], [0, 0, 1, 1], [], []>} : vector<8x73xf32>, vector<73x768xf32>, vector<8x768xf32> -> vector<8x768xf32>
    %cst_53 = arith.constant 0.000000e+00 : f32
    %75 = vector.broadcast %cst_53 : f32 to vector<8x768xf32>
    %76 = arith.maximumf %74, %75 : vector<8x768xf32>
    %c2 = arith.constant 2 : index
    %c0_54 = arith.constant 0 : index
    %c0_55 = arith.constant 0 : index
    %77 = vector.load %arg4[%c2, %c0_54, %c0_55] : memref<4x4x37xf32, #tpu.memory_space<vmem>>, vector<1x4x37xf32>
    %78 = vector.shape_cast %77 : vector<1x4x37xf32> to vector<4x37xf32>
    %79 = vector.extract_strided_slice %76 {offsets = [0, 0], sizes = [4, 768], strides = [1, 1]} : vector<8x768xf32> to vector<4x768xf32>
    %80 = vector.broadcast %0 : vector<1x768xf32> to vector<4x768xf32>
    %81 = arith.mulf %79, %80 : vector<4x768xf32>
    %c19_i32_56 = arith.constant 19 : i32
    %82 = tpu.dynamic_rotate %81 by %c19_i32_56 dim 1 : vector<4x768xf32>, i32 -> vector<4x768xf32>
    %c18_i32_57 = arith.constant 18 : i32
    %83 = tpu.dynamic_rotate %81 by %c18_i32_57 dim 1 : vector<4x768xf32>, i32 -> vector<4x768xf32>
    %c17_i32_58 = arith.constant 17 : i32
    %84 = tpu.dynamic_rotate %81 by %c17_i32_58 dim 1 : vector<4x768xf32>, i32 -> vector<4x768xf32>
    %c1_i32_59 = arith.constant 1 : i32
    %85 = tpu.dynamic_rotate %81 by %c1_i32_59 dim 1 : vector<4x768xf32>, i32 -> vector<4x768xf32>
    %c767_i32_60 = arith.constant 767 : i32
    %86 = tpu.dynamic_rotate %81 by %c767_i32_60 dim 1 : vector<4x768xf32>, i32 -> vector<4x768xf32>
    %c751_i32_61 = arith.constant 751 : i32
    %87 = tpu.dynamic_rotate %81 by %c751_i32_61 dim 1 : vector<4x768xf32>, i32 -> vector<4x768xf32>
    %c750_i32_62 = arith.constant 750 : i32
    %88 = tpu.dynamic_rotate %81 by %c750_i32_62 dim 1 : vector<4x768xf32>, i32 -> vector<4x768xf32>
    %c749_i32_63 = arith.constant 749 : i32
    %89 = tpu.dynamic_rotate %81 by %c749_i32_63 dim 1 : vector<4x768xf32>, i32 -> vector<4x768xf32>
    %90 = tpu.concatenate %82, %83, %84, %85, %81, %86, %87, %88, %89, %0 in 0 : vector<4x768xf32>, vector<4x768xf32>, vector<4x768xf32>, vector<4x768xf32>, vector<4x768xf32>, vector<4x768xf32>, vector<4x768xf32>, vector<4x768xf32>, vector<4x768xf32>, vector<1x768xf32> -> vector<37x768xf32>
    %cst_64 = arith.constant dense<0.000000e+00> : vector<4x768xf32>
    %91 = tpu.matmul %78, %90, %cst_64 {dimension_numbers = #tpu.dot_dimension_numbers<[1], [0], [0], [1], [0, 0, 1, 1], [], []>} : vector<4x37xf32>, vector<37x768xf32>, vector<4x768xf32> -> vector<4x768xf32>
    %cst_65 = arith.constant 0.000000e+00 : f32
    %92 = vector.broadcast %cst_65 : f32 to vector<4x768xf32>
    %93 = arith.maximumf %91, %92 : vector<4x768xf32>
    %94 = vector.broadcast %0 : vector<1x768xf32> to vector<4x768xf32>
    %95 = arith.mulf %93, %94 : vector<4x768xf32>
    %c3 = arith.constant 3 : index
    %c0_66 = arith.constant 0 : index
    %c0_67 = arith.constant 0 : index
    %96 = vector.load %arg4[%c3, %c0_66, %c0_67] : memref<4x4x37xf32, #tpu.memory_space<vmem>>, vector<1x4x37xf32>
    %97 = vector.shape_cast %96 : vector<1x4x37xf32> to vector<4x37xf32>
    %c19_i32_68 = arith.constant 19 : i32
    %98 = tpu.dynamic_rotate %95 by %c19_i32_68 dim 1 : vector<4x768xf32>, i32 -> vector<4x768xf32>
    %c18_i32_69 = arith.constant 18 : i32
    %99 = tpu.dynamic_rotate %95 by %c18_i32_69 dim 1 : vector<4x768xf32>, i32 -> vector<4x768xf32>
    %c17_i32_70 = arith.constant 17 : i32
    %100 = tpu.dynamic_rotate %95 by %c17_i32_70 dim 1 : vector<4x768xf32>, i32 -> vector<4x768xf32>
    %c1_i32_71 = arith.constant 1 : i32
    %101 = tpu.dynamic_rotate %95 by %c1_i32_71 dim 1 : vector<4x768xf32>, i32 -> vector<4x768xf32>
    %c767_i32_72 = arith.constant 767 : i32
    %102 = tpu.dynamic_rotate %95 by %c767_i32_72 dim 1 : vector<4x768xf32>, i32 -> vector<4x768xf32>
    %c751_i32_73 = arith.constant 751 : i32
    %103 = tpu.dynamic_rotate %95 by %c751_i32_73 dim 1 : vector<4x768xf32>, i32 -> vector<4x768xf32>
    %c750_i32_74 = arith.constant 750 : i32
    %104 = tpu.dynamic_rotate %95 by %c750_i32_74 dim 1 : vector<4x768xf32>, i32 -> vector<4x768xf32>
    %c749_i32_75 = arith.constant 749 : i32
    %105 = tpu.dynamic_rotate %95 by %c749_i32_75 dim 1 : vector<4x768xf32>, i32 -> vector<4x768xf32>
    %106 = tpu.concatenate %98, %99, %100, %101, %95, %102, %103, %104, %105, %0 in 0 : vector<4x768xf32>, vector<4x768xf32>, vector<4x768xf32>, vector<4x768xf32>, vector<4x768xf32>, vector<4x768xf32>, vector<4x768xf32>, vector<4x768xf32>, vector<4x768xf32>, vector<1x768xf32> -> vector<37x768xf32>
    %cst_76 = arith.constant dense<0.000000e+00> : vector<4x768xf32>
    %107 = tpu.matmul %97, %106, %cst_76 {dimension_numbers = #tpu.dot_dimension_numbers<[1], [0], [0], [1], [0, 0, 1, 1], [], []>} : vector<4x37xf32>, vector<37x768xf32>, vector<4x768xf32> -> vector<4x768xf32>
    %cst_77 = arith.constant 0.000000e+00 : f32
    %108 = vector.broadcast %cst_77 : f32 to vector<4x768xf32>
    %109 = arith.maximumf %107, %108 : vector<4x768xf32>
    %c0_78 = arith.constant 0 : index
    %c0_79 = arith.constant 0 : index
    %c0_80 = arith.constant 0 : index
    %110 = vector.load %arg5[%c0_78, %c0_79, %c0_80] : memref<1x8x768xf32, #tpu.memory_space<vmem>>, vector<1x4x768xf32>
    %111 = vector.shape_cast %110 : vector<1x4x768xf32> to vector<4x768xf32>
    %112 = vector.shape_cast %109 : vector<4x768xf32> to vector<1x4x768xf32>
    tpu.vector_store %arg5[%c0_78, %c0_79, %c0_80], %112 {strides = array<i32>} : memref<1x8x768xf32, #tpu.memory_space<vmem>>, vector<1x4x768xf32>,
    %113 = vector.extract_strided_slice %76 {offsets = [4, 0], sizes = [4, 768], strides = [1, 1]} : vector<8x768xf32> to vector<4x768xf32>
    %c0_81 = arith.constant 0 : index
    %c4 = arith.constant 4 : index
    %c0_82 = arith.constant 0 : index
    %114 = vector.load %arg5[%c0_81, %c4, %c0_82] : memref<1x8x768xf32, #tpu.memory_space<vmem>>, vector<1x4x768xf32>
    %115 = vector.shape_cast %114 : vector<1x4x768xf32> to vector<4x768xf32>
    %116 = vector.shape_cast %113 : vector<4x768xf32> to vector<1x4x768xf32>
    tpu.vector_store %arg5[%c0_81, %c4, %c0_82], %116 {strides = array<i32>} : memref<1x8x768xf32, #tpu.memory_space<vmem>>, vector<1x4x768xf32>,
    return
  }
  func.func @transform_0(%arg0: i32) -> (i32, i32, i32) {
    %c0_i32 = arith.constant 0 : i32
    %c0_i32_0 = arith.constant 0 : i32
    %c0_i32_1 = arith.constant 0 : i32
    return %arg0, %c0_i32, %c0_i32_0 : i32, i32, i32
  }
  func.func @transform_1(%arg0: i32) -> (i32, i32) {
    %c0_i32 = arith.constant 0 : i32
    %c0_i32_0 = arith.constant 0 : i32
    %c0_i32_1 = arith.constant 0 : i32
    return %c0_i32, %c0_i32_0 : i32, i32
  }
  func.func @transform_2(%arg0: i32) -> (i32, i32, i32) {
    %c0_i32 = arith.constant 0 : i32
    %c0_i32_0 = arith.constant 0 : i32
    %c0_i32_1 = arith.constant 0 : i32
    %c0_i32_2 = arith.constant 0 : i32
    return %c0_i32, %c0_i32_0, %c0_i32_1 : i32, i32, i32
  }
  func.func @transform_3(%arg0: i32) -> (i32, i32, i32) {
    %c0_i32 = arith.constant 0 : i32
    %c0_i32_0 = arith.constant 0 : i32
    %c0_i32_1 = arith.constant 0 : i32
    %c0_i32_2 = arith.constant 0 : i32
    return %c0_i32, %c0_i32_0, %c0_i32_1 : i32, i32, i32
  }
  func.func @transform_4(%arg0: i32) -> (i32, i32, i32) {
    %c0_i32 = arith.constant 0 : i32
    %c0_i32_0 = arith.constant 0 : i32
    %c0_i32_1 = arith.constant 0 : i32
    return %arg0, %c0_i32, %c0_i32_0 : i32, i32, i32
  }
}

</mosaic_0001>

<bundles_post_ra>
// kernel: basic_block2_forward.1
= control target key start
LH: loop header
LB: loop body
LE: loop exit
PB: predicated region body
PF: predicated region fallthrough
CT: control target
= control target key end

     0   :  { %s4185_s23 = smov 19   ;;  %s4186_s24 = smov 18   ;;  %v6911_v9 = vmov 0.0   ;;  %v37_v12 = vlaneseq  ;;  %vm208_vm8 = vcmask 1040384   ;;  %vm4194_vm9 = vmmov 1   ;;  %s6906_s0 = inlined_call_operand.vmem [shape: f32[1,8,768], index: 0, kind: input, shape index: {}]   ;;  %s6907_s1 = inlined_call_operand.vmem [shape: f32[1,768], index: 1, kind: input, shape index: {}]   ;;  %s6908_s2 = inlined_call_operand.vmem [shape: f32[2,8,73], index: 2, kind: input, shape index: {}]   ;;  %s6909_s3 = inlined_call_operand.vmem [shape: f32[4,4,37], index: 3, kind: input, shape index: {}]   ;;  %s6910_s4 = inlined_call_operand.vmem [shape: f32[1,8,768], index: 4, kind: output, shape index: {}]  }
   0x1   :  { %v4223_v0 = vld [vmem:[%s6906_s0 + $0x20] sm:$0xff]  ;;  %v4228_v1 = vld [vmem:[%s6906_s0 + $0x28] sm:$0xff]  ;;  %s4187_s25 = smov 1   ;;  %s4188_s26 = smov 17   ;;  %v4253_v6 = vld [vmem:[%s6906_s0 + $0x10] sm:$0xff]  ;;  %285 = vmatprep.mubr.f32.mxu0 %v6911_v9  ;;  %356 = vmatprep.mubr.f32.mxu1 %v6911_v9  ;;  %vm204_vm11 = vcmask 596992  }
   0x2   :  { %v4233_v2 = vld [vmem:[%s6906_s0] sm:$0xff]  ;;  %v3480_v3 = vpack.i.bf16 %v4223_v0, %v4228_v1  ;;  %v4240_v4 = vld [vmem:[%s6906_s0 + $0x8] sm:$0xff]  ;;  %s4189_s29 = smov 127   ;;  %s4190_s30 = smov 110   ;;  %v4272_v8 = vld [vmem:[%s6906_s0 + $0x18] sm:$0xff]  ;;  %v4305_v15 = vand.u32 127, %v37_v12 }
   0x3   :  { %v3470_v5 = vpack.i.bf16 %v4240_v4, %v4233_v2  ;;  %v3505_v7 = vpack.i.bf16 %v4253_v6, %v4240_v4  ;;  %s4191_s5 = smov 111   ;;  %s4193_s8 = smov 109   ;;  %v3530_v10 = vpack.i.bf16 %v4253_v6, %v4272_v8  ;;  %v3535_v11 = vpack.i.bf16 %v4272_v8, %v4223_v0  ;;  %vm4444_vm10 = vmpackc.low %vm208_vm8, %vm4194_vm9 }
   0x4   :  { %3481 = vrot.lane.b32.xlu1 %v3480_v3, %s4185_s23  ;;  %vm39_vm0 = vcmp.lt.s32.totalorder %v4305_v15, 19  ;;  %vm58_vm1 = vcmp.lt.s32.totalorder %v4305_v15, 18  ;;  %vm96_vm2 = vcmp.lt.s32.totalorder %v4305_v15, 1  ;;  %vm77_vm3 = vcmp.lt.s32.totalorder %v4305_v15, 17 }
   0x5   :  { %3471 = vrot.lane.b32.xlu0 %v3470_v5, %s4185_s23  ;;  %vm115_vm4 = vcmp.lt.s32.totalorder %v4305_v15, 127  ;;  %vm153_vm5 = vcmp.lt.s32.totalorder %v4305_v15, 110  ;;  %vm134_vm6 = vcmp.lt.s32.totalorder %v4305_v15, 111  ;;  %v4383_v52 = vshrl.u32 %v37_v12, 7 }
   0x6   :  { %vm172_vm7 = vcmp.lt.s32.totalorder %v4305_v15, 109  ;;  %vm669_vm12 = vcmask 1043456   ;;  %vm704_vm13 = vcmask 1044480   ;;  %vm700_vm14 = vcmask 302080  }
   0x8   :  { %3486 = vrot.lane.b32.xlu1 %v3480_v3, %s4186_s24 }
   0x9   :  { %3476 = vrot.lane.b32.xlu0 %v3470_v5, %s4186_s24 }
   0xc   :  { %3496 = vrot.lane.b32.xlu1 %v3470_v5, %s4187_s25 }
   0xd   :  { %3491 = vrot.lane.b32.xlu0 %v3470_v5, %s4188_s26  ;;  %v182_v5 = vsub.s32 0, %v4383_v52 }
  0x10   :  { %94 = vrot.lane.b32.xlu1 %v4228_v1, %s4187_s25 }
  0x11   :  { %3501 = vrot.lane.b32.xlu0 %v3480_v3, %s4188_s26 }
  0x14   :  { %103 = vrot.lane.b32.xlu1 %v4233_v2, %s4189_s29 }
  0x15   :  { %3506 = vrot.lane.b32.xlu0 %v3505_v7, %s4189_s29 }
  0x18   :  { %3516 = vrot.lane.b32.xlu1 %v3505_v7, %s4190_s30 }
  0x19   :  { %3511 = vrot.lane.b32.xlu0 %v3505_v7, %s4191_s5 }
  0x1c   :  { %141 = vrot.lane.b32.xlu1 %v4233_v2, %s4190_s30 }
  0x1d   :  { %122 = vrot.lane.b32.xlu0 %v4233_v2, %s4191_s5 }
  0x20   :  { %160 = vrot.lane.b32.xlu1 %v4233_v2, %s4193_s8 }
  0x21   :  { %3521 = vrot.lane.b32.xlu0 %v3505_v7, %s4193_s8 }
  0x24   :  { %3531 = vrot.lane.b32.xlu1 %v3530_v10, %s4186_s24 }
  0x25   :  { %3526 = vrot.lane.b32.xlu0 %v3530_v10, %s4185_s23 }
  0x28   :  { %3541 = vrot.lane.b32.xlu1 %v3530_v10, %s4188_s26  ;;  %v4416_v10 = vld [vmem:[%s6907_s1] sm:$0x3f] }
  0x29   :  { %3536 = vrot.lane.b32.xlu0 %v3535_v11, %s4187_s25 }
  0x2c   :  { %3546 = vrot.lane.b32.xlu1 %v3480_v3, %s4189_s29 }
  0x2d   :  { %88 = vrot.lane.b32.xlu0 %v4253_v6, %s4187_s25 }
  0x30   :  { %3551 = vrot.lane.b32.xlu1 %v3480_v3, %s4191_s5 }
  0x31   :  { %109 = vrot.lane.b32.xlu0 %v4272_v8, %s4189_s29 }
  0x34   :  { %128 = vrot.lane.b32.xlu1 %v4272_v8, %s4191_s5 }
  0x35   :  { %3556 = vrot.lane.b32.xlu0 %v3480_v3, %s4190_s30 }
  0x38   :  { %3561 = vrot.lane.b32.xlu1 %v3480_v3, %s4193_s8 }
  0x39   :  { %147 = vrot.lane.b32.xlu0 %v4272_v8, %s4190_s30 }
  0x3d   :  { %166 = vrot.lane.b32.xlu0 %v4272_v8, %s4193_s8 }
  0x76   :  { %v4301_v13 = vpop.permute.xlu1 %3481 }
  0x77   :  { %v4303_v14 = vpop.permute.xlu0 %3471  ;;  %v3483_v16 = vunpack.i.l.bf16 %v4301_v13 }
  0x78   :  { %v3474_v17 = vunpack.i.h.bf16 %v4303_v14  ;;  %v3473_v18 = vunpack.i.l.bf16 %v4303_v14 }
  0x7a   :  { %v4310_v19 = vpop.permute.xlu1 %3486  ;;  %v44_v25 = vsel %vm39_vm0, %v3473_v18, %v3474_v17  ;;  %v45_v27 = vsel %vm39_vm0, %v3483_v16, %v3473_v18  ;;  %v3484_v18 = vunpack.i.h.bf16 %v4301_v13 }
  0x7b   :  { %v3488_v20 = vunpack.i.l.bf16 %v4310_v19  ;;  %v4313_v21 = vpop.permute.xlu0 %3476  ;;  %v3489_v11 = vunpack.i.h.bf16 %v4310_v19 }
  0x7c   :  { %v3479_v22 = vunpack.i.h.bf16 %v4313_v21  ;;  %v3478_v23 = vunpack.i.l.bf16 %v4313_v21  ;;  %v40_v19 = vsel %vm39_vm0, %v3484_v18, %v3483_v16 }
  0x7e   :  { %v4321_v24 = vpop.permute.xlu1 %3496  ;;  %v63_v26 = vsel %vm58_vm1, %v3478_v23, %v3479_v22  ;;  %v64_v28 = vsel %vm58_vm1, %v3488_v20, %v3478_v23 }
  0x7f   :  { %v3499_v29 = vunpack.i.h.bf16 %v4321_v24  ;;  %v3498_v30 = vunpack.i.l.bf16 %v4321_v24  ;;  %v4341_v31 = vpop.permute.xlu0 %3491  ;;  %v3232_v32 = vpack.c.bf16 %v63_v26, %v44_v25  ;;  %v3234_v33 = vpack.c.bf16 %v64_v28, %v45_v27 }
  0x80   :  { %v3494_v34 = vunpack.i.h.bf16 %v4341_v31  ;;  %v3493_v35 = vunpack.i.l.bf16 %v4341_v31  ;;  %v4429_v27 = vrot.slane %v4416_v10, %v182_v5 }
  0x81   :  { %3233 = vmatprep.subr.bf16.mxu0 %v3232_v32  ;;  %v101_v36 = vsel %vm96_vm2, %v3498_v30, %v3499_v29  ;;  %v59_v32 = vsel %vm58_vm1, %v3489_v11, %v3488_v20 }
  0x82   :  { %3235 = vmatpush1.bf16.msra.mxu0 %v3234_v33  ;;  %v4349_v37 = vpop.permute.xlu1 %94  ;;  %v82_v38 = vsel %vm77_vm3, %v3493_v35, %v3494_v34 }
  0x83   :  { %v4355_v39 = vpop.permute.xlu0 %3501  ;;  %v3236_v40 = vpack.c.bf16 %v101_v36, %v82_v38  ;;  %v102_v42 = vsel %vm96_vm2, %v4349_v37, %v3498_v30  ;;  %v6980_v38 = vmov 0 }
  0x84   :  { %v3503_v41 = vunpack.i.l.bf16 %v4355_v39  ;;  %v6981_v38 = vsel %vm4444_vm10, 4294967295, %v6980_v38 }
  0x85   :  { %3237 = vmatprep.subr.bf16.mxu0 %v3236_v40  ;;  %6982 = vst [vmem:[#allocation2_spill] sm:$0xff] %v6981_v38 }
  0x86   :  { %v4361_v43 = vpop.permute.xlu1 %103  ;;  %v83_v44 = vsel %vm77_vm3, %v3503_v41, %v3493_v35 }
  0x87   :  { %v4367_v45 = vpop.permute.xlu0 %3506  ;;  %v3238_v46 = vpack.c.bf16 %v102_v42, %v83_v44 }
  0x88   :  { %v3509_v47 = vunpack.i.h.bf16 %v4367_v45  ;;  %v3508_v48 = vunpack.i.l.bf16 %v4367_v45 }
  0x89   :  { %3239 = vmatpush1.bf16.msra.mxu0 %v3238_v46 }
  0x8a   :  { %v4373_v49 = vpop.permute.xlu1 %3516  ;;  %v119_v50 = vsel %vm115_vm4, %v3508_v48, %v3509_v47  ;;  %v120_v51 = vsel %vm115_vm4, %v4361_v43, %v3508_v48 }
  0x8b   :  { %v3519_v53 = vunpack.i.h.bf16 %v4373_v49  ;;  %v3518_v54 = vunpack.i.l.bf16 %v4373_v49  ;;  %v4387_v55 = vpop.permute.xlu0 %3511  ;;  %v3240_v56 = vpack.c.bf16 %v119_v50, %v4240_v4  ;;  %v3242_v57 = vpack.c.bf16 %v120_v51, %v4233_v2 }
  0x8c   :  { %v3514_v58 = vunpack.i.h.bf16 %v4387_v55  ;;  %v3513_v59 = vunpack.i.l.bf16 %v4387_v55  ;;  %v186_v4 = vsub.s32 1, %v4383_v52  ;;  %v3276_v51 = vpack.c.bf16 %v59_v32, %v40_v19 }
  0x8d   :  { %3241 = vmatprep.subr.bf16.mxu0 %v3240_v56  ;;  %v157_v60 = vsel %vm153_vm5, %v3518_v54, %v3519_v53 }
  0x8e   :  { %3243 = vmatpush1.bf16.msra.mxu0 %v3242_v57  ;;  %v4397_v61 = vpop.permute.xlu1 %141  ;;  %v138_v62 = vsel %vm134_vm6, %v3513_v59, %v3514_v58  ;;  %v4426_v26 = vrot.slane %v4416_v10, %v186_v4 }
  0x8f   :  { %v158_v63 = vsel %vm153_vm5, %v4397_v61, %v3518_v54  ;;  %v4406_v2 = vpop.permute.xlu0 %122  ;;  %v3244_v3 = vpack.c.bf16 %v157_v60, %v138_v62  ;;  %v3504_v54 = vunpack.i.h.bf16 %v4355_v39  ;;  %v4474_v62 = vld [vmem:[%s6908_s2] sm:$0xff] }
  0x90   :  { %v139_v7 = vsel %vm134_vm6, %v4406_v2, %v3513_v59 }
  0x91   :  { %3245 = vmatprep.subr.bf16.mxu0 %v3244_v3  ;;  %v3246_v12 = vpack.c.bf16 %v158_v63, %v139_v7  ;;  %v78_v14 = vsel %vm77_vm3, %v3504_v54, %v3503_v41 }
  0x92   :  { %v4420_v23 = vpop.permute.xlu1 %160 }
  0x93   :  { %v4423_v25 = vpop.permute.xlu0 %3521  ;;  %3247 = vmatpush1.bf16.msra.mxu0 %v3246_v12 }
  0x94   :  { %v3524_v28 = vunpack.i.h.bf16 %v4423_v25  ;;  %v3523_v30 = vunpack.i.l.bf16 %v4423_v25 }
  0x96   :  { %v176_v33 = vsel %vm172_vm7, %v3523_v30, %v3524_v28  ;;  %v177_v35 = vsel %vm172_vm7, %v4420_v23, %v3523_v30  ;;  %v3532_v36 = vpop.permute.xlu1 %3531 }
  0x97   :  { %v3534_v20 = vunpack.i.h.bf16 %v3532_v36  ;;  %v3533_v40 = vunpack.i.l.bf16 %v3532_v36  ;;  %v3527_v42 = vpop.permute.xlu0 %3526  ;;  %v3248_v44 = vpack.c.bf16 %v4426_v26, %v176_v33  ;;  %v3251_v46 = vpack.c.bf16 %v4429_v27, %v177_v35 }
  0x98   :  { %v3529_v48 = vunpack.i.h.bf16 %v3527_v42  ;;  %v3528_v50 = vunpack.i.l.bf16 %v3527_v42 }
  0x99   :  { %v60_v56 = vsel %vm58_vm1, %v3533_v40, %v3489_v11  ;;  %3250 = vmatprep.subr.msk.bf16.mxu0 %vm4444_vm10, %v3248_v44  ;;  %v61_v13 = vsel %vm58_vm1, %v3534_v20, %v3533_v40  ;;  %v62_v16 = vsel %vm58_vm1, %v3479_v22, %v3534_v20 }
  0x9a   :  { %v41_v57 = vsel %vm39_vm0, %v3528_v50, %v3484_v18  ;;  %3253 = vmatpush1.bf16.msk.msra.mxu0 %vm4444_vm10, %v3251_v46  ;;  %v3542_v59 = vpop.permute.xlu1 %3541  ;;  %v42_v60 = vsel %vm39_vm0, %v3529_v48, %v3528_v50  ;;  %v43_v21 = vsel %vm39_vm0, %v3474_v17, %v3529_v48 }
  0x9b   :  { %v3543_v22 = vunpack.i.l.bf16 %v3542_v59  ;;  %v3537_v63 = vpop.permute.xlu0 %3536  ;;  %3277 = vmatprep.subr.bf16.mxu0 %v3276_v51  ;;  %v3254_v3 = vpack.c.bf16 %v61_v13, %v42_v60  ;;  %v3256_v4 = vpack.c.bf16 %v62_v16, %v43_v21  ;;  %v3544_v5 = vunpack.i.h.bf16 %v3542_v59 }
  0x9c   :  { %v3539_v7 = vunpack.i.h.bf16 %v3537_v63  ;;  %v3538_v11 = vunpack.i.l.bf16 %v3537_v63  ;;  %v3278_v12 = vpack.c.bf16 %v60_v56, %v41_v57  ;;  %v190_v56 = vsub.s32 2, %v4383_v52 }
  0x9d   :  { %v79_v18 = vsel %vm77_vm3, %v3543_v22, %v3504_v54  ;;  %3255 = vmatprep.subr.bf16.mxu1 %v3254_v3  ;;  %3176 = vmatmul.mubr.msk.f32.vlgmr.msra.gmra.mrb[0].mxu0 %vm204_vm11, %v4474_v62  ;;  %v80_v33 = vsel %vm77_vm3, %v3544_v5, %v3543_v22  ;;  %v202_v54 = vsub.s32 5, %v4383_v52  ;;  %v194_v13 = vsub.s32 3, %v4383_v52 }
  0x9e   :  { %v98_v17 = vsel %vm96_vm2, %v3539_v7, %v3538_v11  ;;  %3257 = vmatpush1.bf16.msra.mxu1 %v3256_v4  ;;  %3279 = vmatpush1.bf16.msra.mxu0 %v3278_v12  ;;  %v3547_v30 = vpop.permute.xlu1 %3546  ;;  %v97_v32 = vsel %vm96_vm2, %v3538_v11, %v4349_v37  ;;  %v81_v37 = vsel %vm77_vm3, %v3494_v34, %v3544_v5 }
  0x9f   :  { %v3549_v35 = vunpack.i.h.bf16 %v3547_v30  ;;  %v3548_v36 = vunpack.i.l.bf16 %v3547_v30  ;;  %v89_v19 = vpop.permute.xlu0 %88  ;;  %v3280_v39 = vpack.c.bf16 %v97_v32, %v78_v14  ;;  %v3282_v20 = vpack.c.bf16 %v98_v17, %v79_v18  ;;  %427 = vmatprep.mubr.f32.mxu0 %v6911_v9 }
  0xa0   :  { %v99_v41 = vsel %vm96_vm2, %v89_v19, %v3539_v7  ;;  %v100_v40 = vsel %vm96_vm2, %v3499_v29, %v89_v19 }
  0xa1   :  { %v116_v42 = vsel %vm115_vm4, %v3549_v35, %v3548_v36  ;;  %3281 = vmatprep.subr.bf16.mxu0 %v3280_v39  ;;  %v3258_v44 = vpack.c.bf16 %v99_v41, %v80_v33  ;;  %v3260_v46 = vpack.c.bf16 %v100_v40, %v81_v37  ;;  %v121_v48 = vsel %vm115_vm4, %v3548_v36, %v4361_v43 }
  0xa2   :  { %3283 = vmatpush1.bf16.msra.mxu0 %v3282_v20  ;;  %v3552_v24 = vpop.permute.xlu1 %3551  ;;  %v3284_v50 = vpack.c.bf16 %v121_v48, %v4228_v1  ;;  %v3286_v29 = vpack.c.bf16 %v116_v42, %v4223_v0  ;;  %v198_v43 = vsub.s32 4, %v4383_v52  ;;  %v4535_v52 = vrot.slane %v4416_v10, %v202_v54 }
  0xa3   :  { %v110_v31 = vpop.permute.xlu0 %109  ;;  %3259 = vmatprep.subr.bf16.mxu1 %v3258_v44  ;;  %v3554_v16 = vunpack.i.h.bf16 %v3552_v24  ;;  %v3553_v57 = vunpack.i.l.bf16 %v3552_v24 }
  0xa4   :  { %v117_v34 = vsel %vm115_vm4, %v110_v31, %v3549_v35  ;;  %v118_v51 = vsel %vm115_vm4, %v3509_v47, %v110_v31  ;;  %3261 = vmatpush1.bf16.msra.mxu1 %v3260_v46  ;;  %3285 = vmatprep.subr.bf16.mxu0 %v3284_v50  ;;  %v4526_v21 = vrot.slane %v4416_v10, %v198_v43 }
  0xa5   :  { %v3262_v1 = vpack.c.bf16 %v117_v34, %v4272_v8  ;;  %v3264_v0 = vpack.c.bf16 %v118_v51, %v4253_v6  ;;  %v4529_v8 = vrot.slane %v4416_v10, %v190_v56  ;;  %v4532_v6 = vrot.slane %v4416_v10, %v194_v13  ;;  %6986 = vst [vmem:[#allocation6_spill] sm:$0xff] %v4535_v52 }
  0xa6   :  { %v129_v45 = vpop.permute.xlu1 %128  ;;  %3287 = vmatpush1.bf16.msra.mxu0 %v3286_v29  ;;  %6983 = vst [vmem:[#allocation3_spill] sm:$0xff] %v4526_v21  ;;  %v135_v22 = vsel %vm134_vm6, %v3554_v16, %v3553_v57  ;;  %v140_v4 = vsel %vm134_vm6, %v3553_v57, %v4406_v2 }
  0xa7   :  { %v3557_v59 = vpop.permute.xlu0 %3556  ;;  %3263 = vmatprep.subr.bf16.mxu1 %v3262_v1  ;;  %6984 = vst [vmem:[#allocation4_spill] sm:$0xff] %v4529_v8  ;;  %6985 = vst [vmem:[#allocation5_spill] sm:$0xff] %v4532_v6  ;;  %v136_v14 = vsel %vm134_vm6, %v129_v45, %v3554_v16  ;;  %v137_v17 = vsel %vm134_vm6, %v3514_v58, %v129_v45 }
  0xa8   :  { %v3559_v47 = vunpack.i.h.bf16 %v3557_v59  ;;  %v3558_v60 = vunpack.i.l.bf16 %v3557_v59  ;;  %3265 = vmatpush1.bf16.msra.mxu1 %v3264_v0 }
  0xaa   :  { %v154_v63 = vsel %vm153_vm5, %v3559_v47, %v3558_v60  ;;  %v3562_v3 = vpop.permute.xlu1 %3561  ;;  %v159_v5 = vsel %vm153_vm5, %v3558_v60, %v4397_v61 }
  0xab   :  { %v3564_v7 = vunpack.i.h.bf16 %v3562_v3  ;;  %v3563_v11 = vunpack.i.l.bf16 %v3562_v3  ;;  %v148_v12 = vpop.permute.xlu0 %147  ;;  %v3288_v10 = vpack.c.bf16 %v159_v5, %v140_v4  ;;  %v3290_v18 = vpack.c.bf16 %v154_v63, %v135_v22 }
  0xac   :  { %v155_v2 = vsel %vm153_vm5, %v148_v12, %v3559_v47  ;;  %v156_v61 = vsel %vm153_vm5, %v3519_v53, %v148_v12 }
  0xad   :  { %v173_v30 = vsel %vm172_vm7, %v3564_v7, %v3563_v11  ;;  %v178_v32 = vsel %vm172_vm7, %v3563_v11, %v4420_v23  ;;  %3289 = vmatprep.subr.bf16.mxu0 %v3288_v10  ;;  %v3266_v55 = vpack.c.bf16 %v155_v2, %v136_v14  ;;  %v3268_v33 = vpack.c.bf16 %v156_v61, %v137_v17 }
  0xae   :  { %v3295_v58 = vpack.c.bf16 %v4526_v21, %v173_v30  ;;  %3291 = vmatpush1.bf16.msra.mxu0 %v3290_v18  ;;  %v3292_v35 = vpack.c.bf16 %v4535_v52, %v178_v32 }
  0xaf   :  { %v167_v36 = vpop.permute.xlu0 %166  ;;  %3267 = vmatprep.subr.bf16.mxu1 %v3266_v55 }
  0xb0   :  { %v174_v49 = vsel %vm172_vm7, %v167_v36, %v3564_v7  ;;  %v175_v53 = vsel %vm172_vm7, %v3524_v28, %v167_v36  ;;  %3269 = vmatpush1.bf16.msra.mxu1 %v3268_v33  ;;  %3294 = vmatprep.subr.msk.bf16.mxu0 %vm4444_vm10, %v3292_v35 }
  0xb1   :  { %v3270_v23 = vpack.c.bf16 %v4532_v6, %v174_v49  ;;  %v3273_v19 = vpack.c.bf16 %v4529_v8, %v175_v53 }
  0xb2   :  { %3297 = vmatpush1.bf16.msk.msra.mxu0 %vm4444_vm10, %v3295_v58 }
  0xb3   :  { %3272 = vmatprep.subr.msk.bf16.mxu1 %vm4444_vm10, %v3270_v23 }
  0xb4   :  { %3275 = vmatpush1.bf16.msk.msra.mxu1 %vm4444_vm10, %v3273_v19 }
  0xb5   :  { %3182 = vmatmul.mubr.msk.f32.vlgmr.msra.gmra.mrb[2].mxu0 %vm204_vm11, %v4474_v62 }
  0xb6   :  { %929 = vmatprep.mubr.f32.mxu0 %v6911_v9 }
  0xb7   :  { %3179 = vmatmul.mubr.msk.f32.vlgmr.msra.gmra.mrb[0].mxu1 %vm204_vm11, %v4474_v62 }
  0xb8   :  { %787 = vmatprep.mubr.f32.mxu1 %v6911_v9 }
 0x170   :  { %v287_v25 = vpop.f32.mrb[0].mxu0 }
 0x171   :  { %v434_v28 = vmax.f32 %v287_v25, 0.0  ;;  %v289_v39 = vpop.f32.mrb[1].mxu0 }
 0x172   :  { %v435_v20 = vmax.f32 %v289_v39, 0.0 }
 0x173   :  { %v4589_v41 = vmul.f32 %v434_v28, %v4429_v27 }
 0x174   :  { %v4592_v40 = vmul.f32 %v435_v20, %v4426_v26 }
 0x176   :  { %6987 = vst [vmem:[#allocation7_spill] sm:$0xff] %v4592_v40  ;;  %v3570_v37 = vpack.i.bf16 %v4592_v40, %v4589_v41 }
 0x178   :  { %3571 = vrot.lane.b32.xlu0 %v3570_v37, %s4187_s25  ;;  %3566 = vrot.lane.b32.xlu1 %v3570_v37, %s4186_s24 }
 0x17c   :  { %3581 = vrot.lane.b32.xlu0 %v3570_v37, %s4188_s26  ;;  %3576 = vrot.lane.b32.xlu1 %v3570_v37, %s4185_s23 }
 0x188   :  { %v429_v62 = vpop.f32.mrb[2].mxu0 }
 0x189   :  { %v431_v42 = vpop.f32.mrb[3].mxu0  ;;  %v438_v51 = vmax.f32 %v429_v62, 0.0 }
 0x18a   :  { %v358_v44 = vpop.f32.mrb[0].mxu1  ;;  %v439_v43 = vmax.f32 %v431_v42, 0.0 }
 0x18b   :  { %v436_v46 = vmax.f32 %v358_v44, 0.0  ;;  %v360_v48 = vpop.f32.mrb[1].mxu1  ;;  %v4617_v54 = vmul.f32 %v438_v51, %v4526_v21 }
 0x18c   :  { %v437_v24 = vmax.f32 %v360_v48, 0.0  ;;  %v4620_v1 = vmul.f32 %v439_v43, %v4535_v52 }
 0x18d   :  { %v4601_v50 = vmul.f32 %v436_v46, %v4529_v8 }
 0x18e   :  { %v4604_v29 = vmul.f32 %v437_v24, %v4532_v6  ;;  %v3630_v56 = vpack.i.bf16 %v4617_v54, %v4620_v1  ;;  %v3650_v13 = vpack.i.bf16 %v4620_v1, %v4589_v41 }
 0x18f   :  { %v3590_v31 = vpack.i.bf16 %v4601_v50, %v4592_v40 }
 0x190   :  { %6988 = vst [vmem:[#allocation8_spill] sm:$0xff] %v4604_v29  ;;  %v3600_v34 = vpack.i.bf16 %v4601_v50, %v4604_v29  ;;  %v3620_v0 = vpack.i.bf16 %v4604_v29, %v4617_v54 }
 0x191   :  { %3591 = vrot.lane.b32.xlu0 %v3590_v31, %s4190_s30  ;;  %3586 = vrot.lane.b32.xlu1 %v3590_v31, %s4189_s29 }
 0x195   :  { %3601 = vrot.lane.b32.xlu0 %v3600_v34, %s4186_s24  ;;  %3596 = vrot.lane.b32.xlu1 %v3590_v31, %s4191_s5 }
 0x199   :  { %3616 = vrot.lane.b32.xlu0 %v3600_v34, %s4188_s26  ;;  %3606 = vrot.lane.b32.xlu1 %v3600_v34, %s4187_s25 }
 0x19d   :  { %3611 = vrot.lane.b32.xlu1 %v3600_v34, %s4185_s23  ;;  %569 = vrot.lane.b32.xlu0 %v4617_v54, %s4190_s30 }
 0x1a1   :  { %3621 = vrot.lane.b32.xlu1 %v3620_v0, %s4189_s29  ;;  %3631 = vrot.lane.b32.xlu0 %v3630_v56, %s4187_s25 }
 0x1a5   :  { %3641 = vrot.lane.b32.xlu0 %v3630_v56, %s4188_s26  ;;  %3626 = vrot.lane.b32.xlu1 %v3630_v56, %s4186_s24 }
 0x1a9   :  { %583 = vrot.lane.b32.xlu0 %v4601_v50, %s4193_s8  ;;  %3636 = vrot.lane.b32.xlu1 %v3630_v56, %s4185_s23 }
 0x1ad   :  { %3651 = vrot.lane.b32.xlu0 %v3650_v13, %s4190_s30  ;;  %3646 = vrot.lane.b32.xlu1 %v3650_v13, %s4189_s29 }
 0x1b1   :  { %3656 = vrot.lane.b32.xlu0 %v3650_v13, %s4191_s5  ;;  %581 = vrot.lane.b32.xlu1 %v4592_v40, %s4193_s8 }
 0x1b5   :  { %579 = vrot.lane.b32.xlu0 %v4589_v41, %s4193_s8  ;;  %551 = vrot.lane.b32.xlu1 %v4617_v54, %s4191_s5 }
 0x1b9   :  { %549 = vrot.lane.b32.xlu0 %v4604_v29, %s4191_s5  ;;  %567 = vrot.lane.b32.xlu1 %v4604_v29, %s4190_s30 }
 0x1bd   :  { %587 = vrot.lane.b32.xlu0 %v4617_v54, %s4193_s8  ;;  %589 = vrot.lane.b32.xlu1 %v4620_v1, %s4193_s8 }
 0x1c1   :  { %585 = vrot.lane.b32.xlu1 %v4604_v29, %s4193_s8 }
 0x1ea   :  { %v4657_v16 = vpop.permute.xlu0 %3571  ;;  %v4659_v57 = vpop.permute.xlu1 %3566 }
 0x1eb   :  { %v3574_v45 = vunpack.i.h.bf16 %v4657_v16  ;;  %v3573_v59 = vunpack.i.l.bf16 %v4657_v16  ;;  %v3569_v47 = vunpack.i.h.bf16 %v4659_v57  ;;  %v3568_v60 = vunpack.i.l.bf16 %v4659_v57 }
 0x1ed   :  { %v523_v22 = vsel %vm96_vm2, %v3573_v59, %v3574_v45  ;;  %v487_v63 = vsel %vm58_vm1, %v3568_v60, %v3569_v47 }
 0x1ee   :  { %v622_v3 = vrot.slane %v523_v22, 4  ;;  %v604_v4 = vrot.slane %v487_v63, 4  ;;  %v4673_v5 = vpop.permute.xlu0 %3581  ;;  %v4675_v7 = vpop.permute.xlu1 %3576 }
 0x1ef   :  { %v3584_v11 = vunpack.i.h.bf16 %v4673_v5  ;;  %v3583_v12 = vunpack.i.l.bf16 %v4673_v5  ;;  %v3579_v10 = vunpack.i.h.bf16 %v4675_v7  ;;  %v3578_v18 = vunpack.i.l.bf16 %v4675_v7 }
 0x1f1   :  { %v469_v14 = vsel %vm39_vm0, %v3578_v18, %v3579_v10  ;;  %v505_v17 = vsel %vm77_vm3, %v3583_v12, %v3584_v11 }
 0x1f2   :  { %v671_v2 = vsel %vm669_vm12, %v469_v14, %v604_v4  ;;  %v677_v61 = vsel %vm669_vm12, %v505_v17, %v622_v3 }
 0x1f3   :  { %v3298_v30 = vpack.c.bf16 %v677_v61, %v671_v2 }
 0x1f5   :  { %3299 = vmatprep.subr.bf16.mxu1 %v3298_v30 }
 0x203   :  { %v4691_v32 = vpop.permute.xlu0 %3591  ;;  %v4693_v55 = vpop.permute.xlu1 %3586 }
 0x204   :  { %v6915_v35 = vunpack.i.h.bf16 %v4693_v55  ;;  %v3588_v36 = vunpack.i.l.bf16 %v4693_v55  ;;  %v6914_v23 = vunpack.i.h.bf16 %v4691_v32  ;;  %v3593_v19 = vunpack.i.l.bf16 %v4691_v32 }
 0x206   :  { %v540_v39 = vsel %vm115_vm4, %v3588_v36, %v6915_v35  ;;  %v576_v42 = vsel %vm153_vm5, %v3593_v19, %v6914_v23 }
 0x207   :  { %v3602_v33 = vpop.permute.xlu0 %3601  ;;  %v4695_v58 = vpop.permute.xlu1 %3596  ;;  %v640_v48 = vrot.slane %v540_v39, 4  ;;  %v658_v31 = vrot.slane %v576_v42, 4 }
 0x208   :  { %v6913_v25 = vunpack.i.h.bf16 %v4695_v58  ;;  %v3598_v28 = vunpack.i.l.bf16 %v4695_v58  ;;  %v3604_v20 = vunpack.i.h.bf16 %v3602_v33  ;;  %v3603_v44 = vunpack.i.l.bf16 %v3602_v33 }
 0x209   :  { %v4748_v14 = vsel %vm669_vm12, %v4592_v40, %v640_v48 }
 0x20a   :  { %v558_v24 = vsel %vm134_vm6, %v3598_v28, %v6913_v25  ;;  %v4729_v34 = vsel %vm58_vm1, %v3569_v47, %v3604_v20  ;;  %v4735_v56 = vsel %vm58_vm1, %v3604_v20, %v3603_v44 }
 0x20b   :  { %v4699_v49 = vpop.permute.xlu0 %3616  ;;  %v3607_v53 = vpop.permute.xlu1 %3606  ;;  %v4743_v4 = vsel %vm669_vm12, %v558_v24, %v658_v31 }
 0x20c   :  { %v3609_v46 = vunpack.i.h.bf16 %v3607_v53  ;;  %v3608_v51 = vunpack.i.l.bf16 %v3607_v53  ;;  %v6916_v13 = vunpack.i.h.bf16 %v4699_v49  ;;  %v6917_v2 = vunpack.i.l.bf16 %v4699_v49 }
 0x20d   :  { %v3302_v42 = vpack.c.bf16 %v4743_v4, %v4748_v14 }
 0x20e   :  { %v4740_v63 = vsel %vm96_vm2, %v3574_v45, %v3609_v46  ;;  %v4754_v61 = vsel %vm96_vm2, %v3609_v46, %v3608_v51  ;;  %v4761_v53 = vsel %vm77_vm3, %v3584_v11, %v6916_v13 }
 0x20f   :  { %v4711_v37 = vpop.permute.xlu1 %3611  ;;  %v4713_v62 = vpop.permute.xlu0 %569 }
 0x210   :  { %v3614_v45 = vunpack.i.h.bf16 %v4711_v37  ;;  %v3613_v11 = vunpack.i.l.bf16 %v4711_v37 }
 0x213   :  { %v4731_v43 = vpop.permute.xlu1 %3621  ;;  %v3632_v0 = vpop.permute.xlu0 %3631 }
 0x214   :  { %v3634_v22 = vunpack.i.h.bf16 %v3632_v0  ;;  %v3633_v3 = vunpack.i.l.bf16 %v3632_v0  ;;  %v3623_v16 = vunpack.i.l.bf16 %v4731_v43 }
 0x216   :  { %v520_v20 = vsel %vm96_vm2, %v3608_v51, %v3634_v22  ;;  %v524_v46 = vsel %vm96_vm2, %v3633_v3, %v3573_v59  ;;  %v519_v9 = vsel %vm96_vm2, %v3634_v22, %v3633_v3  ;;  %v4780_v51 = vsel %vm39_vm0, %v3579_v10, %v3614_v45 }
 0x217   :  { %v3642_v30 = vpop.permute.xlu0 %3641  ;;  %v3627_v33 = vpop.permute.xlu1 %3626  ;;  %v625_v3 = vrot.slane %v520_v20, 4  ;;  %v626_v23 = vrot.slane %v519_v9, 4 }
 0x218   :  { %v3644_v48 = vunpack.i.h.bf16 %v3642_v30  ;;  %v3629_v24 = vunpack.i.h.bf16 %v3627_v33  ;;  %v3628_v31 = vunpack.i.l.bf16 %v3627_v33  ;;  %v3643_v25 = vunpack.i.l.bf16 %v3642_v30 }
 0x219   :  { %v621_v30 = vrot.slane %v524_v46, 4 }
 0x21a   :  { %v484_v59 = vsel %vm58_vm1, %v3603_v44, %v3629_v24  ;;  %v488_v33 = vsel %vm58_vm1, %v3628_v31, %v3568_v60  ;;  %v483_v47 = vsel %vm58_vm1, %v3629_v24, %v3628_v31  ;;  %v502_v44 = vsel %vm77_vm3, %v6917_v2, %v3644_v48 }
 0x21b   :  { %v4789_v39 = vpop.permute.xlu0 %583  ;;  %v3637_v22 = vpop.permute.xlu1 %3636  ;;  %v607_v0 = vrot.slane %v484_v59, 4  ;;  %v506_v60 = vsel %vm77_vm3, %v3643_v25, %v3583_v12  ;;  %v603_v35 = vrot.slane %v488_v33, 4  ;;  %v501_v46 = vsel %vm77_vm3, %v3644_v48, %v3643_v25 }
 0x21c   :  { %v3639_v10 = vunpack.i.h.bf16 %v3637_v22  ;;  %v3638_v57 = vunpack.i.l.bf16 %v3637_v22  ;;  %v608_v9 = vrot.slane %v483_v47, 4  ;;  %v3624_v2 = vunpack.i.h.bf16 %v4731_v43 }
 0x21d   :  { %v680_v47 = vsel %vm669_vm12, %v502_v44, %v625_v3  ;;  %v676_v48 = vsel %vm669_vm12, %v506_v60, %v621_v30 }
 0x21e   :  { %v466_v20 = vsel %vm39_vm0, %v3613_v11, %v3639_v10  ;;  %v470_v24 = vsel %vm39_vm0, %v3638_v57, %v3578_v18  ;;  %v465_v5 = vsel %vm39_vm0, %v3639_v10, %v3638_v57  ;;  %v681_v10 = vsel %vm669_vm12, %v501_v46, %v626_v23 }
 0x21f   :  { %v3652_v31 = vpop.permute.xlu0 %3651  ;;  %v3647_v59 = vpop.permute.xlu1 %3646  ;;  %v674_v12 = vsel %vm669_vm12, %v466_v20, %v607_v0  ;;  %v670_v25 = vsel %vm669_vm12, %v470_v24, %v603_v35  ;;  %v675_v7 = vsel %vm669_vm12, %v465_v5, %v608_v9 }
 0x220   :  { %v3654_v33 = vunpack.i.h.bf16 %v3652_v31  ;;  %v3653_v22 = vunpack.i.l.bf16 %v3652_v31  ;;  %v3649_v17 = vunpack.i.h.bf16 %v3647_v59  ;;  %v3648_v13 = vunpack.i.l.bf16 %v3647_v59 }
 0x221   :  { %v3316_v0 = vpack.c.bf16 %v680_v47, %v674_v12  ;;  %v3300_v60 = vpack.c.bf16 %v676_v48, %v670_v25  ;;  %v3314_v46 = vpack.c.bf16 %v681_v10, %v675_v7  ;;  %v538_v59 = vsel %vm115_vm4, %v3624_v2, %v3623_v16 }
 0x222   :  { %v537_v18 = vsel %vm115_vm4, %v3623_v16, %v3649_v17  ;;  %v573_v57 = vsel %vm153_vm5, %v4713_v62, %v3654_v33  ;;  %v577_v35 = vsel %vm153_vm5, %v3653_v22, %v3593_v19  ;;  %v578_v43 = vsel %vm153_vm5, %v3654_v33, %v3653_v22 }
 0x223   :  { %v643_v3 = vrot.slane %v537_v18, 4  ;;  %v3657_v44 = vpop.permute.xlu0 %3656  ;;  %v582_v20 = vpop.permute.xlu1 %581  ;;  %v541_v23 = vsel %vm115_vm4, %v3648_v13, %v3588_v36  ;;  %v542_v30 = vsel %vm115_vm4, %v3649_v17, %v3648_v13  ;;  %v661_v5 = vrot.slane %v573_v57, 4  ;;  %3301 = vmatpush1.bf16.msra.mxu1 %v3300_v60  ;;  %3315 = vmatprep.subr.bf16.mxu0 %v3314_v46 }
 0x224   :  { %v639_v9 = vrot.slane %v541_v23, 4  ;;  %v644_v24 = vrot.slane %v542_v30, 4  ;;  %v3659_v31 = vunpack.i.h.bf16 %v3657_v44  ;;  %v3658_v19 = vunpack.i.l.bf16 %v3657_v44  ;;  %3303 = vmatprep.subr.bf16.mxu1 %v3302_v42  ;;  %3317 = vmatpush1.bf16.msra.mxu0 %v3316_v0 }
 0x225   :  { %v657_v12 = vrot.slane %v577_v35, 4  ;;  %v467_v36 = vsel %vm39_vm0, %v3614_v45, %v3613_v11  ;;  %v662_v13 = vrot.slane %v578_v43, 4  ;;  %v594_v33 = vsel %vm172_vm7, %v582_v20, %v4789_v39 }
 0x226   :  { %v559_v17 = vsel %vm134_vm6, %v3658_v19, %v3598_v28  ;;  %v560_v45 = vsel %vm134_vm6, %v3659_v31, %v3658_v19  ;;  %v686_v28 = vsel %vm669_vm12, %v4617_v54, %v643_v3  ;;  %v682_v22 = vsel %vm669_vm12, %v4589_v41, %v639_v9 }
 0x227   :  { %v580_v16 = vpop.permute.xlu0 %579  ;;  %v552_v37 = vpop.permute.xlu1 %551  ;;  %v688_v25 = vsel %vm669_vm12, %v559_v17, %v657_v12  ;;  %v687_v42 = vsel %vm669_vm12, %v4620_v1, %v644_v24  ;;  %v693_v7 = vsel %vm669_vm12, %v560_v45, %v662_v13  ;;  %v6989_v48 = vunpack.i.l.bf16 %v4699_v49 }
 0x228   :  { %v555_v11 = vsel %vm134_vm6, %v552_v37, %v3659_v31  ;;  %v3304_v14 = vpack.c.bf16 %v688_v25, %v682_v22  ;;  %v3318_v18 = vpack.c.bf16 %v693_v7, %v687_v42  ;;  %v6990_v10 = vunpack.i.h.bf16 %v4699_v49 }
 0x229   :  { %v692_v4 = vsel %vm669_vm12, %v555_v11, %v661_v5  ;;  %v6991_v57 = vrot.slane %v4735_v56, 4  ;;  %v6992_v43 = vunpack.i.h.bf16 %v4693_v55  ;;  %v642_v44 = vrot.slane %v538_v59, 4 }
 0x22a   :  { %v3320_v47 = vpack.c.bf16 %v692_v4, %v686_v28  ;;  %v503_v0 = vsel %vm77_vm3, %v6990_v10, %v6989_v48  ;;  %v595_v23 = vsel %vm172_vm7, %v580_v16, %v582_v20  ;;  %3305 = vmatpush1.bf16.msra.mxu1 %v3304_v14  ;;  %v6993_v49 = vrot.slane %v4754_v61, 4  ;;  %3319 = vmatprep.subr.bf16.mxu0 %v3318_v18 }
 0x22b   :  { %v673_v35 = vsel %vm669_vm12, %v467_v36, %v6991_v57  ;;  %v539_v3 = vsel %vm115_vm4, %v6992_v43, %v3624_v2  ;;  %v550_v30 = vpop.permute.xlu0 %549  ;;  %v568_v60 = vpop.permute.xlu1 %567  ;;  %v6994_v55 = vunpack.i.h.bf16 %v4691_v32  ;;  %v695_v20 = vsel %vm669_vm12, %v594_v33, %v4426_v26  ;;  %v452_v32 = vld [vmem:[%s6909_s3] sm:$0xf] }
 0x22c   :  { %v679_v46 = vsel %vm669_vm12, %v503_v0, %v6993_v49  ;;  %v574_v56 = vsel %vm153_vm5, %v568_v60, %v4713_v62  ;;  %v6995_v9 = vrot.slane %v4729_v34, 4  ;;  %3183 = vmatprep.subr.msk.mxu1 %vm704_vm13, %v695_v20  ;;  %3321 = vmatpush1.bf16.msra.mxu0 %v3320_v47  ;;  %v6996_v19 = vrot.slane %v4740_v63, 4 }
 0x22d   :  { %v575_v2 = vsel %vm153_vm5, %v6994_v55, %v568_v60  ;;  %v660_v31 = vrot.slane %v574_v56, 4  ;;  %v3306_v62 = vpack.c.bf16 %v679_v46, %v673_v35  ;;  %v641_v5 = vrot.slane %v539_v3, 4 }
 0x22e   :  { %v672_v61 = vsel %vm669_vm12, %v4780_v51, %v6995_v9  ;;  %v659_v24 = vrot.slane %v575_v2, 4  ;;  %v678_v59 = vsel %vm669_vm12, %v4761_v53, %v6996_v19  ;;  %v556_v34 = vsel %vm134_vm6, %v550_v30, %v552_v37 }
 0x22f   :  { %v6997_v51 = vunpack.i.h.bf16 %v4695_v58  ;;  %v694_v36 = vsel %vm669_vm12, %v595_v23, %v4429_v27  ;;  %v588_v63 = vpop.permute.xlu0 %587  ;;  %v590_v17 = vpop.permute.xlu1 %589  ;;  %v3308_v33 = vpack.c.bf16 %v678_v59, %v672_v61  ;;  %v685_v53 = vsel %vm669_vm12, %v4604_v29, %v642_v44 }
 0x230   :  { %3184 = vmatpush1.msk.msra.mxu1 %vm704_vm13, %v694_v36  ;;  %v691_v37 = vsel %vm669_vm12, %v556_v34, %v660_v31  ;;  %v591_v58 = vsel %vm172_vm7, %v588_v63, %v590_v17  ;;  %v596_v45 = vsel %vm172_vm7, %v590_v17, %v580_v16  ;;  %v6998_v25 = vmov 0.0  }
 0x231   :  { %v557_v12 = vsel %vm134_vm6, %v6997_v51, %v550_v30  ;;  %3185 = vmatmul.mubr.msk.f32.vlgmr.msra.gmra.mrb[2].mxu1 %vm700_vm14, %v452_v32  ;;  %3307 = vmatprep.subr.bf16.mxu1 %v3306_v62  ;;  %v3310_v11 = vpack.c.bf16 %v691_v37, %v685_v53  ;;  %v699_v28 = vsel %vm669_vm12, %v596_v45, %v4535_v52  ;;  %v6920_v19 = vrot.slane %v4589_v41, 4 }
 0x232   :  { %v690_v13 = vsel %vm669_vm12, %v557_v12, %v659_v24  ;;  %3309 = vmatpush1.bf16.msra.mxu1 %v3308_v33  ;;  %v698_v22 = vsel %vm669_vm12, %v591_v58, %v4526_v21  ;;  %858 = vmatprep.mubr.f32.mxu1 %v6998_v25  ;;  %v684_v4 = vsel %vm669_vm12, %v4601_v50, %v641_v5  ;;  %v1469_v59 = vrot.slane %v4592_v40, 4 }
 0x233   :  { %3311 = vmatprep.subr.bf16.mxu1 %v3310_v11  ;;  %3189 = vmatprep.subr.msk.mxu0 %vm704_vm13, %v699_v28  ;;  %v586_v16 = vpop.permute.xlu1 %585  ;;  %v3312_v14 = vpack.c.bf16 %v690_v13, %v684_v4  ;;  %v6919_v34 = vrot.slane %v4601_v50, 4  ;;  %v5028_v12 = vrot.slane %v4604_v29, 4  ;;  %v6918_v36 = vrot.slane %v4617_v54, 4 }
 0x234   :  { %3190 = vmatpush1.msk.msra.mxu0 %vm704_vm13, %v698_v22  ;;  %v592_v42 = vsel %vm172_vm7, %v586_v16, %v588_v63  ;;  %v593_v7 = vsel %vm172_vm7, %v4789_v39, %v586_v16  ;;  %v3755_v5 = vpack.i.bf16 %v1469_v59, %v6920_v19 }
 0x235   :  { %3191 = vmatmul.mubr.msk.f32.vlgmr.msra.gmra.mrb[4].mxu0 %vm700_vm14, %v452_v32  ;;  %v697_v47 = vsel %vm669_vm12, %v592_v42, %v4532_v6  ;;  %v696_v18 = vsel %vm669_vm12, %v593_v7, %v4529_v8  ;;  %v3775_v51 = vpack.i.bf16 %v6919_v34, %v1469_v59  ;;  %6999 = vst [vmem:[#allocation9_spill] sm:$0xff] %v5028_v12 }
 0x236   :  { %3313 = vmatpush1.bf16.msra.mxu1 %v3312_v14  ;;  %1352 = vmatprep.mubr.f32.mxu0 %v6998_v25  ;;  %v5036_v13 = vpack.i.bf16 %v5028_v12, %v6918_v36 }
 0x237   :  { %3186 = vmatprep.subr.msk.mxu1 %vm704_vm13, %v697_v47 }
 0x23a   :  { %3187 = vmatpush1.msk.msra.mxu1 %vm704_vm13, %v696_v18 }
 0x23b   :  { %3188 = vmatmul.mubr.msk.f32.vlgmr.msra.gmra.mrb[4].mxu1 %vm700_vm14, %v452_v32 }
 0x23c   :  { %1281 = vmatprep.mubr.f32.mxu1 %v6998_v25 }
 0x304   :  { %v789_v48 = vpop.f32.mrb[2].mxu1 }
 0x305   :  { %v936_v10 = vmax.f32 %v789_v48, 0.0  ;;  %v791_v39 = vpop.f32.mrb[3].mxu1 }
 0x306   :  { %v937_v0 = vmax.f32 %v791_v39, 0.0 }
 0x307   :  { %v4946_v57 = vmul.f32 %v936_v10, %v4429_v27 }
 0x308   :  { %v4949_v35 = vmul.f32 %v937_v0, %v4426_v26  ;;  %v931_v43 = vpop.f32.mrb[4].mxu0 }
 0x309   :  { %1076 = vrot.lane.b32.xlu0 %v4946_v57, %s4193_s8  ;;  %v940_v3 = vmax.f32 %v931_v43, 0.0  ;;  %v933_v44 = vpop.f32.mrb[5].mxu0 }
 0x30a   :  { %v941_v23 = vmax.f32 %v933_v44, 0.0  ;;  %v3665_v30 = vpack.i.bf16 %v4949_v35, %v4946_v57 }
 0x30b   :  { %v4956_v60 = vmul.f32 %v940_v3, %v4526_v21 }
 0x30c   :  { %3666 = vrot.lane.b32.xlu1 %v3665_v30, %s4187_s25  ;;  %v4961_v49 = vmul.f32 %v941_v23, %v4535_v52 }
 0x30d   :  { %3661 = vrot.lane.b32.xlu0 %v3665_v30, %s4186_s24 }
 0x30e   :  { %v860_v46 = vpop.f32.mrb[4].mxu1  ;;  %v3685_v55 = vpack.i.bf16 %v4956_v60, %v4961_v49  ;;  %v3705_v20 = vpack.i.bf16 %v4961_v49, %v4946_v57 }
 0x30f   :  { %v862_v56 = vpop.f32.mrb[5].mxu1  ;;  %v938_v2 = vmax.f32 %v860_v46, 0.0 }
 0x310   :  { %3676 = vrot.lane.b32.xlu1 %v3665_v30, %s4188_s26  ;;  %v939_v24 = vmax.f32 %v862_v56, 0.0 }
 0x311   :  { %3671 = vrot.lane.b32.xlu0 %v3665_v30, %s4185_s23  ;;  %v4977_v9 = vmul.f32 %v938_v2, %v4529_v8 }
 0x312   :  { %v4986_v31 = vmul.f32 %v939_v24, %v4532_v6 }
 0x313   :  { %v3720_v61 = vpack.i.bf16 %v4977_v9, %v4949_v35 }
 0x314   :  { %3686 = vrot.lane.b32.xlu1 %v3685_v55, %s4187_s25  ;;  %v3735_v32 = vpack.i.bf16 %v4977_v9, %v4986_v31  ;;  %v3750_v62 = vpack.i.bf16 %v4986_v31, %v4956_v60 }
 0x315   :  { %1078 = vrot.lane.b32.xlu0 %v4949_v35, %s4193_s8 }
 0x318   :  { %3696 = vrot.lane.b32.xlu1 %v3685_v55, %s4188_s26 }
 0x319   :  { %3681 = vrot.lane.b32.xlu0 %v3685_v55, %s4186_s24 }
 0x31c   :  { %3706 = vrot.lane.b32.xlu1 %v3705_v20, %s4190_s30 }
 0x31d   :  { %3691 = vrot.lane.b32.xlu0 %v3685_v55, %s4185_s23 }
 0x320   :  { %3711 = vrot.lane.b32.xlu1 %v3705_v20, %s4191_s5 }
 0x321   :  { %3701 = vrot.lane.b32.xlu0 %v3705_v20, %s4189_s29 }
 0x324   :  { %3721 = vrot.lane.b32.xlu1 %v3720_v61, %s4190_s30 }
 0x325   :  { %3716 = vrot.lane.b32.xlu0 %v3720_v61, %s4189_s29 }
 0x328   :  { %1080 = vrot.lane.b32.xlu1 %v4977_v9, %s4193_s8 }
 0x329   :  { %3726 = vrot.lane.b32.xlu0 %v3720_v61, %s4191_s5 }
 0x32c   :  { %3736 = vrot.lane.b32.xlu1 %v3735_v32, %s4187_s25 }
 0x32d   :  { %3731 = vrot.lane.b32.xlu0 %v3735_v32, %s4186_s24 }
 0x330   :  { %3746 = vrot.lane.b32.xlu1 %v3735_v32, %s4188_s26 }
 0x331   :  { %3741 = vrot.lane.b32.xlu0 %v3735_v32, %s4185_s23 }
 0x334   :  { %3751 = vrot.lane.b32.xlu1 %v3750_v62, %s4189_s29 }
 0x335   :  { %1066 = vrot.lane.b32.xlu0 %v4956_v60, %s4190_s30 }
 0x338   :  { %1048 = vrot.lane.b32.xlu1 %v4956_v60, %s4191_s5 }
 0x339   :  { %1064 = vrot.lane.b32.xlu0 %v4986_v31, %s4190_s30 }
 0x33c   :  { %1086 = vrot.lane.b32.xlu1 %v4961_v49, %s4193_s8 }
 0x33d   :  { %1084 = vrot.lane.b32.xlu0 %v4956_v60, %s4193_s8 }
 0x340   :  { %1046 = vrot.lane.b32.xlu1 %v4986_v31, %s4191_s5 }
 0x341   :  { %1082 = vrot.lane.b32.xlu0 %v4986_v31, %s4193_s8 }
 0x344   :  { %3756 = vrot.lane.b32.xlu1 %v3755_v5, %s4185_s23 }
 0x345   :  { %3761 = vrot.lane.b32.xlu0 %v3755_v5, %s4186_s24 }
 0x348   :  { %3766 = vrot.lane.b32.xlu1 %v3755_v5, %s4188_s26 }
 0x349   :  { %3771 = vrot.lane.b32.xlu0 %v3755_v5, %s4187_s25 }
 0x34c   :  { %3776 = vrot.lane.b32.xlu1 %v3775_v51, %s4189_s29 }
 0x34d   :  { %3781 = vrot.lane.b32.xlu0 %v3775_v51, %s4191_s5 }
 0x350   :  { %3786 = vrot.lane.b32.xlu1 %v3775_v51, %s4190_s30 }
 0x351   :  { %3791 = vrot.lane.b32.xlu0 %v3775_v51, %s4193_s8 }
 0x354   :  { %3796 = vrot.lane.b32.xlu1 %v5036_v13, %s4185_s23 }
 0x355   :  { %3801 = vrot.lane.b32.xlu0 %v5036_v13, %s4186_s24 }
 0x358   :  { %3806 = vrot.lane.b32.xlu1 %v5036_v13, %s4188_s26 }
 0x37b   :  { %v5044_v63 = vpop.permute.xlu0 %1076 }
 0x37e   :  { %v5046_v17 = vpop.permute.xlu1 %3666 }
 0x37f   :  { %v6932_v33 = vunpack.i.h.bf16 %v5046_v17  ;;  %v3668_v53 = vunpack.i.l.bf16 %v5046_v17  ;;  %v5050_v37 = vpop.permute.xlu0 %3661  ;;  %v7000_v12 = vunpack.i.h.bf16 %v5046_v17 }
 0x380   :  { %v6929_v58 = vunpack.i.h.bf16 %v5050_v37  ;;  %v3663_v45 = vunpack.i.l.bf16 %v5050_v37 }
 0x381   :  { %v1020_v11 = vsel %vm96_vm2, %v3668_v53, %v6932_v33 }
 0x382   :  { %v984_v28 = vsel %vm58_vm1, %v3663_v45, %v6929_v58  ;;  %v5062_v22 = vpop.permute.xlu1 %3676  ;;  %v1119_v42 = vrot.slane %v1020_v11, 4 }
 0x383   :  { %v6925_v4 = vunpack.i.h.bf16 %v5062_v22  ;;  %v3678_v16 = vunpack.i.l.bf16 %v5062_v22  ;;  %v5066_v14 = vpop.permute.xlu0 %3671  ;;  %v1101_v18 = vrot.slane %v984_v28, 4 }
 0x384   :  { %v6923_v7 = vunpack.i.h.bf16 %v5066_v14  ;;  %v3673_v47 = vunpack.i.l.bf16 %v5066_v14 }
 0x385   :  { %v1002_v48 = vsel %vm77_vm3, %v3678_v16, %v6925_v4 }
 0x386   :  { %v5074_v10 = vpop.permute.xlu1 %3686  ;;  %v966_v39 = vsel %vm39_vm0, %v3673_v47, %v6923_v7  ;;  %v1173_v0 = vsel %vm669_vm12, %v1002_v48, %v1119_v42 }
 0x387   :  { %v5081_v43 = vpop.permute.xlu0 %1078  ;;  %v1167_v3 = vsel %vm669_vm12, %v966_v39, %v1101_v18  ;;  %v3688_v23 = vunpack.i.l.bf16 %v5074_v10  ;;  %v6931_v59 = vunpack.i.h.bf16 %v5074_v10 }
 0x388   :  { %v3322_v44 = vpack.c.bf16 %v1173_v0, %v1167_v3 }
 0x389   :  { %v1021_v2 = vsel %vm96_vm2, %v3688_v23, %v3668_v53  ;;  %v1016_v48 = vsel %vm96_vm2, %v6931_v59, %v3688_v23 }
 0x38a   :  { %3323 = vmatprep.subr.bf16.mxu1 %v3322_v44  ;;  %v5085_v30 = vpop.permute.xlu1 %3696  ;;  %v1118_v5 = vrot.slane %v1021_v2, 4 }
 0x38b   :  { %v5087_v46 = vpop.permute.xlu0 %3681  ;;  %v3698_v56 = vunpack.i.l.bf16 %v5085_v30  ;;  %v6924_v39 = vunpack.i.h.bf16 %v5085_v30 }
 0x38c   :  { %v3683_v55 = vunpack.i.l.bf16 %v5087_v46  ;;  %v6927_v11 = vunpack.i.h.bf16 %v5087_v46 }
 0x38d   :  { %v1003_v32 = vsel %vm77_vm3, %v3698_v56, %v3678_v16  ;;  %v998_v34 = vsel %vm77_vm3, %v6924_v39, %v3698_v56 }
 0x38e   :  { %v985_v20 = vsel %vm58_vm1, %v3683_v55, %v3663_v45  ;;  %v5095_v61 = vpop.permute.xlu1 %3706  ;;  %v1172_v18 = vsel %vm669_vm12, %v1003_v32, %v1118_v5  ;;  %v980_v3 = vsel %vm58_vm1, %v6927_v11, %v3683_v55 }
 0x38f   :  { %v5097_v24 = vpop.permute.xlu0 %3691  ;;  %v1100_v51 = vrot.slane %v985_v20, 4  ;;  %v6928_v2 = vunpack.i.h.bf16 %v5095_v61  ;;  %v3708_v23 = vunpack.i.l.bf16 %v5095_v61 }
 0x390   :  { %v3693_v62 = vunpack.i.l.bf16 %v5097_v24  ;;  %v6921_v0 = vunpack.i.h.bf16 %v5097_v24 }
 0x391   :  { %v5164_v56 = vsel %vm153_vm5, %v6928_v2, %v3708_v23 }
 0x392   :  { %v967_v53 = vsel %vm39_vm0, %v3693_v62, %v3673_v47  ;;  %v5106_v28 = vpop.permute.xlu1 %3711  ;;  %v1092_v47 = vsel %vm172_vm7, %v5044_v63, %v5081_v43  ;;  %v962_v36 = vsel %vm39_vm0, %v6921_v0, %v3693_v62 }
 0x393   :  { %v5108_v45 = vpop.permute.xlu0 %3701  ;;  %v1166_v42 = vsel %vm669_vm12, %v967_v53, %v1100_v51  ;;  %v1123_v51 = vrot.slane %v1016_v48, 4  ;;  %v3713_v4 = vunpack.i.l.bf16 %v5106_v28 }
 0x394   :  { %v3324_v16 = vpack.c.bf16 %v1172_v18, %v1166_v42  ;;  %v3703_v53 = vunpack.i.l.bf16 %v5108_v45  ;;  %v1105_v18 = vrot.slane %v980_v3, 4 }
 0x396   :  { %v5126_v44 = vpop.permute.xlu1 %3721  ;;  %3325 = vmatpush1.bf16.msra.mxu1 %v3324_v16  ;;  %v6930_v16 = vunpack.i.h.bf16 %v5108_v45  ;;  %v1171_v11 = vsel %vm669_vm12, %v962_v36, %v1105_v18 }
 0x397   :  { %v6922_v20 = vunpack.i.h.bf16 %v5126_v44  ;;  %v3723_v32 = vunpack.i.l.bf16 %v5126_v44  ;;  %v5132_v5 = vpop.permute.xlu0 %3716 }
 0x398   :  { %v6926_v42 = vunpack.i.h.bf16 %v5132_v5  ;;  %v3718_v55 = vunpack.i.l.bf16 %v5132_v5 }
 0x399   :  { %v1073_v48 = vsel %vm153_vm5, %v3723_v32, %v6922_v20  ;;  %v1074_v3 = vsel %vm153_vm5, %v3708_v23, %v3723_v32  ;;  %v5177_v23 = vsel %vm115_vm4, %v6930_v16, %v3703_v53 }
 0x39a   :  { %v1037_v19 = vsel %vm115_vm4, %v3718_v55, %v6926_v42  ;;  %v1038_v62 = vsel %vm115_vm4, %v3703_v53, %v3718_v55  ;;  %v5158_v0 = vpop.permute.xlu1 %1080  ;;  %v1154_v2 = vrot.slane %v1074_v3, 4  ;;  %v1155_v58 = vrot.slane %v1073_v48, 4 }
 0x39b   :  { %v1136_v7 = vrot.slane %v1038_v62, 4  ;;  %v1137_v32 = vrot.slane %v1037_v19, 4  ;;  %v5167_v39 = vpop.permute.xlu0 %3726  ;;  %v1091_v19 = vsel %vm172_vm7, %v5081_v43, %v5158_v0 }
 0x39c   :  { %v3729_v42 = vunpack.i.h.bf16 %v5167_v39  ;;  %v3728_v55 = vunpack.i.l.bf16 %v5167_v39 }
 0x39d   :  { %v1179_v53 = vsel %vm669_vm12, %v4949_v35, %v1137_v32  ;;  %v1178_v18 = vsel %vm669_vm12, %v4946_v57, %v1136_v7  ;;  %v1190_v57 = vsel %vm669_vm12, %v1092_v47, %v4429_v27  ;;  %v1177_v7 = vsel %vm669_vm12, %v998_v34, %v1123_v51 }
 0x39e   :  { %v1056_v62 = vsel %vm134_vm6, %v3713_v4, %v3728_v55  ;;  %v3737_v20 = vpop.permute.xlu1 %3736  ;;  %v1055_v36 = vsel %vm134_vm6, %v3728_v55, %v3729_v42  ;;  %v3338_v17 = vpack.c.bf16 %v1177_v7, %v1171_v11  ;;  %v1141_v32 = vrot.slane %v5177_v23, 4 }
 0x39f   :  { %v3739_v48 = vunpack.i.h.bf16 %v3737_v20  ;;  %v3738_v3 = vunpack.i.l.bf16 %v3737_v20  ;;  %v3732_v16 = vpop.permute.xlu0 %3731  ;;  %v1185_v43 = vsel %vm669_vm12, %v1055_v36, %v1155_v58  ;;  %v1184_v59 = vsel %vm669_vm12, %v1056_v62, %v1154_v2 }
 0x3a0   :  { %v3734_v33 = vunpack.i.h.bf16 %v3732_v16  ;;  %v3733_v38 = vunpack.i.l.bf16 %v3732_v16  ;;  %v3326_v29 = vpack.c.bf16 %v1185_v43, %v1179_v53  ;;  %v3328_v40 = vpack.c.bf16 %v1184_v59, %v1178_v18 }
 0x3a1   :  { %v1019_v55 = vsel %vm96_vm2, %v7000_v12, %v3739_v48  ;;  %v1018_v35 = vsel %vm96_vm2, %v3739_v48, %v3738_v3  ;;  %v1159_v58 = vrot.slane %v5164_v56, 4  ;;  %v7001_v2 = vunpack.i.h.bf16 %v5074_v10 }
 0x3a2   :  { %v3747_v20 = vpop.permute.xlu1 %3746  ;;  %3327 = vmatprep.subr.bf16.mxu1 %v3326_v29  ;;  %v7002_v12 = vunpack.i.h.bf16 %v5106_v28  ;;  %v982_v34 = vsel %vm58_vm1, %v3734_v33, %v3733_v38  ;;  %v1191_v10 = vsel %vm669_vm12, %v1091_v19, %v4426_v26  ;;  %v1120_v56 = vrot.slane %v1019_v55, 4  ;;  %v5230_v19 = vld [vmem:[%s6909_s3 + $0x4] sm:$0xf] }
 0x3a3   :  { %v1017_v59 = vsel %vm96_vm2, %v3738_v3, %v7001_v2  ;;  %v3749_v47 = vunpack.i.h.bf16 %v3747_v20  ;;  %v3742_v51 = vpop.permute.xlu0 %3741  ;;  %3329 = vmatpush1.bf16.msra.mxu1 %v3328_v40  ;;  %v1121_v62 = vrot.slane %v1018_v35, 4  ;;  %v3748_v29 = vunpack.i.l.bf16 %v3747_v20 }
 0x3a4   :  { %v1057_v16 = vsel %vm134_vm6, %v7002_v12, %v3713_v4  ;;  %v3744_v11 = vunpack.i.h.bf16 %v3742_v51  ;;  %3193 = vmatprep.subr.msk.mxu1 %vm704_vm13, %v1191_v10  ;;  %v1122_v36 = vrot.slane %v1017_v59, 4  ;;  %v7003_v4 = vunpack.i.h.bf16 %v5050_v37 }
 0x3a5   :  { %v7004_v53 = vunpack.i.h.bf16 %v5087_v46  ;;  %v3743_v18 = vunpack.i.l.bf16 %v3742_v51  ;;  %v1103_v48 = vrot.slane %v982_v34, 4  ;;  %v7005_v3 = vunpack.i.h.bf16 %v5062_v22 }
 0x3a6   :  { %v983_v23 = vsel %vm58_vm1, %v7003_v4, %v3734_v33  ;;  %v7006_v43 = vunpack.i.h.bf16 %v5085_v30  ;;  %v3752_v46 = vpop.permute.xlu1 %3751  ;;  %v7007_v55 = vunpack.i.h.bf16 %v5066_v14  ;;  %v7008_v7 = vunpack.i.h.bf16 %v5097_v24 }
 0x3a7   :  { %v981_v40 = vsel %vm58_vm1, %v3733_v38, %v7004_v53  ;;  %v1001_v37 = vsel %vm77_vm3, %v7005_v3, %v3749_v47  ;;  %v1000_v38 = vsel %vm77_vm3, %v3749_v47, %v3748_v29  ;;  %v3753_v2 = vunpack.i.l.bf16 %v3752_v46  ;;  %v1067_v59 = vpop.permute.xlu0 %1066  ;;  %3194 = vmatpush1.msk.msra.mxu1 %vm704_vm13, %v1190_v57 }
 0x3a8   :  { %v999_v33 = vsel %vm77_vm3, %v3748_v29, %v7006_v43  ;;  %v965_v35 = vsel %vm39_vm0, %v7007_v55, %v3744_v11  ;;  %v963_v22 = vsel %vm39_vm0, %v3743_v18, %v7008_v7  ;;  %v964_v30 = vsel %vm39_vm0, %v3744_v11, %v3743_v18  ;;  %3195 = vmatmul.mubr.msk.f32.vlgmr.msra.gmra.mrb[6].mxu1 %vm700_vm14, %v5230_v19 }
 0x3a9   :  { %v1102_v20 = vrot.slane %v983_v23, 4  ;;  %v7009_v12 = vunpack.i.h.bf16 %v5095_v61  ;;  %3339 = vmatprep.subr.bf16.mxu1 %v3338_v17  ;;  %v1169_v24 = vsel %vm669_vm12, %v964_v30, %v1103_v48  ;;  %v1175_v34 = vsel %vm669_vm12, %v1000_v38, %v1121_v62  ;;  %1423 = vmatprep.mubr.f32.mxu1 %v6998_v25 }
 0x3aa   :  { %v1104_v47 = vrot.slane %v981_v40, 4  ;;  %v3754_v51 = vunpack.i.h.bf16 %v3752_v46  ;;  %v7010_v57 = vunpack.i.h.bf16 %v5108_v45  ;;  %v1049_v11 = vpop.permute.xlu1 %1048  ;;  %v3330_v4 = vpack.c.bf16 %v1175_v34, %v1169_v24 }
 0x3ab   :  { %v1070_v14 = vsel %vm153_vm5, %v1067_v59, %v7009_v12  ;;  %v1174_v23 = vsel %vm669_vm12, %v1001_v37, %v1120_v56  ;;  %v1183_v17 = vsel %vm669_vm12, %v4961_v49, %v1141_v32  ;;  %v7011_v62 = vunpack.i.h.bf16 %v5106_v28  ;;  %v1065_v18 = vpop.permute.xlu0 %1064 }
 0x3ac   :  { %v1034_v10 = vsel %vm115_vm4, %v3753_v2, %v7010_v57  ;;  %v1158_v29 = vrot.slane %v1070_v14, 4  ;;  %v1170_v45 = vsel %vm669_vm12, %v963_v22, %v1104_v47  ;;  %v1176_v40 = vsel %vm669_vm12, %v999_v33, %v1122_v36  ;;  %3331 = vmatprep.subr.bf16.mxu0 %v3330_v4 }
 0x3ad   :  { %v1140_v61 = vrot.slane %v1034_v10, 4  ;;  %v1052_v53 = vsel %vm134_vm6, %v1049_v11, %v7011_v62  ;;  %v1168_v48 = vsel %vm669_vm12, %v965_v35, %v1102_v20  ;;  %v3340_v37 = vpack.c.bf16 %v1176_v40, %v1170_v45 }
 0x3ae   :  { %v1188_v56 = vsel %vm669_vm12, %v1052_v53, %v1158_v29  ;;  %v1189_v49 = vsel %vm669_vm12, %v1057_v16, %v1159_v58  ;;  %v1035_v28 = vsel %vm115_vm4, %v3754_v51, %v3753_v2  ;;  %v7012_v32 = vunpack.i.h.bf16 %v5132_v5  ;;  %v1087_v38 = vpop.permute.xlu1 %1086 }
 0x3af   :  { %v1182_v3 = vsel %vm669_vm12, %v4956_v60, %v1140_v61  ;;  %v3332_v43 = vpack.c.bf16 %v1174_v23, %v1168_v48  ;;  %v3342_v33 = vpack.c.bf16 %v1189_v49, %v1183_v17  ;;  %3341 = vmatpush1.bf16.msra.mxu1 %v3340_v37  ;;  %v1071_v60 = vsel %vm153_vm5, %v1065_v18, %v1067_v59  ;;  %v1085_v16 = vpop.permute.xlu0 %1084 }
 0x3b0   :  { %v1036_v36 = vsel %vm115_vm4, %v7012_v32, %v3754_v51  ;;  %v3344_v46 = vpack.c.bf16 %v1188_v56, %v1182_v3  ;;  %v7013_v55 = vunpack.i.h.bf16 %v5126_v44  ;;  %v1093_v5 = vsel %vm172_vm7, %v1087_v38, %v5044_v63 }
 0x3b1   :  { %3333 = vmatpush1.bf16.msra.mxu0 %v3332_v43  ;;  %3343 = vmatprep.subr.bf16.mxu1 %v3342_v33  ;;  %v1138_v35 = vrot.slane %v1036_v36, 4  ;;  %v1139_v7 = vrot.slane %v1035_v28, 4  ;;  %v1088_v22 = vsel %vm172_vm7, %v1085_v16, %v1087_v38  ;;  %v1195_v2 = vsel %vm669_vm12, %v1093_v5, %v4535_v52 }
 0x3b2   :  { %v1072_v58 = vsel %vm153_vm5, %v7013_v55, %v1065_v18  ;;  %v1157_v44 = vrot.slane %v1071_v60, 4  ;;  %v1047_v30 = vpop.permute.xlu1 %1046  ;;  %v1194_v14 = vsel %vm669_vm12, %v1088_v22, %v4526_v21  ;;  %v1473_v4 = vrot.slane %v4620_v1, 4 }
 0x3b3   :  { %v1156_v59 = vrot.slane %v1072_v58, 4  ;;  %3345 = vmatpush1.bf16.msra.mxu1 %v3344_v46  ;;  %v1053_v20 = vsel %vm134_vm6, %v1047_v30, %v1049_v11  ;;  %v1054_v63 = vsel %vm134_vm6, %v3729_v42, %v1047_v30  ;;  %v1083_v12 = vpop.permute.xlu0 %1082  ;;  %v1180_v24 = vsel %vm669_vm12, %v4977_v9, %v1138_v35  ;;  %v7017_v35 = vld [vmem:[#allocation9_spill] sm:$0xff] }
 0x3b4   :  { %3199 = vmatprep.subr.msk.mxu1 %vm704_vm13, %v1195_v2  ;;  %v1181_v47 = vsel %vm669_vm12, %v4986_v31, %v1139_v7  ;;  %v1187_v51 = vsel %vm669_vm12, %v1053_v20, %v1157_v44  ;;  %v1089_v39 = vsel %vm172_vm7, %v1083_v12, %v1085_v16  ;;  %v1090_v9 = vsel %vm172_vm7, %v5158_v0, %v1083_v12 }
 0x3b5   :  { %v1186_v34 = vsel %vm669_vm12, %v1054_v63, %v1156_v59  ;;  %v3334_v10 = vpack.c.bf16 %v1187_v51, %v1181_v47  ;;  %v1193_v31 = vsel %vm669_vm12, %v1089_v39, %v4532_v6  ;;  %v1192_v42 = vsel %vm669_vm12, %v1090_v9, %v4529_v8 }
 0x3b6   :  { %v3336_v57 = vpack.c.bf16 %v1186_v34, %v1180_v24  ;;  %v7015_v55 = vrot.slane %v4601_v50, 4  ;;  %v7016_v5 = vrot.slane %v4617_v54, 4 }
 0x3b7   :  { %3200 = vmatpush1.msk.msra.mxu1 %vm704_vm13, %v1194_v14  ;;  %3335 = vmatprep.subr.bf16.mxu0 %v3334_v10  ;;  %v5413_v22 = vpop.permute.xlu0 %3761 }
 0x3b8   :  { %3201 = vmatmul.mubr.msk.f32.vlgmr.msra.gmra.mrb[8].mxu1 %vm700_vm14, %v5230_v19  ;;  %3337 = vmatpush1.bf16.msra.mxu0 %v3336_v57  ;;  %v3935_v16 = vpack.i.bf16 %v7016_v5, %v1473_v4  ;;  %v6948_v39 = vunpack.i.h.bf16 %v5413_v22  ;;  %v3763_v10 = vunpack.i.l.bf16 %v5413_v22 }
 0x3b9   :  { %2086 = vmatprep.mubr.f32.mxu1 %v6998_v25  ;;  %3196 = vmatprep.subr.msk.mxu0 %vm704_vm13, %v1193_v31 }
 0x3bb   :  { %v5417_v59 = vpop.permute.xlu0 %3771 }
 0x3bc   :  { %3197 = vmatpush1.msk.msra.mxu0 %vm704_vm13, %v1192_v42  ;;  %v6942_v42 = vunpack.i.h.bf16 %v5417_v59 }
 0x3bd   :  { %3198 = vmatmul.mubr.msk.f32.vlgmr.msra.gmra.mrb[6].mxu0 %vm700_vm14, %v5230_v19  ;;  %v7014_v19 = vrot.slane %v4589_v41, 4 }
 0x3be   :  { %2015 = vmatprep.mubr.f32.mxu0 %v6998_v25 }
 0x3bf   :  { %v5421_v30 = vpop.permute.xlu0 %3781 }
 0x3c3   :  { %v5425_v63 = vpop.permute.xlu0 %3791 }
 0x3c4   :  { %7019 = vst [vmem:[#allocation10_spill] sm:$0xff] %v5425_v63 }
 0x3c7   :  { %v5429_v14 = vpop.permute.xlu0 %3801 }
 0x47b   :  { %v1283_v29 = vpop.f32.mrb[6].mxu1 }
 0x47c   :  { %v1430_v0 = vmax.f32 %v1283_v29, 0.0  ;;  %v1285_v61 = vpop.f32.mrb[7].mxu1  ;;  %v3773_v29 = vunpack.i.l.bf16 %v5417_v59 }
 0x47d   :  { %v1431_v23 = vmax.f32 %v1285_v61, 0.0 }
 0x47e   :  { %v5333_v11 = vmul.f32 %v1430_v0, %v4429_v27 }
 0x47f   :  { %v5340_v62 = vmul.f32 %v1431_v23, %v4426_v26  ;;  %v6950_v23 = vunpack.i.l.bf16 %v5421_v30 }
 0x480   :  { %v3815_v17 = vpack.i.bf16 %v5333_v11, %v1473_v4  ;;  %v6940_v4 = vunpack.i.h.bf16 %v5421_v30 }
 0x481   :  { %v3830_v53 = vpack.i.bf16 %v5340_v62, %v7014_v19 }
 0x482   :  { %3816 = vrot.lane.b32.xlu0 %v3815_v17, %s4186_s24  ;;  %3811 = vrot.lane.b32.xlu1 %v3815_v17, %s4185_s23  ;;  %v5503_v5 = vsel %vm134_vm6, %v6950_v23, %v6940_v4 }
 0x486   :  { %3826 = vrot.lane.b32.xlu0 %v3815_v17, %s4187_s25  ;;  %3821 = vrot.lane.b32.xlu1 %v3815_v17, %s4188_s26 }
 0x48a   :  { %3831 = vrot.lane.b32.xlu0 %v3830_v53, %s4189_s29  ;;  %3841 = vrot.lane.b32.xlu1 %v3830_v53, %s4190_s30 }
 0x48b   :  { %v1425_v45 = vpop.f32.mrb[8].mxu1 }
 0x48c   :  { %v1434_v40 = vmax.f32 %v1425_v45, 0.0  ;;  %v1427_v18 = vpop.f32.mrb[9].mxu1 }
 0x48d   :  { %v1435_v48 = vmax.f32 %v1427_v18, 0.0  ;;  %v6949_v18 = vunpack.i.l.bf16 %v5425_v63 }
 0x48e   :  { %3836 = vrot.lane.b32.xlu0 %v3830_v53, %s4191_s5  ;;  %3846 = vrot.lane.b32.xlu1 %v3830_v53, %s4193_s8  ;;  %v5355_v56 = vmul.f32 %v1434_v40, %v4526_v21  ;;  %v6943_v40 = vunpack.i.h.bf16 %v5425_v63 }
 0x48f   :  { %v5350_v3 = vmul.f32 %v1435_v48, %v4535_v52 }
 0x490   :  { %v1354_v37 = vpop.f32.mrb[6].mxu0 }
 0x491   :  { %v3895_v49 = vpack.i.bf16 %v5350_v3, %v5340_v62  ;;  %v1432_v28 = vmax.f32 %v1354_v37, 0.0  ;;  %v1356_v32 = vpop.f32.mrb[7].mxu0  ;;  %v3965_v36 = vpack.i.bf16 %v5355_v56, %v5350_v3 }
 0x492   :  { %v1433_v43 = vmax.f32 %v1356_v32, 0.0 }
 0x493   :  { %v5362_v33 = vmul.f32 %v1432_v28, %v4529_v8  ;;  %v3803_v28 = vunpack.i.l.bf16 %v5429_v14 }
 0x494   :  { %v5365_v46 = vmul.f32 %v1433_v43, %v4532_v6 }
 0x495   :  { %v3855_v38 = vpack.i.bf16 %v5333_v11, %v5362_v33  ;;  %v3875_v58 = vpack.i.bf16 %v5362_v33, %v7015_v55  ;;  %v5487_v55 = vsel %vm96_vm2, %v3773_v29, %v6942_v42 }
 0x496   :  { %v3885_v60 = vpack.i.bf16 %v5365_v46, %v5355_v56  ;;  %v3940_v7 = vpack.i.bf16 %v5365_v46, %v7017_v35 }
 0x497   :  { %3856 = vrot.lane.b32.xlu0 %v3855_v38, %s4191_s5  ;;  %3851 = vrot.lane.b32.xlu1 %v3855_v38, %s4189_s29 }
 0x49b   :  { %3866 = vrot.lane.b32.xlu0 %v3855_v38, %s4193_s8  ;;  %3861 = vrot.lane.b32.xlu1 %v3855_v38, %s4190_s30  ;;  %v5473_v38 = vsel %vm58_vm1, %v3763_v10, %v6948_v39 }
 0x49f   :  { %3876 = vrot.lane.b32.xlu0 %v3875_v58, %s4186_s24  ;;  %3871 = vrot.lane.b32.xlu1 %v3875_v58, %s4185_s23 }
 0x4a3   :  { %3886 = vrot.lane.b32.xlu0 %v3885_v60, %s4186_s24  ;;  %3881 = vrot.lane.b32.xlu1 %v3885_v60, %s4185_s23 }
 0x4a7   :  { %3896 = vrot.lane.b32.xlu0 %v3895_v49, %s4186_s24  ;;  %3891 = vrot.lane.b32.xlu1 %v3895_v49, %s4185_s23 }
 0x4ab   :  { %3906 = vrot.lane.b32.xlu0 %v3895_v49, %s4187_s25  ;;  %3901 = vrot.lane.b32.xlu1 %v3895_v49, %s4188_s26  ;;  %v6947_v49 = vunpack.i.h.bf16 %v5429_v14 }
 0x4af   :  { %3911 = vrot.lane.b32.xlu0 %v5036_v13, %s4187_s25  ;;  %3916 = vrot.lane.b32.xlu1 %v3885_v60, %s4188_s26  ;;  %v5411_v13 = vpop.permute.xlu1 %3756 }
 0x4b0   :  { %v6945_v51 = vunpack.i.h.bf16 %v5411_v13  ;;  %v3758_v57 = vunpack.i.l.bf16 %v5411_v13 }
 0x4b2   :  { %v5467_v43 = vsel %vm39_vm0, %v3758_v57, %v6945_v51 }
 0x4b3   :  { %3921 = vrot.lane.b32.xlu0 %v3885_v60, %s4187_s25  ;;  %3926 = vrot.lane.b32.xlu1 %v3875_v58, %s4188_s26  ;;  %v5415_v2 = vpop.permute.xlu1 %3766 }
 0x4b4   :  { %v6944_v9 = vunpack.i.h.bf16 %v5415_v2  ;;  %v3768_v31 = vunpack.i.l.bf16 %v5415_v2 }
 0x4b6   :  { %v5481_v60 = vsel %vm77_vm3, %v3768_v31, %v6944_v9 }
 0x4b7   :  { %3931 = vrot.lane.b32.xlu0 %v3875_v58, %s4187_s25  ;;  %3936 = vrot.lane.b32.xlu1 %v3935_v16, %s4189_s29  ;;  %v5419_v44 = vpop.permute.xlu1 %3776 }
 0x4b8   :  { %v6941_v0 = vunpack.i.h.bf16 %v5419_v44  ;;  %v6952_v61 = vunpack.i.l.bf16 %v5419_v44 }
 0x4ba   :  { %v5495_v58 = vsel %vm115_vm4, %v6952_v61, %v6941_v0  ;;  %v5574_v61 = vsel %vm669_vm12, %v5333_v11, %v4589_v41  ;;  %v5597_v41 = vsel %vm669_vm12, %v5350_v3, %v4620_v1 }
 0x4bb   :  { %3946 = vrot.lane.b32.xlu0 %v3935_v16, %s4191_s5  ;;  %3941 = vrot.lane.b32.xlu1 %v3940_v7, %s4189_s29  ;;  %v5423_v20 = vpop.permute.xlu1 %3786  ;;  %7026 = vst [vmem:[#allocation13_spill] sm:$0xff] %v5597_v41 }
 0x4bc   :  { %7018 = vst [vmem:[#allocation9_spill] sm:$0xff] %v5423_v20  ;;  %v6939_v53 = vunpack.i.h.bf16 %v5423_v20  ;;  %v6951_v45 = vunpack.i.l.bf16 %v5423_v20 }
 0x4bf   :  { %3956 = vrot.lane.b32.xlu0 %v3940_v7, %s4191_s5  ;;  %3951 = vrot.lane.b32.xlu1 %v3935_v16, %s4190_s30  ;;  %v5427_v12 = vpop.permute.xlu1 %3796 }
 0x4c0   :  { %v6946_v48 = vunpack.i.h.bf16 %v5427_v12  ;;  %v3798_v37 = vunpack.i.l.bf16 %v5427_v12 }
 0x4c3   :  { %3966 = vrot.lane.b32.xlu0 %v3965_v36, %s4189_s29  ;;  %3961 = vrot.lane.b32.xlu1 %v3940_v7, %s4190_s30  ;;  %v5431_v24 = vpop.permute.xlu1 %3806  ;;  %v5525_v7 = vsel %vm39_vm0, %v6946_v48, %v3798_v37 }
 0x4c4   :  { %v6953_v32 = vunpack.i.h.bf16 %v5431_v24 }
 0x4c7   :  { %3971 = vrot.lane.b32.xlu0 %v3965_v36, %s4191_s5  ;;  %3981 = vrot.lane.b32.xlu1 %v3965_v36, %s4190_s30 }
 0x4cb   :  { %3976 = vrot.lane.b32.xlu0 %v3935_v16, %s4193_s8  ;;  %3986 = vrot.lane.b32.xlu1 %v3965_v36, %s4193_s8  ;;  %v3808_v36 = vunpack.i.l.bf16 %v5431_v24  ;;  %v5511_v16 = vsel %vm153_vm5, %v6951_v45, %v6939_v53  ;;  %v5531_v53 = vsel %vm58_vm1, %v6947_v49, %v3803_v28 }
 0x4cd   :  { %v5545_v48 = vsel %vm77_vm3, %v6953_v32, %v3808_v36 }
 0x4ce   :  { %7020 = vst [vmem:[#allocation11_spill] sm:$0xff] %v5545_v48  ;;  %v7043_v48 = vrot.slane %v5511_v16, 4 }
 0x4cf   :  { %1738 = vrot.lane.b32.xlu0 %v7017_v35, %s4193_s8  ;;  %1720 = vrot.lane.b32.xlu1 %v5365_v46, %s4193_s8  ;;  %v5519_v35 = vsel %vm172_vm7, %v6949_v18, %v6943_v40  ;;  %v7021_v40 = vld [vmem:[#allocation7_spill] sm:$0xff] }
 0x4d0   :  { %v5569_v51 = vsel %vm669_vm12, %v5340_v62, %v7021_v40  ;;  %v7024_v62 = vld [vmem:[#allocation8_spill] sm:$0xff] }
 0x4d1   :  { %v5592_v40 = vsel %vm669_vm12, %v5365_v46, %v7024_v62 }
 0x4d2   :  { %7025 = vst [vmem:[#allocation8_spill] sm:$0xff] %v5592_v40 }
 0x4f4   :  { %v5433_v34 = vpop.permute.xlu0 %3816  ;;  %v5435_v47 = vpop.permute.xlu1 %3811 }
 0x4f5   :  { %v3818_v4 = vunpack.i.l.bf16 %v5433_v34  ;;  %v3813_v23 = vunpack.i.l.bf16 %v5435_v47 }
 0x4f7   :  { %v5558_v32 = vsel %vm58_vm1, %v3818_v4, %v3763_v10  ;;  %v5564_v39 = vsel %vm58_vm1, %v3803_v28, %v3818_v4  ;;  %v5579_v10 = vsel %vm669_vm12, %v5355_v56, %v4617_v54  ;;  %v5583_v45 = vsel %vm39_vm0, %v3813_v23, %v3758_v57 }
 0x4f8   :  { %v5449_v17 = vpop.permute.xlu0 %3826  ;;  %v5451_v19 = vpop.permute.xlu1 %3821  ;;  %7022 = vst [vmem:[#allocation7_spill] sm:$0xff] %v5579_v10  ;;  %v5602_v54 = vsel %vm669_vm12, %v5362_v33, %v4601_v50  ;;  %v5609_v46 = vsel %vm39_vm0, %v3798_v37, %v3813_v23  ;;  %v7029_v33 = vunpack.i.l.bf16 %v5423_v20  ;;  %v7030_v56 = vunpack.i.l.bf16 %v5421_v30 }
 0x4f9   :  { %v6954_v49 = vunpack.i.l.bf16 %v5449_v17  ;;  %v3823_v18 = vunpack.i.l.bf16 %v5451_v19  ;;  %7027 = vst [vmem:[#allocation14_spill] sm:$0xff] %v5602_v54 }
 0x4fb   :  { %v5616_v1 = vsel %vm96_vm2, %v6954_v49, %v3773_v29  ;;  %v5622_v50 = vsel %vm77_vm3, %v3823_v18, %v3768_v31  ;;  %v5634_v31 = vsel %vm77_vm3, %v3808_v36, %v3823_v18  ;;  %v7028_v49 = vunpack.i.l.bf16 %v5419_v44 }
 0x4fc   :  { %v5534_v0 = vpop.permute.xlu0 %3831  ;;  %v5536_v42 = vpop.permute.xlu1 %3841 }
 0x4fd   :  { %v6957_v3 = vunpack.i.l.bf16 %v5534_v0  ;;  %v6962_v23 = vunpack.i.l.bf16 %v5536_v42  ;;  %v3834_v29 = vunpack.i.h.bf16 %v5534_v0  ;;  %v3844_v36 = vunpack.i.h.bf16 %v5536_v42 }
 0x4ff   :  { %v1640_v18 = vsel %vm115_vm4, %v6957_v3, %v7028_v49  ;;  %v1712_v9 = vsel %vm153_vm5, %v6962_v23, %v7029_v33  ;;  %v7032_v49 = vunpack.i.l.bf16 %v5425_v63 }
 0x500   :  { %v5585_v4 = vpop.permute.xlu0 %3836  ;;  %v5587_v28 = vpop.permute.xlu1 %3846 }
 0x501   :  { %7023 = vst [vmem:[#allocation12_spill] sm:$0xff] %v5587_v28  ;;  %v7031_v62 = vunpack.i.l.bf16 %v5585_v4  ;;  %v7033_v3 = vunpack.i.l.bf16 %v5587_v28  ;;  %v3839_v8 = vunpack.i.h.bf16 %v5585_v4  ;;  %v3849_v33 = vunpack.i.h.bf16 %v5587_v28 }
 0x502   :  { %v1828_v28 = vrot.slane %v1640_v18, 4 }
 0x503   :  { %v1676_v21 = vsel %vm134_vm6, %v7031_v62, %v7030_v56  ;;  %v1748_v37 = vsel %vm172_vm7, %v7033_v3, %v7032_v49 }
 0x504   :  { %v1846_v41 = vrot.slane %v1676_v21, 4 }
 0x509   :  { %v5636_v57 = vpop.permute.xlu0 %3856  ;;  %v5638_v11 = vpop.permute.xlu1 %3851 }
 0x50a   :  { %v7034_v23 = vunpack.i.h.bf16 %v5638_v11  ;;  %v7035_v56 = vunpack.i.l.bf16 %v5638_v11  ;;  %v7038_v40 = vunpack.i.l.bf16 %v5636_v57 }
 0x50c   :  { %v1622_v6 = vsel %vm115_vm4, %v7034_v23, %v3834_v29  ;;  %v1621_v62 = vsel %vm115_vm4, %v3834_v29, %v7035_v56  ;;  %v1930_v23 = vrot.slane %v1748_v37, 4  ;;  %v1657_v29 = vsel %vm134_vm6, %v3839_v8, %v7038_v40 }
 0x50d   :  { %v5682_v63 = vpop.permute.xlu0 %3866  ;;  %v5684_v10 = vpop.permute.xlu1 %3861  ;;  %v7039_v56 = vunpack.i.h.bf16 %v5636_v57  ;;  %v7040_v37 = vrot.slane %v5495_v58, 4  ;;  %v5723_v58 = vsel %vm669_vm12, %v1622_v6, %v1828_v28  ;;  %v7045_v28 = vrot.slane %v5519_v35, 4 }
 0x50e   :  { %7036 = vst [vmem:[#allocation15_spill] sm:$0xff] %v5682_v63  ;;  %7037 = vst [vmem:[#allocation16_spill] sm:$0xff] %v5684_v10  ;;  %v6968_v3 = vunpack.i.h.bf16 %v5682_v63  ;;  %v6974_v49 = vunpack.i.l.bf16 %v5682_v63  ;;  %v6970_v54 = vunpack.i.l.bf16 %v5684_v10 }
 0x50f   :  { %v1658_v25 = vsel %vm134_vm6, %v7039_v56, %v3839_v8  ;;  %v5709_v18 = vsel %vm669_vm12, %v1621_v62, %v7040_v37  ;;  %v7042_v56 = vunpack.i.h.bf16 %v5684_v10  ;;  %v1864_v37 = vrot.slane %v1712_v9, 4 }
 0x510   :  { %v1730_v52 = vsel %vm172_vm7, %v6968_v3, %v3849_v33  ;;  %v1693_v21 = vsel %vm153_vm5, %v3844_v36, %v6970_v54  ;;  %v1729_v8 = vsel %vm172_vm7, %v3849_v33, %v6974_v49  ;;  %v5739_v6 = vsel %vm669_vm12, %v1658_v25, %v1846_v41 }
 0x511   :  { %v5716_v40 = vsel %vm669_vm12, %v1730_v52, %v1930_v23  ;;  %v1694_v3 = vsel %vm153_vm5, %v7042_v56, %v3844_v36  ;;  %v3877_v20 = vpop.permute.xlu0 %3876  ;;  %v3872_v54 = vpop.permute.xlu1 %3871  ;;  %v5729_v33 = vsel %vm669_vm12, %v1693_v21, %v7043_v48  ;;  %v7044_v36 = vrot.slane %v5503_v5, 4 }
 0x512   :  { %7041 = vst [vmem:[#allocation17_spill] sm:$0xff] %v5716_v40  ;;  %v3878_v63 = vunpack.i.l.bf16 %v3877_v20  ;;  %v3873_v52 = vunpack.i.l.bf16 %v3872_v54  ;;  %v5746_v48 = vsel %vm669_vm12, %v1694_v3, %v1864_v37  ;;  %v5751_v21 = vsel %vm669_vm12, %v1729_v8, %v7045_v28 }
 0x513   :  { %v5736_v56 = vsel %vm669_vm12, %v1657_v29, %v7044_v36  ;;  %v3879_v5 = vunpack.i.h.bf16 %v3877_v20  ;;  %v7046_v29 = vunpack.i.h.bf16 %v5413_v22  ;;  %v3874_v41 = vunpack.i.h.bf16 %v3872_v54 }
 0x514   :  { %v7047_v3 = vunpack.i.h.bf16 %v5429_v14  ;;  %v7048_v8 = vunpack.i.h.bf16 %v5427_v12  ;;  %v7049_v14 = vunpack.i.h.bf16 %v5411_v13 }
 0x515   :  { %v1531_v25 = vsel %vm58_vm1, %v7046_v29, %v3878_v63  ;;  %v3887_v36 = vpop.permute.xlu0 %3886  ;;  %v3882_v49 = vpop.permute.xlu1 %3881 }
 0x516   :  { %v1530_v35 = vsel %vm58_vm1, %v3878_v63, %v7047_v3  ;;  %v1494_v20 = vsel %vm39_vm0, %v3873_v52, %v7048_v8  ;;  %v3889_v22 = vunpack.i.h.bf16 %v3887_v36  ;;  %v3888_v37 = vunpack.i.l.bf16 %v3887_v36 }
 0x517   :  { %v3884_v28 = vunpack.i.h.bf16 %v3882_v49  ;;  %v3883_v29 = vunpack.i.l.bf16 %v3882_v49  ;;  %v1776_v16 = vrot.slane %v1531_v25, 4  ;;  %v1495_v63 = vsel %vm39_vm0, %v7049_v14, %v3873_v52 }
 0x518   :  { %v1511_v12 = vsel %vm58_vm1, %v3889_v22, %v3888_v37  ;;  %v1512_v36 = vsel %vm58_vm1, %v3879_v5, %v3889_v22  ;;  %v1777_v3 = vrot.slane %v1530_v35, 4  ;;  %v1759_v49 = vrot.slane %v1494_v20, 4 }
 0x519   :  { %v1457_v8 = vsel %vm39_vm0, %v3884_v28, %v3883_v29  ;;  %v1458_v9 = vsel %vm39_vm0, %v3874_v41, %v3884_v28  ;;  %v3897_v25 = vpop.permute.xlu0 %3896  ;;  %v3892_v54 = vpop.permute.xlu1 %3891  ;;  %v1758_v14 = vrot.slane %v1495_v63, 4  ;;  %v7050_v35 = vrot.slane %v5531_v53, 4 }
 0x51a   :  { %v3899_v13 = vunpack.i.h.bf16 %v3897_v25  ;;  %v3898_v23 = vunpack.i.l.bf16 %v3897_v25  ;;  %v3894_v62 = vunpack.i.h.bf16 %v3892_v54  ;;  %v3893_v52 = vunpack.i.l.bf16 %v3892_v54 }
 0x51b   :  { %v1879_v10 = vsel %vm669_vm12, %v1458_v9, %v1759_v49  ;;  %v1885_v40 = vsel %vm669_vm12, %v1512_v36, %v1777_v3  ;;  %v5788_v20 = vsel %vm669_vm12, %v1511_v12, %v7050_v35  ;;  %v7051_v25 = vunpack.i.h.bf16 %v5433_v34 }
 0x51c   :  { %v1510_v22 = vsel %vm58_vm1, %v3888_v37, %v3899_v13  ;;  %v1513_v28 = vsel %vm58_vm1, %v3898_v23, %v3879_v5  ;;  %v7052_v9 = vrot.slane %v5525_v7, 4  ;;  %v1456_v37 = vsel %vm39_vm0, %v3883_v29, %v3894_v62 }
 0x51d   :  { %v1514_v54 = vsel %vm58_vm1, %v7051_v25, %v3898_v23  ;;  %v7053_v53 = vmov %v7051_v25  ;;  %v1459_v5 = vsel %vm39_vm0, %v3893_v52, %v3874_v41  ;;  %v7054_v36 = vunpack.i.h.bf16 %v5435_v47  ;;  %v5815_v7 = vpop.permute.xlu0 %3906  ;;  %v3902_v3 = vpop.permute.xlu1 %3901 }
 0x51e   :  { %v5801_v63 = vsel %vm669_vm12, %v1457_v8, %v7052_v9  ;;  %v1515_v12 = vsel %vm58_vm1, %v3899_v13, %v7053_v53  ;;  %v3368_v8 = vpack.c.bf16 %v1885_v40, %v1879_v10  ;;  %v3908_v13 = vunpack.i.l.bf16 %v5815_v7 }
 0x51f   :  { %v1460_v23 = vsel %vm39_vm0, %v7054_v36, %v3893_v52  ;;  %v7055_v49 = vmov %v7054_v36  ;;  %v3904_v29 = vunpack.i.h.bf16 %v3902_v3  ;;  %v3903_v35 = vunpack.i.l.bf16 %v3902_v3 }
 0x520   :  { %v1461_v34 = vsel %vm39_vm0, %v3894_v62, %v7055_v49  ;;  %v7056_v41 = vrot.slane %v5467_v43, 4  ;;  %v7057_v9 = vrot.slane %v5473_v38, 4  ;;  %v1878_v53 = vsel %vm669_vm12, %v1459_v5, %v1758_v14  ;;  %3369 = vmatprep.subr.bf16.mxu1 %v3368_v8 }
 0x521   :  { %v3909_v47 = vunpack.i.h.bf16 %v5815_v7  ;;  %v7058_v10 = vunpack.i.h.bf16 %v5449_v17  ;;  %v7059_v43 = vunpack.i.h.bf16 %v5451_v19  ;;  %v1884_v5 = vsel %vm669_vm12, %v1513_v28, %v1776_v16  ;;  %v3912_v36 = vpop.permute.xlu0 %3911 }
 0x522   :  { %v1877_v25 = vsel %vm669_vm12, %v1460_v23, %v7056_v41  ;;  %v1883_v52 = vsel %vm669_vm12, %v1514_v54, %v7057_v9  ;;  %v3917_v23 = vpop.permute.xlu1 %3916  ;;  %v7061_v3 = vrot.slane %v5583_v45, 4  ;;  %v7062_v8 = vrot.slane %v5558_v32, 4 }
 0x523   :  { %v1586_v40 = vsel %vm96_vm2, %v7058_v10, %v3908_v13  ;;  %v1551_v62 = vsel %vm77_vm3, %v3904_v29, %v7059_v43  ;;  %v3346_v38 = vpack.c.bf16 %v1883_v52, %v1877_v25  ;;  %v7060_v54 = vmov %v7059_v43 }
 0x524   :  { %v1550_v14 = vsel %vm77_vm3, %v7060_v54, %v3903_v35  ;;  %v1876_v49 = vsel %vm669_vm12, %v1461_v34, %v7061_v3  ;;  %v1882_v41 = vsel %vm669_vm12, %v1515_v12, %v7062_v8  ;;  %v3370_v9 = vpack.c.bf16 %v1884_v5, %v1878_v53 }
 0x525   :  { %3347 = vmatprep.subr.bf16.mxu0 %v3346_v38  ;;  %v3914_v25 = vunpack.i.h.bf16 %v3912_v36  ;;  %v3913_v52 = vunpack.i.l.bf16 %v3912_v36  ;;  %v3919_v19 = vunpack.i.h.bf16 %v3917_v23  ;;  %v3918_v10 = vunpack.i.l.bf16 %v3917_v23  ;;  %v3922_v5 = vpop.permute.xlu0 %3921 }
 0x526   :  { %v3348_v43 = vpack.c.bf16 %v1882_v41, %v1876_v49  ;;  %v7063_v54 = vrot.slane %v5481_v60, 4  ;;  %v7064_v28 = vrot.slane %v5487_v55, 4  ;;  %v7065_v34 = vunpack.i.h.bf16 %v5449_v17  ;;  %3371 = vmatpush1.bf16.msra.mxu1 %v3370_v9  ;;  %v3927_v36 = vpop.permute.xlu1 %3926 }
 0x527   :  { %v7066_v12 = vunpack.i.l.bf16 %v5449_v17  ;;  %v5867_v60 = vsel %vm96_vm2, %v3914_v25, %v3913_v52  ;;  %v7067_v23 = vrot.slane %v5622_v50, 4  ;;  %v3924_v3 = vunpack.i.h.bf16 %v3922_v5 }
 0x528   :  { %v1889_v16 = vsel %vm669_vm12, %v1550_v14, %v7063_v54  ;;  %v1895_v45 = vsel %vm669_vm12, %v1586_v40, %v7064_v28  ;;  %v1587_v32 = vsel %vm96_vm2, %v3909_v47, %v7065_v34  ;;  %v1814_v55 = vrot.slane %v5867_v60, 4  ;;  %3349 = vmatpush1.bf16.msra.mxu0 %v3348_v43 }
 0x529   :  { %v1600_v53 = vsel %vm96_vm2, %v3913_v52, %v7066_v12  ;;  %v3350_v38 = vpack.c.bf16 %v1895_v45, %v1889_v16  ;;  %v1546_v40 = vsel %vm77_vm3, %v3918_v10, %v3904_v29  ;;  %v1888_v17 = vsel %vm669_vm12, %v1551_v62, %v7067_v23  ;;  %v3932_v34 = vpop.permute.xlu0 %3931 }
 0x52a   :  { %v1815_v14 = vrot.slane %v1600_v53, 4  ;;  %v3923_v49 = vunpack.i.l.bf16 %v3922_v5  ;;  %v3929_v8 = vunpack.i.h.bf16 %v3927_v36  ;;  %v3928_v41 = vunpack.i.l.bf16 %v3927_v36 }
 0x52b   :  { %3351 = vmatprep.subr.bf16.mxu0 %v3350_v38  ;;  %v5877_v9 = vsel %vm77_vm3, %v3919_v19, %v3918_v10  ;;  %v7068_v52 = vrot.slane %v5616_v1, 4  ;;  %v7069_v43 = vrot.slane %v5609_v46, 4  ;;  %v7070_v50 = vrot.slane %v5564_v39, 4 }
 0x52c   :  { %v1582_v16 = vsel %vm96_vm2, %v3923_v49, %v3909_v47  ;;  %v5896_v10 = vsel %vm96_vm2, %v3924_v3, %v3923_v49  ;;  %v1548_v1 = vsel %vm77_vm3, %v3929_v8, %v3919_v19  ;;  %v3392_v46 = vpack.c.bf16 %v5788_v20, %v5801_v63  ;;  %v7098_v20 = vld [vmem:[#allocation8_spill] sm:$0xff] }
 0x52d   :  { %v1894_v29 = vsel %vm669_vm12, %v1587_v32, %v7068_v52  ;;  %v5885_v54 = vsel %vm669_vm12, %v1456_v37, %v7069_v43  ;;  %v5890_v62 = vsel %vm669_vm12, %v1510_v22, %v7070_v50  ;;  %v1549_v37 = vsel %vm77_vm3, %v3903_v35, %v3929_v8  ;;  %v3937_v32 = vpop.permute.xlu1 %3936 }
 0x52e   :  { %v7071_v39 = vunpack.i.h.bf16 %v5431_v24  ;;  %v7072_v47 = vunpack.i.h.bf16 %v5415_v2  ;;  %v3352_v45 = vpack.c.bf16 %v1894_v29, %v1888_v17  ;;  %v3934_v12 = vunpack.i.h.bf16 %v3932_v34 }
 0x52f   :  { %v3933_v53 = vunpack.i.l.bf16 %v3932_v34  ;;  %v3390_v38 = vpack.c.bf16 %v5890_v62, %v5885_v54  ;;  %v3939_v24 = vunpack.i.h.bf16 %v3937_v32  ;;  %v3938_v5 = vunpack.i.l.bf16 %v3937_v32  ;;  %v7093_v62 = vld [vmem:[#allocation16_spill] sm:$0xff] }
 0x530   :  { %v1566_v22 = vsel %vm77_vm3, %v3928_v41, %v7071_v39  ;;  %v1567_v28 = vsel %vm77_vm3, %v7072_v47, %v3928_v41  ;;  %3353 = vmatpush1.bf16.msra.mxu0 %v3352_v45  ;;  %v7073_v36 = vrot.slane %v5634_v31, 4  ;;  %v7074_v23 = vpack.c.bf16 %v5709_v18, %v5569_v51 }
 0x531   :  { %v1794_v19 = vrot.slane %v1567_v28, 4  ;;  %v1795_v35 = vrot.slane %v1566_v22, 4  ;;  %v1584_v17 = vsel %vm96_vm2, %v3934_v12, %v3924_v3  ;;  %v1602_v49 = vsel %vm96_vm2, %v3933_v53, %v3914_v25  ;;  %v3947_v3 = vpop.permute.xlu0 %3946  ;;  %v3942_v52 = vpop.permute.xlu1 %3941 }
 0x532   :  { %v5917_v2 = vsel %vm669_vm12, %v1546_v40, %v7073_v36  ;;  %3355 = vmatprep.subr.bf16.mxu0 %v7074_v23  ;;  %v7075_v8 = vunpack.i.h.bf16 %v5417_v59  ;;  %v5931_v31 = vsel %vm669_vm12, %v1582_v16, %v1815_v14  ;;  %v1585_v51 = vsel %vm96_vm2, %v3908_v13, %v3934_v12 }
 0x533   :  { %v1813_v18 = vrot.slane %v1602_v49, 4  ;;  %v5939_v40 = vsel %vm115_vm4, %v3939_v24, %v3938_v5  ;;  %v7076_v25 = vunpack.i.l.bf16 %v5534_v0  ;;  %v3949_v7 = vunpack.i.h.bf16 %v3947_v3 }
 0x534   :  { %v1603_v41 = vsel %vm96_vm2, %v7075_v8, %v3933_v53  ;;  %v1832_v29 = vrot.slane %v5939_v40, 4  ;;  %v3948_v43 = vunpack.i.l.bf16 %v3947_v3  ;;  %v7077_v13 = vpack.c.bf16 %v5723_v58, %v5574_v61 }
 0x535   :  { %v5945_v59 = vsel %vm115_vm4, %v3938_v5, %v7076_v25  ;;  %v1812_v14 = vrot.slane %v1603_v41, 4  ;;  %v3944_v50 = vunpack.i.h.bf16 %v3942_v52  ;;  %v3943_v16 = vunpack.i.l.bf16 %v3942_v52 }
 0x536   :  { %3357 = vmatpush1.bf16.msra.mxu0 %v7077_v13  ;;  %v1891_v39 = vsel %vm669_vm12, %v1548_v1, %v1795_v35  ;;  %v1897_v0 = vsel %vm669_vm12, %v1584_v17, %v1813_v18  ;;  %v1833_v22 = vrot.slane %v5945_v59, 4  ;;  %v7078_v47 = vpack.c.bf16 %v5729_v33, %v5736_v56  ;;  %v3957_v33 = vpop.permute.xlu0 %3956  ;;  %v3952_v56 = vpop.permute.xlu1 %3951 }
 0x537   :  { %v5959_v28 = vsel %vm134_vm6, %v3949_v7, %v3948_v43  ;;  %v7079_v45 = vunpack.i.l.bf16 %v5585_v4  ;;  %v3372_v58 = vpack.c.bf16 %v1897_v0, %v1891_v39  ;;  %v1637_v32 = vsel %vm115_vm4, %v3943_v16, %v3939_v24 }
 0x538   :  { %3359 = vmatprep.subr.bf16.mxu0 %v7078_v47  ;;  %v1850_v1 = vrot.slane %v5959_v28, 4  ;;  %v1890_v12 = vsel %vm669_vm12, %v1549_v37, %v1794_v19  ;;  %v7080_v53 = vunpack.i.l.bf16 %v5638_v11  ;;  %v7081_v35 = vunpack.i.h.bf16 %v5419_v44  ;;  %v6026_v47 = vld [vmem:[%s6908_s2 + $0x8] sm:$0xff] }
 0x539   :  { %v5965_v61 = vsel %vm134_vm6, %v3948_v43, %v7079_v45  ;;  %v3959_v36 = vunpack.i.h.bf16 %v3957_v33  ;;  %v3958_v23 = vunpack.i.l.bf16 %v3957_v33  ;;  %3373 = vmatprep.subr.bf16.mxu1 %v3372_v58  ;;  %v1831_v24 = vrot.slane %v1637_v32, 4  ;;  %v7088_v45 = vld [vmem:[#allocation17_spill] sm:$0xff]  ;;  %v7114_v28 = vld [vmem:[#allocation3_spill] sm:$0xff] }
 0x53a   :  { %v1851_v34 = vrot.slane %v5965_v61, 4  ;;  %v5976_v4 = vsel %vm115_vm4, %v7080_v53, %v3944_v50  ;;  %v5982_v5 = vsel %vm115_vm4, %v7081_v35, %v3943_v16  ;;  %v7082_v17 = vpack.c.bf16 %v5746_v48, %v5739_v6  ;;  %v3962_v43 = vpop.permute.xlu1 %3961 }
 0x53b   :  { %v3954_v37 = vunpack.i.h.bf16 %v3952_v56  ;;  %v3953_v19 = vunpack.i.l.bf16 %v3952_v56  ;;  %v1896_v49 = vsel %vm669_vm12, %v1585_v51, %v1812_v14  ;;  %v1830_v8 = vrot.slane %v5982_v5, 4  ;;  %v7091_v5 = vld [vmem:[#allocation11_spill] sm:$0xff] }
 0x53c   :  { %3361 = vmatpush1.bf16.msra.mxu0 %v7082_v17  ;;  %v7083_v44 = vpack.c.bf16 %v4426_v26, %v5751_v21  ;;  %v5996_v18 = vsel %vm134_vm6, %v3958_v23, %v3949_v7  ;;  %v7085_v25 = vunpack.i.h.bf16 %v5421_v30  ;;  %v3374_v48 = vpack.c.bf16 %v1896_v49, %v1890_v12  ;;  %v3967_v7 = vpop.permute.xlu0 %3966 }
 0x53d   :  { %v7086_v51 = vunpack.i.l.bf16 %v5636_v57  ;;  %v6013_v52 = vsel %vm153_vm5, %v3954_v37, %v3953_v19  ;;  %v7087_v14 = vunpack.i.l.bf16 %v5536_v42  ;;  %v1849_v13 = vrot.slane %v5996_v18, 4 }
 0x53e   :  { %3364 = vmatprep.subr.msk.bf16.mxu0 %vm4444_vm10, %v7083_v44  ;;  %v6002_v6 = vsel %vm134_vm6, %v7085_v25, %v3958_v23  ;;  %v1868_v16 = vrot.slane %v6013_v52, 4  ;;  %3375 = vmatpush1.bf16.msra.mxu1 %v3374_v48  ;;  %v3969_v39 = vunpack.i.h.bf16 %v3967_v7  ;;  %v3968_v0 = vunpack.i.l.bf16 %v3967_v7 }
 0x53f   :  { %v6008_v3 = vsel %vm134_vm6, %v7086_v51, %v3959_v36  ;;  %v1848_v21 = vrot.slane %v6002_v6, 4  ;;  %v6019_v30 = vsel %vm153_vm5, %v3953_v19, %v7087_v14  ;;  %v7089_v58 = vpack.c.bf16 %v4429_v27, %v7088_v45 }
 0x540   :  { %v1869_v42 = vrot.slane %v6019_v30, 4  ;;  %v3964_v32 = vunpack.i.h.bf16 %v3962_v43  ;;  %v3963_v33 = vunpack.i.l.bf16 %v3962_v43  ;;  %v3394_v56 = vpack.c.bf16 %v5931_v31, %v5917_v2 }
 0x541   :  { %3367 = vmatpush1.bf16.msk.msra.mxu0 %vm4444_vm10, %v7089_v58  ;;  %v1619_v12 = vsel %vm115_vm4, %v3944_v50, %v3969_v39  ;;  %v7090_v53 = vunpack.i.h.bf16 %v5638_v11  ;;  %v7092_v23 = vrot.slane %v7091_v5, 4  ;;  %v1898_v2 = vsel %vm669_vm12, %v5896_v10, %v1814_v55  ;;  %v7095_v50 = vld [vmem:[#allocation9_spill] sm:$0xff]  ;;  %v3982_v55 = vpop.permute.xlu1 %3981 }
 0x542   :  { %3391 = vmatprep.subr.bf16.mxu0 %v3390_v38  ;;  %v1618_v54 = vsel %vm115_vm4, %v3969_v39, %v3968_v0  ;;  %v7094_v38 = vunpack.i.l.bf16 %v7093_v62  ;;  %v1709_v31 = vsel %vm153_vm5, %v3963_v33, %v3954_v37  ;;  %v7096_v19 = vunpack.i.h.bf16 %v7095_v50  ;;  %v7107_v50 = vld [vmem:[#allocation7_spill] sm:$0xff] }
 0x543   :  { %v1623_v35 = vsel %vm115_vm4, %v3968_v0, %v7090_v53  ;;  %v1892_v17 = vsel %vm669_vm12, %v5877_v9, %v7092_v23  ;;  %v3972_v9 = vpop.permute.xlu0 %3971  ;;  %v3984_v37 = vunpack.i.h.bf16 %v3982_v55  ;;  %v3983_v25 = vunpack.i.l.bf16 %v3982_v55  ;;  %v7101_v0 = vld [vmem:[#allocation13_spill] sm:$0xff] }
 0x544   :  { %v6059_v11 = vsel %vm153_vm5, %v7094_v38, %v3964_v32  ;;  %v6067_v60 = vsel %vm153_vm5, %v7096_v19, %v3963_v33  ;;  %3205 = vmatmul.mubr.msk.f32.vlgmr.msra.gmra.mrb[8].mxu0 %vm204_vm11, %v6026_v47  ;;  %v3974_v49 = vunpack.i.h.bf16 %v3972_v9  ;;  %v3973_v44 = vunpack.i.l.bf16 %v3972_v9  ;;  %v7106_v38 = vld [vmem:[#allocation14_spill] sm:$0xff] }
 0x545   :  { %v1866_v10 = vrot.slane %v6067_v60, 4  ;;  %v3396_v18 = vpack.c.bf16 %v1898_v2, %v1892_v17  ;;  %3393 = vmatpush1.bf16.msra.mxu0 %v3392_v46  ;;  %v1909_v48 = vsel %vm669_vm12, %v1619_v12, %v1831_v24  ;;  %v1911_v51 = vsel %vm669_vm12, %v1623_v35, %v1833_v22  ;;  %v3987_v33 = vpop.permute.xlu1 %3986  ;;  %v7102_v2 = vld [vmem:[#allocation12_spill] sm:$0xff] }
 0x546   :  { %v7097_v14 = vmov 0.0   ;;  %v1867_v30 = vrot.slane %v1709_v31, 4  ;;  %3395 = vmatprep.subr.bf16.mxu0 %v3394_v56  ;;  %v1654_v7 = vsel %vm134_vm6, %v3974_v49, %v3973_v44  ;;  %v1655_v43 = vsel %vm134_vm6, %v3959_v36, %v3974_v49 }
 0x547   :  { %2157 = vmatprep.mubr.f32.mxu0 %v7097_v14  ;;  %v3376_v63 = vpack.c.bf16 %v1909_v48, %v7098_v20  ;;  %v7099_v46 = vunpack.i.h.bf16 %v5636_v57  ;;  %v1691_v59 = vsel %vm153_vm5, %v3964_v32, %v3984_v37  ;;  %v7100_v22 = vunpack.i.h.bf16 %v7093_v62  ;;  %v3977_v58 = vpop.permute.xlu0 %3976  ;;  %v7108_v48 = vld [vmem:[#allocation10_spill] sm:$0xff] }
 0x548   :  { %v3398_v45 = vpack.c.bf16 %v1911_v51, %v7101_v0  ;;  %v3979_v36 = vunpack.i.h.bf16 %v3977_v58  ;;  %v3978_v56 = vunpack.i.l.bf16 %v3977_v58  ;;  %v3989_v12 = vunpack.i.h.bf16 %v3987_v33  ;;  %v7111_v0 = vld [vmem:[#allocation5_spill] sm:$0xff] }
 0x549   :  { %v1659_v24 = vsel %vm134_vm6, %v3973_v44, %v7099_v46  ;;  %v1695_v39 = vsel %vm153_vm5, %v3983_v25, %v7100_v22  ;;  %3377 = vmatprep.subr.bf16.mxu1 %v3376_v63  ;;  %v3988_v57 = vunpack.i.l.bf16 %v3987_v33  ;;  %3397 = vmatpush1.bf16.msra.mxu0 %v3396_v18  ;;  %v1908_v53 = vsel %vm669_vm12, %v5976_v4, %v1830_v8  ;;  %v7104_v8 = vld [vmem:[#allocation15_spill] sm:$0xff]  ;;  %v1721_v9 = vpop.permute.xlu1 %1720 }
 0x54a   :  { %v1910_v32 = vsel %vm669_vm12, %v1618_v54, %v1832_v29  ;;  %v1915_v35 = vsel %vm669_vm12, %v1655_v43, %v1849_v13  ;;  %v1921_v5 = vsel %vm669_vm12, %v1691_v59, %v1867_v30  ;;  %v1690_v23 = vsel %vm153_vm5, %v3984_v37, %v3983_v25  ;;  %3399 = vmatprep.subr.bf16.mxu0 %v3398_v45 }
 0x54b   :  { %v1744_v17 = vsel %vm172_vm7, %v3979_v36, %v3978_v56  ;;  %v7103_v62 = vunpack.i.l.bf16 %v7102_v2  ;;  %v1726_v40 = vsel %vm172_vm7, %v3989_v12, %v3988_v57  ;;  %v7105_v13 = vunpack.i.h.bf16 %v7104_v8  ;;  %v1739_v60 = vpop.permute.xlu0 %1738 }
 0x54c   :  { %v1934_v29 = vrot.slane %v1744_v17, 4  ;;  %v3378_v31 = vpack.c.bf16 %v1908_v53, %v7106_v38  ;;  %v3400_v19 = vpack.c.bf16 %v1910_v32, %v7107_v50  ;;  %v3380_v55 = vpack.c.bf16 %v1921_v5, %v1915_v35 }
 0x54d   :  { %v1749_v4 = vsel %vm172_vm7, %v3978_v56, %v7103_v62  ;;  %v1731_v54 = vsel %vm172_vm7, %v3988_v57, %v7105_v13  ;;  %v1917_v49 = vsel %vm669_vm12, %v1659_v24, %v1851_v34  ;;  %v1923_v44 = vsel %vm669_vm12, %v1695_v39, %v1869_v42 }
 0x54e   :  { %v1745_v18 = vsel %vm172_vm7, %v1739_v60, %v3979_v36  ;;  %v1935_v37 = vrot.slane %v1749_v4, 4  ;;  %3379 = vmatpush1.bf16.msra.mxu1 %v3378_v31  ;;  %3401 = vmatpush1.bf16.msra.mxu0 %v3400_v19  ;;  %v3402_v25 = vpack.c.bf16 %v1923_v44, %v1917_v49  ;;  %v7109_v51 = vunpack.i.h.bf16 %v7108_v48 }
 0x54f   :  { %v1933_v43 = vrot.slane %v1745_v18, 4  ;;  %v1946_v20 = vsel %vm669_vm12, %v1726_v40, %v1934_v29  ;;  %3381 = vmatprep.subr.bf16.mxu1 %v3380_v55  ;;  %v1727_v34 = vsel %vm172_vm7, %v1721_v9, %v3989_v12  ;;  %v7110_v42 = vunpack.i.l.bf16 %v7104_v8 }
 0x550   :  { %v1746_v30 = vsel %vm172_vm7, %v7109_v51, %v1739_v60  ;;  %3403 = vmatprep.subr.bf16.mxu0 %v3402_v25  ;;  %v1914_v24 = vsel %vm669_vm12, %v6008_v3, %v1848_v21  ;;  %v1920_v59 = vsel %vm669_vm12, %v6059_v11, %v1866_v10  ;;  %v1916_v22 = vsel %vm669_vm12, %v1654_v7, %v1850_v1  ;;  %v7112_v3 = vld [vmem:[#allocation4_spill] sm:$0xff]  ;;  %v7113_v11 = vld [vmem:[#allocation6_spill] sm:$0xff] }
 0x551   :  { %v1932_v61 = vrot.slane %v1746_v30, 4  ;;  %v1728_v63 = vsel %vm172_vm7, %v7110_v42, %v1721_v9  ;;  %v1945_v46 = vsel %vm669_vm12, %v1727_v34, %v1933_v43  ;;  %v3382_v58 = vpack.c.bf16 %v1920_v59, %v1914_v24 }
 0x552   :  { %v3384_v45 = vpack.c.bf16 %v7111_v0, %v1945_v46  ;;  %v1922_v33 = vsel %vm669_vm12, %v1690_v23, %v1868_v16  ;;  %v1947_v36 = vsel %vm669_vm12, %v1731_v54, %v1935_v37  ;;  %v3409_v56 = vpack.c.bf16 %v7114_v28, %v1946_v20 }
 0x553   :  { %v1944_v39 = vsel %vm669_vm12, %v1728_v63, %v1932_v61  ;;  %v3404_v6 = vpack.c.bf16 %v1922_v33, %v1916_v22  ;;  %3383 = vmatpush1.bf16.msra.mxu1 %v3382_v58  ;;  %v3406_v10 = vpack.c.bf16 %v7113_v11, %v1947_v36 }
 0x554   :  { %v3387_v21 = vpack.c.bf16 %v7112_v3, %v1944_v39  ;;  %3386 = vmatprep.subr.msk.bf16.mxu1 %vm4444_vm10, %v3384_v45 }
 0x555   :  { %3405 = vmatpush1.bf16.msra.mxu0 %v3404_v6 }
 0x556   :  { %3408 = vmatprep.subr.msk.bf16.mxu0 %vm4444_vm10, %v3406_v10 }
 0x557   :  { %3389 = vmatpush1.bf16.msk.msra.mxu1 %vm4444_vm10, %v3387_v21 }
 0x559   :  { %3411 = vmatpush1.bf16.msk.msra.mxu0 %vm4444_vm10, %v3409_v56 }
 0x55a   :  { %3208 = vmatmul.mubr.msk.f32.vlgmr.msra.gmra.mrb[10].mxu1 %vm204_vm11, %v6026_v47 }
 0x55b   :  { %2509 = vmatprep.mubr.f32.mxu1 %v7097_v14 }
 0x55c   :  { %3211 = vmatmul.mubr.msk.f32.vlgmr.msra.gmra.mrb[10].mxu0 %vm204_vm11, %v6026_v47 }
 0x55d   :  { %2651 = vmatprep.mubr.f32.mxu0 %v7097_v14 }
 0x617   :  { %v2017_v1 = vpop.f32.mrb[8].mxu0 }
 0x618   :  { %v2164_v52 = vmax.f32 %v2017_v1, 0.0  ;;  %v2019_v16 = vpop.f32.mrb[9].mxu0 }
 0x619   :  { %v2165_v7 = vmax.f32 %v2019_v16, 0.0 }
 0x61a   :  { %3164 = vst [vmem:[%s6910_s4] sm:$0xf0] %v2164_v52  ;;  %v6198_v62 = vmul.f32 %v2164_v52, %v4429_v27 }
 0x61b   :  { %3165 = vst [vmem:[%s6910_s4 + $0x8] sm:$0xf0] %v2165_v7  ;;  %v6201_v4 = vmul.f32 %v2165_v7, %v4426_v26 }
 0x61d   :  { %v4015_v40 = vpack.i.bf16 %v6201_v4, %v6198_v62 }
 0x62d   :  { %v2088_v41 = vpop.f32.mrb[10].mxu1 }
 0x62e   :  { %v2166_v12 = vmax.f32 %v2088_v41, 0.0  ;;  %v2090_v57 = vpop.f32.mrb[11].mxu1 }
 0x62f   :  { %v2159_v47 = vpop.f32.mrb[10].mxu0  ;;  %v2167_v53 = vmax.f32 %v2090_v57, 0.0 }
 0x630   :  { %v2168_v32 = vmax.f32 %v2159_v47, 0.0  ;;  %v2161_v35 = vpop.f32.mrb[11].mxu0  ;;  %v6176_v5 = vmul.f32 %v2166_v12, %v7112_v3  ;;  %3166 = vst [vmem:[%s6910_s4 + $0x10] sm:$0xf0] %v2166_v12 }
 0x631   :  { %v2169_v23 = vmax.f32 %v2161_v35, 0.0  ;;  %v6182_v17 = vmul.f32 %v2167_v53, %v7111_v0  ;;  %3167 = vst [vmem:[%s6910_s4 + $0x18] sm:$0xf0] %v2167_v53 }
 0x632   :  { %3168 = vst [vmem:[%s6910_s4 + $0x20] sm:$0xf0] %v2168_v32  ;;  %v4035_v29 = vpack.i.bf16 %v6176_v5, %v6201_v4  ;;  %v6216_v8 = vmul.f32 %v2168_v32, %v7114_v28 }
 0x633   :  { %3169 = vst [vmem:[%s6910_s4 + $0x28] sm:$0xf0] %v2169_v23  ;;  %v3995_v2 = vpack.i.bf16 %v6176_v5, %v6182_v17  ;;  %v6219_v13 = vmul.f32 %v2169_v23, %v7113_v11 }
 0x634   :  { %v4045_v54 = vpack.i.bf16 %v6182_v17, %v6216_v8 }
 0x635   :  { %3996 = vrot.lane.b32.xlu0 %v3995_v2, %s4187_s25  ;;  %3991 = vrot.lane.b32.xlu1 %v3995_v2, %s4186_s24  ;;  %v4055_v38 = vpack.i.bf16 %v6216_v8, %v6219_v13  ;;  %v4075_v31 = vpack.i.bf16 %v6219_v13, %v6198_v62 }
 0x639   :  { %4001 = vrot.lane.b32.xlu0 %v3995_v2, %s4185_s23  ;;  %4006 = vrot.lane.b32.xlu1 %v3995_v2, %s4188_s26 }
 0x63d   :  { %4016 = vrot.lane.b32.xlu1 %v4015_v40, %s4187_s25  ;;  %4011 = vrot.lane.b32.xlu0 %v4015_v40, %s4186_s24 }
 0x641   :  { %4026 = vrot.lane.b32.xlu1 %v4015_v40, %s4188_s26  ;;  %4021 = vrot.lane.b32.xlu0 %v4015_v40, %s4185_s23 }
 0x645   :  { %4036 = vrot.lane.b32.xlu1 %v4035_v29, %s4190_s30  ;;  %4031 = vrot.lane.b32.xlu0 %v4035_v29, %s4189_s29 }
 0x649   :  { %4041 = vrot.lane.b32.xlu0 %v4035_v29, %s4191_s5  ;;  %2294 = vrot.lane.b32.xlu1 %v6216_v8, %s4190_s30 }
 0x64d   :  { %4046 = vrot.lane.b32.xlu0 %v4045_v54, %s4189_s29  ;;  %4056 = vrot.lane.b32.xlu1 %v4055_v38, %s4187_s25 }
 0x651   :  { %4066 = vrot.lane.b32.xlu1 %v4055_v38, %s4188_s26  ;;  %4051 = vrot.lane.b32.xlu0 %v4055_v38, %s4186_s24 }
 0x655   :  { %2308 = vrot.lane.b32.xlu1 %v6176_v5, %s4193_s8  ;;  %4061 = vrot.lane.b32.xlu0 %v4055_v38, %s4185_s23 }
 0x659   :  { %4076 = vrot.lane.b32.xlu1 %v4075_v31, %s4190_s30  ;;  %4071 = vrot.lane.b32.xlu0 %v4075_v31, %s4189_s29 }
 0x65d   :  { %4081 = vrot.lane.b32.xlu1 %v4075_v31, %s4191_s5  ;;  %2306 = vrot.lane.b32.xlu0 %v6201_v4, %s4193_s8 }
 0x661   :  { %2304 = vrot.lane.b32.xlu1 %v6198_v62, %s4193_s8  ;;  %2276 = vrot.lane.b32.xlu0 %v6216_v8, %s4191_s5 }
 0x665   :  { %2274 = vrot.lane.b32.xlu1 %v6182_v17, %s4191_s5  ;;  %2292 = vrot.lane.b32.xlu0 %v6182_v17, %s4190_s30 }
 0x669   :  { %2312 = vrot.lane.b32.xlu1 %v6216_v8, %s4193_s8  ;;  %2314 = vrot.lane.b32.xlu0 %v6219_v13, %s4193_s8 }
 0x66d   :  { %2310 = vrot.lane.b32.xlu0 %v6182_v17, %s4193_s8 }
 0x6a7   :  { %v6256_v50 = vpop.permute.xlu0 %3996  ;;  %v6258_v19 = vpop.permute.xlu1 %3991 }
 0x6a8   :  { %v3999_v6 = vunpack.i.h.bf16 %v6256_v50  ;;  %v3998_v36 = vunpack.i.l.bf16 %v6256_v50  ;;  %v3994_v21 = vunpack.i.h.bf16 %v6258_v19  ;;  %v3993_v10 = vunpack.i.l.bf16 %v6258_v19 }
 0x6aa   :  { %v6318_v47 = vsel %vm96_vm2, %v3999_v6, %v3998_v36  ;;  %v2210_v53 = vsel %vm58_vm1, %v3994_v21, %v3993_v10 }
 0x6ab   :  { %v6260_v60 = vpop.permute.xlu0 %4001  ;;  %v6262_v9 = vpop.permute.xlu1 %4006  ;;  %v2331_v50 = vrot.slane %v2210_v53, 4 }
 0x6ac   :  { %v4004_v7 = vunpack.i.h.bf16 %v6260_v60  ;;  %v4003_v41 = vunpack.i.l.bf16 %v6260_v60  ;;  %v4009_v32 = vunpack.i.h.bf16 %v6262_v9  ;;  %v4008_v35 = vunpack.i.l.bf16 %v6262_v9 }
 0x6ae   :  { %v2192_v38 = vsel %vm39_vm0, %v4004_v7, %v4003_v41 }
 0x6af   :  { %v6264_v55 = vpop.permute.xlu1 %4016  ;;  %v6266_v49 = vpop.permute.xlu0 %4011 }
 0x6b0   :  { %v4019_v44 = vunpack.i.h.bf16 %v6264_v55  ;;  %v4018_v18 = vunpack.i.l.bf16 %v6264_v55  ;;  %v4014_v37 = vunpack.i.h.bf16 %v6266_v49  ;;  %v4013_v25 = vunpack.i.l.bf16 %v6266_v49 }
 0x6b2   :  { %v2248_v48 = vsel %vm96_vm2, %v4018_v18, %v4019_v44  ;;  %v2212_v51 = vsel %vm58_vm1, %v4013_v25, %v4014_v37  ;;  %v6340_v19 = vsel %vm58_vm1, %v4014_v37, %v3994_v21 }
 0x6b3   :  { %v6278_v30 = vpop.permute.xlu1 %4026  ;;  %v6280_v43 = vpop.permute.xlu0 %4021  ;;  %v2347_v63 = vrot.slane %v2248_v48, 4  ;;  %v2329_v46 = vrot.slane %v2212_v51, 4  ;;  %v2349_v48 = vrot.slane %v6318_v47, 4 }
 0x6b4   :  { %v4029_v20 = vunpack.i.h.bf16 %v6278_v30  ;;  %v4028_v61 = vunpack.i.l.bf16 %v6278_v30  ;;  %v4024_v34 = vunpack.i.h.bf16 %v6280_v43  ;;  %v4023_v42 = vunpack.i.l.bf16 %v6280_v43 }
 0x6b6   :  { %v2230_v24 = vsel %vm77_vm3, %v4028_v61, %v4029_v20  ;;  %v2194_v59 = vsel %vm39_vm0, %v4023_v42, %v4024_v34 }
 0x6b7   :  { %v6296_v22 = vpop.permute.xlu1 %4036  ;;  %v6298_v39 = vpop.permute.xlu0 %4031  ;;  %v2395_v45 = vsel %vm669_vm12, %v2194_v59, %v2329_v46  ;;  %v2401_v58 = vsel %vm669_vm12, %v2230_v24, %v2347_v63  ;;  %v6351_v63 = vsel %vm77_vm3, %v4009_v32, %v4008_v35  ;;  %v6355_v46 = vsel %vm96_vm2, %v4019_v44, %v3999_v6 }
 0x6b8   :  { %v3412_v33 = vpack.c.bf16 %v2401_v58, %v2395_v45  ;;  %v4034_v56 = vunpack.i.h.bf16 %v6298_v39  ;;  %v4033_v1 = vunpack.i.l.bf16 %v6298_v39  ;;  %v6979_v12 = vunpack.i.h.bf16 %v6296_v22 }
 0x6b9   :  { %v4038_v57 = vunpack.i.l.bf16 %v6296_v22  ;;  %v6364_v45 = vsel %vm669_vm12, %v2192_v38, %v2331_v50  ;;  %v7116_v39 = vunpack.i.h.bf16 %v6296_v22 }
 0x6ba   :  { %3413 = vmatprep.subr.bf16.mxu1 %v3412_v33  ;;  %v2265_v23 = vsel %vm115_vm4, %v4033_v1, %v4034_v56  ;;  %v6369_v33 = vsel %vm77_vm3, %v4029_v20, %v4009_v32 }
 0x6bb   :  { %v6308_v52 = vpop.permute.xlu0 %4041  ;;  %v6310_v16 = vpop.permute.xlu1 %2294  ;;  %v2301_v9 = vsel %vm153_vm5, %v4038_v57, %v6979_v12  ;;  %v2365_v51 = vrot.slane %v2265_v23, 4 }
 0x6bc   :  { %v6978_v2 = vunpack.i.h.bf16 %v6308_v52  ;;  %v4043_v40 = vunpack.i.l.bf16 %v6308_v52  ;;  %v2383_v44 = vrot.slane %v2301_v9, 4 }
 0x6be   :  { %v2283_v37 = vsel %vm134_vm6, %v4043_v40, %v6978_v2  ;;  %v6379_v2 = vsel %vm669_vm12, %v6201_v4, %v2365_v51 }
 0x6bf   :  { %v6332_v29 = vpop.permute.xlu0 %4046  ;;  %v4057_v54 = vpop.permute.xlu1 %4056  ;;  %v2413_v20 = vsel %vm669_vm12, %v2283_v37, %v2383_v44 }
 0x6c0   :  { %v4059_v31 = vunpack.i.h.bf16 %v4057_v54  ;;  %v4058_v55 = vunpack.i.l.bf16 %v4057_v54  ;;  %v4049_v32 = vunpack.i.h.bf16 %v6332_v29 }
 0x6c2   :  { %v2245_v6 = vsel %vm96_vm2, %v3998_v36, %v4059_v31  ;;  %v2249_v21 = vsel %vm96_vm2, %v4058_v55, %v4018_v18  ;;  %v2244_v38 = vsel %vm96_vm2, %v4059_v31, %v4058_v55  ;;  %v4048_v36 = vunpack.i.l.bf16 %v6332_v29 }
 0x6c3   :  { %v4067_v24 = vpop.permute.xlu1 %4066  ;;  %v4052_v59 = vpop.permute.xlu0 %4051  ;;  %v2346_v4 = vrot.slane %v2249_v21, 4 }
 0x6c4   :  { %v4069_v53 = vunpack.i.h.bf16 %v4067_v24  ;;  %v4054_v23 = vunpack.i.h.bf16 %v4052_v59  ;;  %v4053_v54 = vunpack.i.l.bf16 %v4052_v59  ;;  %v4068_v50 = vunpack.i.l.bf16 %v4067_v24 }
 0x6c5   :  { %v2350_v24 = vrot.slane %v2245_v6, 4  ;;  %v2351_v59 = vrot.slane %v2244_v38, 4 }
 0x6c6   :  { %v2209_v18 = vsel %vm58_vm1, %v3993_v10, %v4054_v23  ;;  %v2213_v9 = vsel %vm58_vm1, %v4053_v54, %v4013_v25  ;;  %v2208_v51 = vsel %vm58_vm1, %v4054_v23, %v4053_v54  ;;  %v2227_v44 = vsel %vm77_vm3, %v4008_v35, %v4069_v53 }
 0x6c7   :  { %v6390_v31 = vpop.permute.xlu1 %2308  ;;  %v4062_v55 = vpop.permute.xlu0 %4061  ;;  %v2332_v12 = vrot.slane %v2209_v18, 4  ;;  %v2226_v49 = vsel %vm77_vm3, %v4069_v53, %v4068_v50  ;;  %v2231_v25 = vsel %vm77_vm3, %v4068_v50, %v4028_v61  ;;  %v2328_v6 = vrot.slane %v2213_v9, 4 }
 0x6c8   :  { %v4064_v37 = vunpack.i.h.bf16 %v4062_v55  ;;  %v4063_v10 = vunpack.i.l.bf16 %v4062_v55  ;;  %v2333_v23 = vrot.slane %v2208_v51, 4  ;;  %v3416_v51 = vpack.c.bf16 %v2413_v20, %v6379_v2 }
 0x6ca   :  { %v2191_v21 = vsel %vm39_vm0, %v4003_v41, %v4064_v37  ;;  %v2190_v54 = vsel %vm39_vm0, %v4064_v37, %v4063_v10  ;;  %v2195_v35 = vsel %vm39_vm0, %v4063_v10, %v4023_v42  ;;  %v2404_v37 = vsel %vm669_vm12, %v2227_v44, %v2350_v24 }
 0x6cb   :  { %v4077_v38 = vpop.permute.xlu1 %4076  ;;  %v4072_v53 = vpop.permute.xlu0 %4071  ;;  %v2398_v30 = vsel %vm669_vm12, %v2191_v21, %v2332_v12  ;;  %v2394_v9 = vsel %vm669_vm12, %v2195_v35, %v2328_v6  ;;  %v2399_v41 = vsel %vm669_vm12, %v2190_v54, %v2333_v23  ;;  %v2400_v42 = vsel %vm669_vm12, %v2231_v25, %v2346_v4 }
 0x6cc   :  { %v4079_v18 = vunpack.i.h.bf16 %v4077_v38  ;;  %v4078_v55 = vunpack.i.l.bf16 %v4077_v38  ;;  %v4074_v61 = vunpack.i.h.bf16 %v4072_v53  ;;  %v4073_v50 = vunpack.i.l.bf16 %v4072_v53 }
 0x6cd   :  { %v2405_v10 = vsel %vm669_vm12, %v2226_v49, %v2351_v59  ;;  %v3430_v12 = vpack.c.bf16 %v2404_v37, %v2398_v30  ;;  %v3414_v49 = vpack.c.bf16 %v2400_v42, %v2394_v9  ;;  %v2348_v37 = vrot.slane %v6355_v46, 4 }
 0x6ce   :  { %v2262_v58 = vsel %vm115_vm4, %v4048_v36, %v4074_v61  ;;  %v2298_v21 = vsel %vm153_vm5, %v6310_v16, %v4079_v18  ;;  %v2302_v6 = vsel %vm153_vm5, %v4078_v55, %v4038_v57  ;;  %v2303_v2 = vsel %vm153_vm5, %v4079_v18, %v4078_v55 }
 0x6cf   :  { %v2368_v20 = vrot.slane %v2262_v58, 4  ;;  %v4082_v24 = vpop.permute.xlu1 %4081  ;;  %v2307_v44 = vpop.permute.xlu0 %2306  ;;  %v2266_v4 = vsel %vm115_vm4, %v4073_v50, %v4033_v1  ;;  %v2267_v59 = vsel %vm115_vm4, %v4074_v61, %v4073_v50  ;;  %v3428_v25 = vpack.c.bf16 %v2405_v10, %v2399_v41  ;;  %3415 = vmatpush1.bf16.msra.mxu1 %v3414_v49 }
 0x6d0   :  { %v2364_v23 = vrot.slane %v2266_v4, 4  ;;  %v2369_v54 = vrot.slane %v2267_v59, 4  ;;  %v4084_v35 = vunpack.i.h.bf16 %v4082_v24  ;;  %v4083_v57 = vunpack.i.l.bf16 %v4082_v24  ;;  %3417 = vmatprep.subr.bf16.mxu1 %v3416_v51 }
 0x6d1   :  { %v2193_v58 = vsel %vm39_vm0, %v4024_v34, %v4004_v7  ;;  %v2263_v1 = vsel %vm115_vm4, %v4049_v32, %v4048_v36  ;;  %v2386_v38 = vrot.slane %v2298_v21, 4  ;;  %v2382_v53 = vrot.slane %v2302_v6, 4  ;;  %3429 = vmatprep.subr.bf16.mxu0 %v3428_v25 }
 0x6d2   :  { %v2387_v30 = vrot.slane %v2303_v2, 4  ;;  %v2284_v60 = vsel %vm134_vm6, %v4083_v57, %v4043_v40  ;;  %v2285_v43 = vsel %vm134_vm6, %v4084_v35, %v4083_v57  ;;  %v2319_v34 = vsel %vm172_vm7, %v2307_v44, %v6390_v31  ;;  %3431 = vmatpush1.bf16.msra.mxu0 %v3430_v12 }
 0x6d3   :  { %v2305_v7 = vpop.permute.xlu1 %2304  ;;  %v2277_v36 = vpop.permute.xlu0 %2276  ;;  %v2410_v55 = vsel %vm669_vm12, %v6216_v8, %v2368_v20  ;;  %v2406_v40 = vsel %vm669_vm12, %v6198_v62, %v2364_v23  ;;  %v2412_v61 = vsel %vm669_vm12, %v2284_v60, %v2382_v53  ;;  %v2411_v41 = vsel %vm669_vm12, %v6219_v13, %v2369_v54 }
 0x6d4   :  { %v2280_v18 = vsel %vm134_vm6, %v2277_v36, %v4084_v35  ;;  %v3418_v9 = vpack.c.bf16 %v2412_v61, %v2406_v40  ;;  %v2417_v51 = vsel %vm669_vm12, %v2285_v43, %v2387_v30  ;;  %v2403_v8 = vsel %vm669_vm12, %v6351_v63, %v2349_v48 }
 0x6d5   :  { %v2416_v50 = vsel %vm669_vm12, %v2280_v18, %v2386_v38  ;;  %v3432_v10 = vpack.c.bf16 %v2417_v51, %v2411_v41  ;;  %v2264_v62 = vsel %vm115_vm4, %v4034_v56, %v4049_v32  ;;  %v2367_v12 = vrot.slane %v2263_v1, 4 }
 0x6d6   :  { %v3434_v42 = vpack.c.bf16 %v2416_v50, %v2410_v55  ;;  %v2320_v13 = vsel %vm172_vm7, %v2305_v7, %v2307_v44  ;;  %3419 = vmatpush1.bf16.msra.mxu1 %v3418_v9  ;;  %v7115_v6 = vrot.slane %v6340_v19, 4  ;;  %v2419_v48 = vsel %vm669_vm12, %v2319_v34, %v4426_v26 }
 0x6d7   :  { %v2275_v46 = vpop.permute.xlu1 %2274  ;;  %v2293_v21 = vpop.permute.xlu0 %2292  ;;  %3433 = vmatprep.subr.bf16.mxu0 %v3432_v10  ;;  %v2402_v63 = vsel %vm669_vm12, %v6369_v33, %v2348_v37  ;;  %3213 = vmatprep.subr.msk.mxu1 %vm704_vm13, %v2419_v48  ;;  %v3420_v22 = vpack.c.bf16 %v2403_v8, %v6364_v45  ;;  %v2366_v2 = vrot.slane %v2264_v62, 4  ;;  %v2418_v20 = vsel %vm669_vm12, %v2320_v13, %v4429_v27 }
 0x6d8   :  { %v2396_v47 = vsel %vm669_vm12, %v2193_v58, %v7115_v6  ;;  %v2299_v29 = vsel %vm153_vm5, %v2293_v21, %v6310_v16  ;;  %v2300_v56 = vsel %vm153_vm5, %v7116_v39, %v2293_v21  ;;  %3435 = vmatpush1.bf16.msra.mxu0 %v3434_v42  ;;  %v3212_v16 = vld [vmem:[%s6909_s3 + $0x8] sm:$0xf]  ;;  %v2281_v24 = vsel %vm134_vm6, %v2275_v46, %v2277_v36 }
 0x6d9   :  { %v2384_v32 = vrot.slane %v2300_v56, 4  ;;  %v2385_v19 = vrot.slane %v2299_v29, 4  ;;  %v7117_v33 = vunpack.i.h.bf16 %v6308_v52  ;;  %v3422_v25 = vpack.c.bf16 %v2402_v63, %v2396_v47 }
 0x6da   :  { %3214 = vmatpush1.msk.msra.mxu1 %vm704_vm13, %v2418_v20  ;;  %v2409_v45 = vsel %vm669_vm12, %v6182_v17, %v2367_v12  ;;  %v2408_v17 = vsel %vm669_vm12, %v6176_v5, %v2366_v2 }
 0x6db   :  { %v2282_v44 = vsel %vm134_vm6, %v7117_v33, %v2275_v46  ;;  %v2313_v59 = vpop.permute.xlu1 %2312  ;;  %v2315_v49 = vpop.permute.xlu0 %2314  ;;  %v2415_v23 = vsel %vm669_vm12, %v2281_v24, %v2385_v19  ;;  %3215 = vmatmul.mubr.msk.f32.vlgmr.msra.gmra.mrb[12].mxu1 %vm700_vm14, %v3212_v16  ;;  %3421 = vmatprep.subr.bf16.mxu1 %v3420_v22 }
 0x6dc   :  { %v2414_v4 = vsel %vm669_vm12, %v2282_v44, %v2384_v32  ;;  %v2316_v54 = vsel %vm172_vm7, %v2313_v59, %v2315_v49  ;;  %v2321_v52 = vsel %vm172_vm7, %v2315_v49, %v2305_v7  ;;  %v3424_v35 = vpack.c.bf16 %v2415_v23, %v2409_v45  ;;  %3423 = vmatpush1.bf16.msra.mxu1 %v3422_v25 }
 0x6dd   :  { %v2422_v57 = vsel %vm669_vm12, %v2316_v54, %v7114_v28  ;;  %v2423_v58 = vsel %vm669_vm12, %v2321_v52, %v7113_v11  ;;  %2580 = vmatprep.mubr.f32.mxu1 %v7097_v14  ;;  %v3426_v38 = vpack.c.bf16 %v2414_v4, %v2408_v17 }
 0x6de   :  { %3425 = vmatprep.subr.bf16.mxu1 %v3424_v35  ;;  %3219 = vmatprep.subr.msk.mxu0 %vm704_vm13, %v2423_v58 }
 0x6df   :  { %v2311_v1 = vpop.permute.xlu0 %2310  ;;  %3220 = vmatpush1.msk.msra.mxu0 %vm704_vm13, %v2422_v57 }
 0x6e0   :  { %v2317_v53 = vsel %vm172_vm7, %v2311_v1, %v2313_v59  ;;  %3221 = vmatmul.mubr.msk.f32.vlgmr.msra.gmra.mrb[12].mxu0 %vm700_vm14, %v3212_v16  ;;  %v2318_v30 = vsel %vm172_vm7, %v6390_v31, %v2311_v1  ;;  %3427 = vmatpush1.bf16.msra.mxu1 %v3426_v38 }
 0x6e1   :  { %v2421_v60 = vsel %vm669_vm12, %v2317_v53, %v7111_v0  ;;  %3074 = vmatprep.mubr.f32.mxu0 %v7097_v14  ;;  %v2420_v5 = vsel %vm669_vm12, %v2318_v30, %v7112_v3 }
 0x6e2   :  { %3216 = vmatprep.subr.msk.mxu1 %vm704_vm13, %v2421_v60 }
 0x6e4   :  { %3217 = vmatpush1.msk.msra.mxu1 %vm704_vm13, %v2420_v5 }
 0x6e5   :  { %3218 = vmatmul.mubr.msk.f32.vlgmr.msra.gmra.mrb[14].mxu1 %vm700_vm14, %v3212_v16 }
 0x6e6   :  { %3003 = vmatprep.mubr.f32.mxu1 %v7097_v14 }
 0x7ae   :  { %v2511_v43 = vpop.f32.mrb[12].mxu1 }
 0x7af   :  { %v2658_v34 = vmax.f32 %v2511_v43, 0.0  ;;  %v2513_v31 = vpop.f32.mrb[13].mxu1 }
 0x7b0   :  { %v2659_v7 = vmax.f32 %v2513_v31, 0.0 }
 0x7b1   :  { %v6539_v36 = vmul.f32 %v2658_v34, %v4429_v27 }
 0x7b2   :  { %v6542_v18 = vmul.f32 %v2659_v7, %v4426_v26 }
 0x7b3   :  { %v2653_v55 = vpop.f32.mrb[12].mxu0  ;;  %2798 = vrot.lane.b32.xlu1 %v6539_v36, %s4193_s8  ;;  %2762 = vrot.lane.b32.xlu0 %v6539_v36, %s4191_s5 }
 0x7b4   :  { %v2662_v40 = vmax.f32 %v2653_v55, 0.0  ;;  %v2655_v61 = vpop.f32.mrb[13].mxu0  ;;  %v4090_v50 = vpack.i.bf16 %v6542_v18, %v6539_v36 }
 0x7b5   :  { %v2663_v9 = vmax.f32 %v2655_v61, 0.0 }
 0x7b6   :  { %v6553_v41 = vmul.f32 %v2662_v40, %v7114_v28 }
 0x7b7   :  { %4091 = vrot.lane.b32.xlu0 %v4090_v50, %s4187_s25  ;;  %4086 = vrot.lane.b32.xlu1 %v4090_v50, %s4186_s24  ;;  %v6556_v51 = vmul.f32 %v2663_v9, %v7113_v11 }
 0x7b8   :  { %v2582_v37 = vpop.f32.mrb[14].mxu1 }
 0x7b9   :  { %v2660_v42 = vmax.f32 %v2582_v37, 0.0  ;;  %v2584_v10 = vpop.f32.mrb[15].mxu1  ;;  %v4105_v8 = vpack.i.bf16 %v6556_v51, %v6553_v41 }
 0x7ba   :  { %v2661_v13 = vmax.f32 %v2584_v10, 0.0 }
 0x7bb   :  { %4101 = vrot.lane.b32.xlu0 %v4090_v50, %s4188_s26  ;;  %4096 = vrot.lane.b32.xlu1 %v4090_v50, %s4185_s23  ;;  %v6563_v62 = vmul.f32 %v2660_v42, %v7112_v3 }
 0x7bc   :  { %v6579_v21 = vmul.f32 %v2661_v13, %v7111_v0 }
 0x7bd   :  { %v4120_v12 = vpack.i.bf16 %v6563_v62, %v6556_v51  ;;  %v4140_v46 = vpack.i.bf16 %v6563_v62, %v6542_v18 }
 0x7be   :  { %v4155_v6 = vpack.i.bf16 %v6579_v21, %v6539_v36  ;;  %v4165_v47 = vpack.i.bf16 %v6553_v41, %v6579_v21 }
 0x7bf   :  { %2800 = vrot.lane.b32.xlu1 %v6542_v18, %s4193_s8  ;;  %4106 = vrot.lane.b32.xlu0 %v4105_v8, %s4189_s29 }
 0x7c3   :  { %4111 = vrot.lane.b32.xlu1 %v4105_v8, %s4190_s30  ;;  %4121 = vrot.lane.b32.xlu0 %v4120_v12, %s4187_s25 }
 0x7c7   :  { %4116 = vrot.lane.b32.xlu1 %v4120_v12, %s4186_s24  ;;  %4131 = vrot.lane.b32.xlu0 %v4120_v12, %s4188_s26 }
 0x7cb   :  { %4126 = vrot.lane.b32.xlu1 %v4120_v12, %s4185_s23  ;;  %4141 = vrot.lane.b32.xlu0 %v4140_v46, %s4190_s30 }
 0x7cf   :  { %4136 = vrot.lane.b32.xlu1 %v4140_v46, %s4189_s29  ;;  %2802 = vrot.lane.b32.xlu0 %v6563_v62, %s4193_s8 }
 0x7d3   :  { %4146 = vrot.lane.b32.xlu1 %v4140_v46, %s4191_s5  ;;  %4156 = vrot.lane.b32.xlu0 %v4155_v6, %s4190_s30 }
 0x7d7   :  { %4151 = vrot.lane.b32.xlu1 %v4155_v6, %s4189_s29  ;;  %4166 = vrot.lane.b32.xlu0 %v4165_v47, %s4187_s25 }
 0x7db   :  { %4161 = vrot.lane.b32.xlu1 %v4165_v47, %s4186_s24  ;;  %4176 = vrot.lane.b32.xlu0 %v4165_v47, %s4188_s26 }
 0x7df   :  { %4171 = vrot.lane.b32.xlu1 %v4165_v47, %s4185_s23  ;;  %4181 = vrot.lane.b32.xlu0 %v4165_v47, %s4191_s5 }
 0x7e3   :  { %2772 = vrot.lane.b32.xlu1 %v6556_v51, %s4191_s5  ;;  %2804 = vrot.lane.b32.xlu0 %v6579_v21, %s4193_s8 }
 0x7e7   :  { %2806 = vrot.lane.b32.xlu1 %v6553_v41, %s4193_s8  ;;  %2808 = vrot.lane.b32.xlu0 %v6556_v51, %s4193_s8 }
 0x825   :  { %v6604_v29 = vpop.permute.xlu1 %2798  ;;  %v6606_v39 = vpop.permute.xlu0 %2762 }
 0x829   :  { %v6608_v56 = vpop.permute.xlu0 %4091  ;;  %v4087_v48 = vpop.permute.xlu1 %4086 }
 0x82a   :  { %v4094_v63 = vunpack.i.h.bf16 %v6608_v56  ;;  %v4093_v32 = vunpack.i.l.bf16 %v6608_v56  ;;  %v4089_v19 = vunpack.i.h.bf16 %v4087_v48  ;;  %v4088_v16 = vunpack.i.l.bf16 %v4087_v48 }
 0x82c   :  { %v2742_v22 = vsel %vm96_vm2, %v4093_v32, %v4094_v63  ;;  %v2706_v2 = vsel %vm58_vm1, %v4088_v16, %v4089_v19 }
 0x82d   :  { %v4102_v20 = vpop.permute.xlu0 %4101  ;;  %v4097_v24 = vpop.permute.xlu1 %4096  ;;  %v2841_v49 = vrot.slane %v2742_v22, 4  ;;  %v2823_v25 = vrot.slane %v2706_v2, 4 }
 0x82e   :  { %v4104_v33 = vunpack.i.h.bf16 %v4102_v20  ;;  %v4103_v44 = vunpack.i.l.bf16 %v4102_v20  ;;  %v4099_v4 = vunpack.i.h.bf16 %v4097_v24  ;;  %v4098_v59 = vunpack.i.l.bf16 %v4097_v24 }
 0x830   :  { %v2724_v45 = vsel %vm77_vm3, %v4103_v44, %v4104_v33  ;;  %v2688_v23 = vsel %vm39_vm0, %v4098_v59, %v4099_v4 }
 0x831   :  { %v2801_v54 = vpop.permute.xlu1 %2800  ;;  %v6620_v52 = vpop.permute.xlu0 %4106  ;;  %v2889_v35 = vsel %vm669_vm12, %v2688_v23, %v2823_v25  ;;  %v2895_v57 = vsel %vm669_vm12, %v2724_v45, %v2841_v49 }
 0x832   :  { %v3436_v58 = vpack.c.bf16 %v2895_v57, %v2889_v35  ;;  %v4109_v40 = vunpack.i.h.bf16 %v6620_v52  ;;  %v4108_v61 = vunpack.i.l.bf16 %v6620_v52 }
 0x834   :  { %3437 = vmatprep.subr.bf16.mxu1 %v3436_v58 }
 0x835   :  { %v6624_v17 = vpop.permute.xlu1 %4111  ;;  %v6626_v1 = vpop.permute.xlu0 %4121 }
 0x836   :  { %v4123_v38 = vunpack.i.l.bf16 %v6626_v1  ;;  %v4114_v37 = vunpack.i.h.bf16 %v6624_v17  ;;  %v4113_v42 = vunpack.i.l.bf16 %v6624_v17  ;;  %v4124_v12 = vunpack.i.h.bf16 %v6626_v1 }
 0x838   :  { %v2743_v43 = vsel %vm96_vm2, %v4123_v38, %v4093_v32  ;;  %v6687_v49 = vsel %vm153_vm5, %v4113_v42, %v4114_v37  ;;  %v2741_v25 = vsel %vm96_vm2, %v4094_v63, %v4124_v12 }
 0x839   :  { %v6629_v53 = vpop.permute.xlu1 %4116  ;;  %v6631_v30 = vpop.permute.xlu0 %4131  ;;  %v2840_v10 = vrot.slane %v2743_v43, 4 }
 0x83a   :  { %v4118_v60 = vunpack.i.l.bf16 %v6629_v53  ;;  %v4133_v5 = vunpack.i.l.bf16 %v6631_v30  ;;  %v4119_v34 = vunpack.i.h.bf16 %v6629_v53  ;;  %v4134_v46 = vunpack.i.h.bf16 %v6631_v30 }
 0x83c   :  { %v2707_v31 = vsel %vm58_vm1, %v4118_v60, %v4088_v16  ;;  %v2725_v50 = vsel %vm77_vm3, %v4133_v5, %v4103_v44  ;;  %v2705_v13 = vsel %vm58_vm1, %v4089_v19, %v4119_v34  ;;  %v2814_v44 = vsel %vm172_vm7, %v6604_v29, %v2801_v54 }
 0x83d   :  { %v6644_v7 = vpop.permute.xlu1 %4126  ;;  %v6646_v55 = vpop.permute.xlu0 %4141  ;;  %v2822_v8 = vrot.slane %v2707_v31, 4  ;;  %v2894_v22 = vsel %vm669_vm12, %v2725_v50, %v2840_v10  ;;  %v2824_v45 = vrot.slane %v2705_v13, 4  ;;  %v2723_v23 = vsel %vm77_vm3, %v4104_v33, %v4134_v46 }
 0x83e   :  { %v4128_v9 = vunpack.i.l.bf16 %v6644_v7  ;;  %v4129_v47 = vunpack.i.h.bf16 %v6644_v7  ;;  %v4144_v56 = vunpack.i.h.bf16 %v6646_v55  ;;  %v4143_v19 = vunpack.i.l.bf16 %v6646_v55 }
 0x83f   :  { %v6711_v33 = vsel %vm669_vm12, %v2814_v44, %v4429_v27  ;;  %v2842_v50 = vrot.slane %v2741_v25, 4  ;;  %v2880_v27 = vrot.slane %v6687_v49, 4 }
 0x840   :  { %v2689_v6 = vsel %vm39_vm0, %v4128_v9, %v4098_v59  ;;  %v6683_v59 = vsel %vm115_vm4, %v4108_v61, %v4109_v40  ;;  %v2687_v35 = vsel %vm39_vm0, %v4099_v4, %v4129_v47  ;;  %v2795_v63 = vsel %vm153_vm5, %v4143_v19, %v4144_v56 }
 0x841   :  { %v4137_v48 = vpop.permute.xlu1 %4136  ;;  %v6669_v32 = vpop.permute.xlu0 %2802  ;;  %v2888_v16 = vsel %vm669_vm12, %v2689_v6, %v2822_v8  ;;  %v6721_v6 = vsel %vm669_vm12, %v2687_v35, %v2824_v45  ;;  %v6726_v44 = vsel %vm669_vm12, %v2723_v23, %v2842_v50 }
 0x842   :  { %v4139_v2 = vunpack.i.h.bf16 %v4137_v48  ;;  %v4138_v20 = vunpack.i.l.bf16 %v4137_v48  ;;  %v3438_v24 = vpack.c.bf16 %v2894_v22, %v2888_v16  ;;  %v2813_v4 = vsel %vm172_vm7, %v2801_v54, %v6669_v32 }
 0x843   :  { %v2877_v16 = vrot.slane %v2795_v63, 4  ;;  %v6734_v45 = vsel %vm669_vm12, %v2813_v4, %v4426_v26 }
 0x844   :  { %3439 = vmatpush1.bf16.msra.mxu1 %v3438_v24  ;;  %v2759_v57 = vsel %vm115_vm4, %v4138_v20, %v4139_v2 }
 0x845   :  { %v6703_v58 = vpop.permute.xlu1 %4146  ;;  %v4157_v17 = vpop.permute.xlu0 %4156  ;;  %v2859_v10 = vrot.slane %v2759_v57, 4 }
 0x846   :  { %v4149_v43 = vunpack.i.h.bf16 %v6703_v58  ;;  %v4148_v31 = vunpack.i.l.bf16 %v6703_v58  ;;  %v4159_v55 = vunpack.i.h.bf16 %v4157_v17  ;;  %v4158_v13 = vunpack.i.l.bf16 %v4157_v17 }
 0x847   :  { %v2901_v26 = vsel %vm669_vm12, %v6542_v18, %v2859_v10 }
 0x848   :  { %v2777_v8 = vsel %vm134_vm6, %v4148_v31, %v4149_v43  ;;  %v6730_v54 = vsel %vm153_vm5, %v4159_v55, %v4113_v42  ;;  %v2778_v23 = vsel %vm134_vm6, %v6606_v39, %v4148_v31  ;;  %v2796_v42 = vsel %vm153_vm5, %v4158_v13, %v4143_v19 }
 0x849   :  { %v4152_v22 = vpop.permute.xlu1 %4151  ;;  %v4167_v24 = vpop.permute.xlu0 %4166  ;;  %v2907_v48 = vsel %vm669_vm12, %v2777_v8, %v2877_v16  ;;  %v2879_v4 = vrot.slane %v6730_v54, 4  ;;  %v6751_v8 = vsel %vm153_vm5, %v4144_v56, %v4159_v55  ;;  %v2797_v16 = vsel %vm153_vm5, %v4114_v37, %v4158_v13 }
 0x84a   :  { %v4154_v25 = vunpack.i.h.bf16 %v4152_v22  ;;  %v4153_v57 = vunpack.i.l.bf16 %v4152_v22  ;;  %v4169_v35 = vunpack.i.h.bf16 %v4167_v24  ;;  %v4168_v17 = vunpack.i.l.bf16 %v4167_v24 }
 0x84b   :  { %v3440_v55 = vpack.c.bf16 %v2907_v48, %v2901_v26  ;;  %v2876_v37 = vrot.slane %v2796_v42, 4  ;;  %v2881_v24 = vrot.slane %v2797_v16, 4  ;;  %v7119_v54 = vpack.c.bf16 %v6726_v44, %v6721_v6 }
 0x84c   :  { %v2760_v50 = vsel %vm115_vm4, %v4153_v57, %v4138_v20  ;;  %v6757_v31 = vsel %vm115_vm4, %v4139_v2, %v4154_v25  ;;  %v2757_v18 = vsel %vm115_vm4, %v4154_v25, %v4108_v61  ;;  %v6767_v56 = vsel %vm115_vm4, %v4109_v40, %v4153_v57 }
 0x84d   :  { %v4162_v19 = vpop.permute.xlu1 %4161  ;;  %v4177_v22 = vpop.permute.xlu0 %4176  ;;  %v2858_v20 = vrot.slane %v2760_v50, 4  ;;  %v2739_v2 = vsel %vm96_vm2, %v4168_v17, %v4169_v35  ;;  %v2740_v10 = vsel %vm96_vm2, %v4124_v12, %v4168_v17  ;;  %v2860_v61 = vrot.slane %v6757_v31, 4  ;;  %3441 = vmatprep.subr.bf16.mxu1 %v3440_v55 }
 0x84e   :  { %v4164_v13 = vunpack.i.h.bf16 %v4162_v19  ;;  %v4163_v52 = vunpack.i.l.bf16 %v4162_v19  ;;  %v4178_v25 = vunpack.i.l.bf16 %v4177_v22  ;;  %v2861_v40 = vrot.slane %v2757_v18, 4 }
 0x84f   :  { %v2863_v57 = vrot.slane %v6767_v56, 4  ;;  %v2738_v48 = vsel %vm96_vm2, %v4169_v35, %v4123_v38  ;;  %v4179_v42 = vunpack.i.h.bf16 %v4177_v22  ;;  %v2843_v63 = vrot.slane %v2740_v10, 4 }
 0x850   :  { %v2844_v12 = vrot.slane %v2739_v2, 4  ;;  %v2702_v17 = vsel %vm58_vm1, %v4164_v13, %v4118_v60  ;;  %v2900_v16 = vsel %vm669_vm12, %v6539_v36, %v2858_v20  ;;  %v2703_v19 = vsel %vm58_vm1, %v4163_v52, %v4164_v13 }
 0x851   :  { %v4172_v50 = vpop.permute.xlu1 %4171  ;;  %v4182_v26 = vpop.permute.xlu0 %4181  ;;  %v2704_v1 = vsel %vm58_vm1, %v4119_v34, %v4163_v52  ;;  %v2722_v38 = vsel %vm77_vm3, %v4134_v46, %v4178_v25  ;;  %v2906_v35 = vsel %vm669_vm12, %v2778_v23, %v2876_v37  ;;  %v2845_v36 = vrot.slane %v2738_v48, 4 }
 0x852   :  { %v4174_v22 = vunpack.i.h.bf16 %v4172_v50  ;;  %v4173_v60 = vunpack.i.l.bf16 %v4172_v50  ;;  %v4184_v18 = vunpack.i.h.bf16 %v4182_v26  ;;  %v4183_v56 = vunpack.i.l.bf16 %v4182_v26 }
 0x853   :  { %v2827_v20 = vrot.slane %v2702_v17, 4  ;;  %v2720_v53 = vsel %vm77_vm3, %v4179_v42, %v4133_v5  ;;  %v3442_v55 = vpack.c.bf16 %v2906_v35, %v2900_v16  ;;  %v2825_v10 = vrot.slane %v2704_v1, 4 }
 0x854   :  { %v2684_v46 = vsel %vm39_vm0, %v4174_v22, %v4128_v9  ;;  %v2685_v23 = vsel %vm39_vm0, %v4173_v60, %v4174_v22  ;;  %v2686_v30 = vsel %vm39_vm0, %v4129_v47, %v4173_v60  ;;  %v2826_v37 = vrot.slane %v2703_v19, 4 }
 0x855   :  { %v2773_v34 = vpop.permute.xlu1 %2772  ;;  %v2805_v2 = vpop.permute.xlu0 %2804  ;;  %v2721_v5 = vsel %vm77_vm3, %v4178_v25, %v4179_v42  ;;  %3443 = vmatpush1.bf16.msra.mxu1 %v3442_v55  ;;  %v2897_v52 = vsel %vm669_vm12, %v2722_v38, %v2843_v63  ;;  %v2775_v9 = vsel %vm134_vm6, %v4183_v56, %v4184_v18  ;;  %v2891_v47 = vsel %vm669_vm12, %v2686_v30, %v2825_v10 }
 0x856   :  { %v2779_v13 = vsel %vm134_vm6, %v2773_v34, %v6606_v39  ;;  %3223 = vmatprep.subr.msk.mxu1 %vm704_vm13, %v6734_v45  ;;  %v2774_v7 = vsel %vm134_vm6, %v4184_v18, %v2773_v34  ;;  %v2899_v25 = vsel %vm669_vm12, %v2720_v53, %v2845_v36  ;;  %v3222_v39 = vld [vmem:[%s6909_s3 + $0xc] sm:$0xf]  ;;  %v3444_v63 = vpack.c.bf16 %v2897_v52, %v2891_v47 }
 0x857   :  { %v2911_v48 = vsel %vm669_vm12, %v2779_v13, %v2881_v24  ;;  %v2893_v42 = vsel %vm669_vm12, %v2684_v46, %v2827_v20  ;;  %v2892_v50 = vsel %vm669_vm12, %v2685_v23, %v2826_v37  ;;  %v2776_v45 = vsel %vm134_vm6, %v4149_v43, %v4183_v56 }
 0x858   :  { %v3452_v26 = vpack.c.bf16 %v2899_v25, %v2893_v42  ;;  %v2898_v17 = vsel %vm669_vm12, %v2721_v5, %v2844_v12  ;;  %v2903_v24 = vsel %vm669_vm12, %v6579_v21, %v2861_v40  ;;  %v2878_v16 = vrot.slane %v6751_v8, 4  ;;  %3445 = vmatprep.subr.bf16.mxu0 %v3444_v63 }
 0x859   :  { %3224 = vmatpush1.msk.msra.mxu1 %vm704_vm13, %v6711_v33  ;;  %v2807_v19 = vpop.permute.xlu1 %2806  ;;  %v2809_v1 = vpop.permute.xlu0 %2808  ;;  %v3454_v38 = vpack.c.bf16 %v2898_v17, %v2892_v50  ;;  %v2909_v58 = vsel %vm669_vm12, %v2775_v9, %v2879_v4  ;;  %v2905_v43 = vsel %vm669_vm12, %v6556_v51, %v2863_v57  ;;  %v2910_v21 = vsel %vm669_vm12, %v2774_v7, %v2880_v27 }
 0x85a   :  { %3225 = vmatmul.mubr.msk.f32.vlgmr.msra.gmra.mrb[16].mxu1 %vm700_vm14, %v3222_v39  ;;  %3453 = vmatprep.subr.bf16.mxu1 %v3452_v26  ;;  %v3448_v8 = vpack.c.bf16 %v2909_v58, %v2903_v24  ;;  %v3456_v33 = vpack.c.bf16 %v2911_v48, %v2905_v43  ;;  %v7118_v40 = vrot.slane %v6683_v59, 4  ;;  %v2908_v51 = vsel %vm669_vm12, %v2776_v45, %v2878_v16 }
 0x85b   :  { %3447 = vmatpush1.bf16.msra.mxu0 %v7119_v54  ;;  %3455 = vmatpush1.bf16.msra.mxu1 %v3454_v38  ;;  %v2811_v49 = vsel %vm172_vm7, %v2805_v2, %v2807_v19  ;;  %v2815_v27 = vsel %vm172_vm7, %v2809_v1, %v6604_v29  ;;  %v2812_v44 = vsel %vm172_vm7, %v6669_v32, %v2805_v2 }
 0x85c   :  { %v2904_v12 = vsel %vm669_vm12, %v6553_v41, %v7118_v40  ;;  %3449 = vmatprep.subr.bf16.mxu0 %v3448_v8  ;;  %3457 = vmatprep.subr.bf16.mxu1 %v3456_v33  ;;  %v2902_v41 = vsel %vm669_vm12, %v6563_v62, %v2860_v61  ;;  %v2810_v4 = vsel %vm172_vm7, %v2807_v19, %v2809_v1 }
 0x85d   :  { %v3458_v59 = vpack.c.bf16 %v2910_v21, %v2904_v12  ;;  %v3450_v6 = vpack.c.bf16 %v2908_v51, %v2902_v41  ;;  %3145 = vmatprep.mubr.f32.mxu1 %v7097_v14  ;;  %v2915_v29 = vsel %vm669_vm12, %v2811_v49, %v7111_v0  ;;  %v2917_v31 = vsel %vm669_vm12, %v2815_v27, %v7113_v11 }
 0x85e   :  { %v2914_v14 = vsel %vm669_vm12, %v2812_v44, %v7112_v3  ;;  %v2916_v62 = vsel %vm669_vm12, %v2810_v4, %v7114_v28 }
 0x85f   :  { %3451 = vmatpush1.bf16.msra.mxu0 %v3450_v6  ;;  %3459 = vmatpush1.bf16.msra.mxu1 %v3458_v59 }
 0x860   :  { %3226 = vmatprep.subr.msk.mxu0 %vm704_vm13, %v2915_v29  ;;  %3229 = vmatprep.subr.msk.mxu1 %vm704_vm13, %v2917_v31 }
 0x863   :  { %3227 = vmatpush1.msk.msra.mxu0 %vm704_vm13, %v2914_v14  ;;  %3230 = vmatpush1.msk.msra.mxu1 %vm704_vm13, %v2916_v62 }
 0x864   :  { %3228 = vmatmul.mubr.msk.f32.vlgmr.msra.gmra.mrb[14].mxu0 %vm700_vm14, %v3222_v39  ;;  %3231 = vmatmul.mubr.msk.f32.vlgmr.msra.gmra.mrb[18].mxu1 %vm700_vm14, %v3222_v39 }
 0x92d   :  { %v3005_v15 = vpop.f32.mrb[16].mxu1 }
 0x92e   :  { %v3152_v0 = vmax.f32 %v3005_v15, 0.0  ;;  %v3007_v11 = vpop.f32.mrb[17].mxu1 }
 0x92f   :  { %v3153_v32 = vmax.f32 %v3007_v11, 0.0 }
 0x930   :  { %3158 = vst [vmem:[%s6910_s4] sm:$0xf] %v3152_v0 }
 0x931   :  { %3159 = vst [vmem:[%s6910_s4 + $0x8] sm:$0xf] %v3153_v32 }
 0x937   :  { %v3076_v3 = vpop.f32.mrb[14].mxu0  ;;  %v3147_v28 = vpop.f32.mrb[18].mxu1 }
 0x938   :  { %v3154_v61 = vmax.f32 %v3076_v3, 0.0  ;;  %v3156_v57 = vmax.f32 %v3147_v28, 0.0  ;;  %v3078_v35 = vpop.f32.mrb[15].mxu0  ;;  %v3149_v22 = vpop.f32.mrb[19].mxu1 }
 0x939   :  { %v3155_v60 = vmax.f32 %v3078_v35, 0.0  ;;  %v3157_v18 = vmax.f32 %v3149_v22, 0.0 }
 0x93a   :  { %3160 = vst [vmem:[%s6910_s4 + $0x10] sm:$0xf] %v3154_v61  ;;  %3162 = vst [vmem:[%s6910_s4 + $0x20] sm:$0xf] %v3156_v57 }
 0x93b   :  { %3161 = vst [vmem:[%s6910_s4 + $0x18] sm:$0xf] %v3155_v60  ;;  %3163 = vst [vmem:[%s6910_s4 + $0x28] sm:$0xf] %v3157_v18 }

</bundles_post_ra>
